<compile_context>
chip_gen: v6e
topology: v6e:2x2x1
jax: 0.10.0
libtpu: 0.0.40
codegen_flags: <defaults>
</compile_context>

<pallas_src>
import jax
import jax.numpy as jnp
import numpy as np
from jax.experimental import pallas as pl
from jax.experimental.pallas import tpu as pltpu


# -----------------------------------------------------------------------------
# Static geometry (fc_map expects 4 * 33 * 33 = 4356 features => 33x33 maps)
# -----------------------------------------------------------------------------
H = W = 33
HP, WP = H + 2, W + 2            # zero-padded spatial extents (3x3, pad=1)
R = H * WP                       # 1155: rows of the "flat shifted" conv output
                                 #       (includes 2 junk columns per row)
P_IN = 1280                      # conv1 padded-flat input length  (>= 2*WP+2 + R)
DELTA = 128 - (WP + 1)           # 92: extra lane offset so the scratch store is
STORE_OFF = WP + 1 + DELTA       # 128: lane-tile aligned
P_Y1 = 1408                      # scratch length (>= DELTA + 2*WP+2 + R)


# -----------------------------------------------------------------------------
# Fused Pallas kernel: one grid step == one batch element
# -----------------------------------------------------------------------------
def _critic_kernel(xf_ref, xm_ref, mask_ref,
                   w1_ref, b1_ref, w2_ref, b2_ref,
                   wm_ref, bm_ref, wf_ref, bf_ref,
                   wca_ref, wcb_ref, bc_ref, wh_ref, bh_ref,
                   o_ref, y1pad_ref):
    f32 = jnp.float32

    # ---- map_layer1: 3x3 conv as 9 shifted-slice matmuls --------------------
    # xm: (CIN, P_IN), flat index p = h_p*WP + w_p over the zero-padded image.
    xm = xm_ref[0]
    acc1 = jnp.zeros((8, R), f32)
    for dy in range(3):
        for dx in range(3):
            sh = dy * WP + dx
            acc1 = acc1 + jnp.dot(w1_ref[dy * 3 + dx], xm[:, sh:sh + R],
                                  preferred_element_type=f32)
    # bias + relu; zero the junk columns (w >= W) so they cannot pollute the
    # zero-padding of the conv2 input buffer.
    y1 = jnp.maximum(acc1 + b1_ref[...], 0.0) * mask_ref[...]          # (8, R)

    # Stash conv1 output inside a zero-padded flat VMEM buffer for conv2.
    # Flat position p of the padded y1 image lives at lane p + DELTA.
    y1pad_ref[...] = jnp.zeros_like(y1pad_ref)
    y1pad_ref[:, pl.ds(STORE_OFF, R)] = y1
    y1p = y1pad_ref[...]                                               # (8, P_Y1)

    # ---- map_layer2: same trick --------------------------------------------
    acc2 = jnp.zeros((4, R), f32)
    for dy in range(3):
        for dx in range(3):
            s = DELTA + dy * WP + dx
            acc2 = acc2 + jnp.dot(w2_ref[dy * 3 + dx], y1p[:, s:s + R],
                                  preferred_element_type=f32)
    y2 = jnp.maximum(acc2 + b2_ref[...], 0.0)                          # (4, R)

    # ---- fc_map: sum_c y2[c, :] @ Wm[c]  (junk rows of Wm are zero) ---------
    x2p = jnp.dot(y2[0:1, :], wm_ref[0], preferred_element_type=f32)
    for c in range(1, 4):
        x2p = x2p + jnp.dot(y2[c:c + 1, :], wm_ref[c],
                            preferred_element_type=f32)
    x2 = jnp.maximum(x2p + bm_ref[...], 0.0)                           # (1, 32)

    # ---- float branch --------------------------------------------------------
    x1 = jnp.maximum(jnp.dot(xf_ref[0], wf_ref[...],
                             preferred_element_type=f32) + bf_ref[...], 0.0)

    # ---- fc_combined (concat realized via split weights) + fused heads ------
    hcomb = jnp.maximum(
        jnp.dot(x1, wca_ref[...], preferred_element_type=f32)
        + jnp.dot(x2, wcb_ref[...], preferred_element_type=f32)
        + bc_ref[...], 0.0)                                            # (1, 64)
    o_ref[0] = (jnp.dot(hcomb, wh_ref[...], preferred_element_type=f32)
                + bh_ref[...])                                         # (1, 2)


# -----------------------------------------------------------------------------
# One-time parameter preparation (pure layout plumbing, done outside the kernel)
# -----------------------------------------------------------------------------
def prepare_params(params, cin):
    # conv weights: HWIO -> (9, O, I) so w[k] is the (O, I) matrix for tap k.
    w1t = jnp.transpose(params["wc1"], (0, 1, 3, 2)).reshape(9, 8, cin)
    w2t = jnp.transpose(params["wc2"], (0, 1, 3, 2)).reshape(9, 4, 8)
    # fc_map weight: PyTorch flattens NCHW, so rows are (c, h, w). Re-index to
    # the kernel's (c, h*WP + w) layout and zero the junk columns (w >= W).
    wm = params["wm"].reshape(4, H, W, 32)
    wm = jnp.pad(wm, ((0, 0), (0, 0), (0, WP - W), (0, 0))).reshape(4, R, 32)
    mask = jnp.asarray((np.arange(R) % WP < W).astype(np.float32).reshape(1, R))
    return dict(
        mask=mask,
        w1t=w1t, b1=params["bc1"].reshape(8, 1),
        w2t=w2t, b2=params["bc2"].reshape(4, 1),
        wm=wm, bm=params["bm"].reshape(1, 32),
        wf=params["wf"], bf=params["bf"].reshape(1, 32),
        wca=params["wcomb"][:32], wcb=params["wcomb"][32:],
        bc=params["bcomb"].reshape(1, 64),
        wh=jnp.concatenate([params["wmove"], params["wrot"]], axis=1),   # (64, 2)
        bh=jnp.concatenate([params["bmove"], params["brot"]]).reshape(1, 2),
    )


# -----------------------------------------------------------------------------
# Forward
# -----------------------------------------------------------------------------
def critic_forward(x_float, x_map_nchw, prep):
    b, f = x_float.shape
    cin = x_map_nchw.shape[1]

    # zero-pad spatially (pad=1), flatten (h, w) onto the lane axis, pad lanes.
    xp = jnp.pad(x_map_nchw, ((0, 0), (0, 0), (1, 1), (1, 1)))
    xp = xp.reshape(b, cin, HP * WP)
    xp = jnp.pad(xp, ((0, 0), (0, 0), (0, P_IN - HP * WP)))
    xf3 = x_float.reshape(b, 1, f)

    def bcast(shape):
        zeros = (0,) * len(shape)
        return pl.BlockSpec(shape, lambda i, z=zeros: z)

    out3 = pl.pallas_call(
        _critic_kernel,
        out_shape=jax.ShapeDtypeStruct((b, 1, 2), jnp.float32),
        grid=(b,),
        in_specs=[
            pl.BlockSpec((1, 1, f), lambda i: (i, 0, 0)),          # float input
            pl.BlockSpec((1, cin, P_IN), lambda i: (i, 0, 0)),     # padded-flat map
            bcast((1, R)),                                         # junk-col mask
            bcast((9, 8, cin)), bcast((8, 1)),                     # conv1 W^T, b
            bcast((9, 4, 8)), bcast((4, 1)),                       # conv2 W^T, b
            bcast((4, R, 32)), bcast((1, 32)),                     # fc_map
            bcast((f, 32)), bcast((1, 32)),                        # float_layer
            bcast((32, 64)), bcast((32, 64)), bcast((1, 64)),      # fc_combined
            bcast((64, 2)), bcast((1, 2)),                         # fused heads
        ],
        out_specs=pl.BlockSpec((1, 1, 2), lambda i: (i, 0, 0)),
        scratch_shapes=[pltpu.VMEM((8, P_Y1), jnp.float32)],
        compiler_params=pltpu.CompilerParams(
            dimension_semantics=("parallel",),
            vmem_limit_bytes=32 * 1024 * 1024),
    )(xf3, xp, prep["mask"], prep["w1t"], prep["b1"], prep["w2t"], prep["b2"],
      prep["wm"], prep["bm"], prep["wf"], prep["bf"], prep["wca"], prep["wcb"],
      prep["bc"], prep["wh"], prep["bh"])

    out = out3.reshape(b, 2)
    return out[:, 0:1], out[:, 1:2]


# -----------------------------------------------------------------------------
# Pure-JAX reference (for correctness check)
# -----------------------------------------------------------------------------
def critic_reference(x_float, x_map_nchw, params):
    hi = jax.lax.Precision.HIGHEST
    x1 = jax.nn.relu(jnp.dot(x_float, params["wf"], precision=hi) + params["bf"])
    y = jax.lax.conv_general_dilated(
        x_map_nchw, params["wc1"], (1, 1), "SAME",
        dimension_numbers=("NCHW", "HWIO", "NCHW"), precision=hi)
    y = jax.nn.relu(y + params["bc1"][None, :, None, None])
    y = jax.lax.conv_general_dilated(
        y, params["wc2"], (1, 1), "SAME",
        dimension_numbers=("NCHW", "HWIO", "NCHW"), precision=hi)
    y = jax.nn.relu(y + params["bc2"][None, :, None, None])
    x2 = jax.nn.relu(
        jnp.dot(y.reshape(y.shape[0], -1), params["wm"], precision=hi) + params["bm"])
    x = jnp.concatenate([x1, x2], axis=1)
    x = jax.nn.relu(jnp.dot(x, params["wcomb"], precision=hi) + params["bcomb"])
    o_move = jnp.dot(x, params["wmove"], precision=hi) + params["bmove"]
    o_rot = jnp.dot(x, params["wrot"], precision=hi) + params["brot"]
    return o_move, o_rot


# -----------------------------------------------------------------------------
# Main
# -----------------------------------------------------------------------------
if __name__ == "__main__":
    # state_dim = (F, (CIN, 33, 33)); spatial must be 33 since fc_map expects
    # 4 * 33 * 33 = 4356 features.
    B, F, CIN = 2, 8, 4

    key = jax.random.PRNGKey(0)
    ks = jax.random.split(key, 16)

    def init(k, shape, scale=0.1):
        return (scale * jax.random.normal(k, shape)).astype(jnp.float32)

    # Weights stored as (in, out) / HWIO; equivalent to PyTorch weights
    # transposed -- deterministic synthetic init, not a checkpoint load.
    params = {
        "wf": init(ks[0], (F, 32)), "bf": init(ks[1], (32,)),
        "wc1": init(ks[2], (3, 3, CIN, 8)), "bc1": init(ks[3], (8,)),
        "wc2": init(ks[4], (3, 3, 8, 4)), "bc2": init(ks[5], (4,)),
        "wm": init(ks[6], (4 * H * W, 32), 0.02), "bm": init(ks[7], (32,)),
        "wcomb": init(ks[8], (64, 64)), "bcomb": init(ks[9], (64,)),
        "wmove": init(ks[10], (64, 1)), "bmove": init(ks[11], (1,)),
        "wrot": init(ks[12], (64, 1)), "brot": init(ks[13], (1,)),
    }

    x_float = jax.random.normal(ks[14], (B, F), dtype=jnp.float32)
    x_map = jax.random.normal(ks[15], (B, CIN, H, W), dtype=jnp.float32)

    prep = prepare_params(params, CIN)              # one-time layout plumbing

    fwd = jax.jit(critic_forward)
    o_move, o_rot = fwd(x_float, x_map, prep)
    jax.block_until_ready((o_move, o_rot))

    r_move, r_rot = jax.jit(critic_reference)(x_float, x_map, params)
    jax.block_until_ready((r_move, r_rot))

    assert o_move.shape == (B, 1) and o_rot.shape == (B, 1)
    # Kernel uses default (MXU-native) matmul precision; tolerances relaxed
    # accordingly vs. the HIGHEST-precision reference.
    np.testing.assert_allclose(np.asarray(o_move), np.asarray(r_move),
                               rtol=2e-2, atol=5e-3)
    np.testing.assert_allclose(np.asarray(o_rot), np.asarray(r_rot),
                               rtol=2e-2, atol=5e-3)

    print("KERNEL_OK")
</pallas_src>

<mosaic_0001>
module attributes {stable_mosaic.version = 11 : i64} {
  func.func @_critic_kernel(%arg0: i32, %arg1: memref<1x1x8xf32, #tpu.memory_space<vmem>>, %arg2: memref<1x4x1280xf32, #tpu.memory_space<vmem>>, %arg3: memref<1x1155xf32, #tpu.memory_space<vmem>>, %arg4: memref<9x8x4xf32, #tpu.memory_space<vmem>>, %arg5: memref<8x1xf32, #tpu.memory_space<vmem>>, %arg6: memref<9x4x8xf32, #tpu.memory_space<vmem>>, %arg7: memref<4x1xf32, #tpu.memory_space<vmem>>, %arg8: memref<4x1155x32xf32, #tpu.memory_space<vmem>>, %arg9: memref<1x32xf32, #tpu.memory_space<vmem>>, %arg10: memref<8x32xf32, #tpu.memory_space<vmem>>, %arg11: memref<1x32xf32, #tpu.memory_space<vmem>>, %arg12: memref<32x64xf32, #tpu.memory_space<vmem>>, %arg13: memref<32x64xf32, #tpu.memory_space<vmem>>, %arg14: memref<1x64xf32, #tpu.memory_space<vmem>>, %arg15: memref<64x2xf32, #tpu.memory_space<vmem>>, %arg16: memref<1x2xf32, #tpu.memory_space<vmem>>, %arg17: memref<1x1x2xf32, #tpu.memory_space<vmem>>, %arg18: memref<8x1408xf32, #tpu.memory_space<vmem>>) attributes {dimension_semantics = [#tpu.dimension_semantics<parallel>], iteration_bounds = array<i64: 2>, scalar_prefetch = 0 : i64, scratch_operands = 1 : i64, tpu.core_type = #tpu.core_type<tc>, window_params = [{transform_indices = @transform_0, window_bounds = array<i64: 1, 1, 8>}, {transform_indices = @transform_1, window_bounds = array<i64: 1, 4, 1280>}, {pipeline_mode = #tpu.pipeline_mode<synchronous>, transform_indices = @transform_2, window_bounds = array<i64: 1, 1155>}, {pipeline_mode = #tpu.pipeline_mode<synchronous>, transform_indices = @transform_3, window_bounds = array<i64: 9, 8, 4>}, {pipeline_mode = #tpu.pipeline_mode<synchronous>, transform_indices = @transform_4, window_bounds = array<i64: 8, 1>}, {pipeline_mode = #tpu.pipeline_mode<synchronous>, transform_indices = @transform_5, window_bounds = array<i64: 9, 4, 8>}, {pipeline_mode = #tpu.pipeline_mode<synchronous>, transform_indices = @transform_6, window_bounds = array<i64: 4, 1>}, {pipeline_mode = #tpu.pipeline_mode<synchronous>, transform_indices = @transform_7, window_bounds = array<i64: 4, 1155, 32>}, {pipeline_mode = #tpu.pipeline_mode<synchronous>, transform_indices = @transform_8, window_bounds = array<i64: 1, 32>}, {pipeline_mode = #tpu.pipeline_mode<synchronous>, transform_indices = @transform_9, window_bounds = array<i64: 8, 32>}, {pipeline_mode = #tpu.pipeline_mode<synchronous>, transform_indices = @transform_10, window_bounds = array<i64: 1, 32>}, {pipeline_mode = #tpu.pipeline_mode<synchronous>, transform_indices = @transform_11, window_bounds = array<i64: 32, 64>}, {pipeline_mode = #tpu.pipeline_mode<synchronous>, transform_indices = @transform_12, window_bounds = array<i64: 32, 64>}, {pipeline_mode = #tpu.pipeline_mode<synchronous>, transform_indices = @transform_13, window_bounds = array<i64: 1, 64>}, {pipeline_mode = #tpu.pipeline_mode<synchronous>, transform_indices = @transform_14, window_bounds = array<i64: 64, 2>}, {pipeline_mode = #tpu.pipeline_mode<synchronous>, transform_indices = @transform_15, window_bounds = array<i64: 1, 2>}, {transform_indices = @transform_16, window_bounds = array<i64: 1, 1, 2>}]} {
    %c0 = arith.constant 0 : index
    %c0_0 = arith.constant 0 : index
    %c0_1 = arith.constant 0 : index
    %0 = vector.load %arg2[%c0, %c0_0, %c0_1] : memref<1x4x1280xf32, #tpu.memory_space<vmem>>, vector<1x4x1280xf32>
    %1 = vector.shape_cast %0 : vector<1x4x1280xf32> to vector<4x1280xf32>
    %cst = arith.constant 0.000000e+00 : f32
    %2 = vector.broadcast %cst : f32 to vector<8x1155xf32>
    %c0_2 = arith.constant 0 : index
    %c0_3 = arith.constant 0 : index
    %c0_4 = arith.constant 0 : index
    %3 = vector.load %arg4[%c0_2, %c0_3, %c0_4] : memref<9x8x4xf32, #tpu.memory_space<vmem>>, vector<1x8x4xf32>
    %4 = vector.shape_cast %3 : vector<1x8x4xf32> to vector<8x4xf32>
    %5 = vector.extract_strided_slice %1 {offsets = [0, 0], sizes = [4, 1155], strides = [1, 1]} : vector<4x1280xf32> to vector<4x1155xf32>
    %cst_5 = arith.constant dense<0.000000e+00> : vector<8x1155xf32>
    %6 = tpu.matmul %4, %5, %cst_5 {dimension_numbers = #tpu.dot_dimension_numbers<[1], [0], [0], [1], [0, 0, 1, 1], [], []>} : vector<8x4xf32>, vector<4x1155xf32>, vector<8x1155xf32> -> vector<8x1155xf32>
    %7 = arith.addf %2, %6 : vector<8x1155xf32>
    %c1 = arith.constant 1 : index
    %c0_6 = arith.constant 0 : index
    %c0_7 = arith.constant 0 : index
    %8 = vector.load %arg4[%c1, %c0_6, %c0_7] : memref<9x8x4xf32, #tpu.memory_space<vmem>>, vector<1x8x4xf32>
    %9 = vector.shape_cast %8 : vector<1x8x4xf32> to vector<8x4xf32>
    %10 = vector.extract_strided_slice %1 {offsets = [0, 1], sizes = [4, 1155], strides = [1, 1]} : vector<4x1280xf32> to vector<4x1155xf32>
    %cst_8 = arith.constant dense<0.000000e+00> : vector<8x1155xf32>
    %11 = tpu.matmul %9, %10, %cst_8 {dimension_numbers = #tpu.dot_dimension_numbers<[1], [0], [0], [1], [0, 0, 1, 1], [], []>} : vector<8x4xf32>, vector<4x1155xf32>, vector<8x1155xf32> -> vector<8x1155xf32>
    %12 = arith.addf %7, %11 : vector<8x1155xf32>
    %c2 = arith.constant 2 : index
    %c0_9 = arith.constant 0 : index
    %c0_10 = arith.constant 0 : index
    %13 = vector.load %arg4[%c2, %c0_9, %c0_10] : memref<9x8x4xf32, #tpu.memory_space<vmem>>, vector<1x8x4xf32>
    %14 = vector.shape_cast %13 : vector<1x8x4xf32> to vector<8x4xf32>
    %15 = vector.extract_strided_slice %1 {offsets = [0, 2], sizes = [4, 1155], strides = [1, 1]} : vector<4x1280xf32> to vector<4x1155xf32>
    %cst_11 = arith.constant dense<0.000000e+00> : vector<8x1155xf32>
    %16 = tpu.matmul %14, %15, %cst_11 {dimension_numbers = #tpu.dot_dimension_numbers<[1], [0], [0], [1], [0, 0, 1, 1], [], []>} : vector<8x4xf32>, vector<4x1155xf32>, vector<8x1155xf32> -> vector<8x1155xf32>
    %17 = arith.addf %12, %16 : vector<8x1155xf32>
    %c3 = arith.constant 3 : index
    %c0_12 = arith.constant 0 : index
    %c0_13 = arith.constant 0 : index
    %18 = vector.load %arg4[%c3, %c0_12, %c0_13] : memref<9x8x4xf32, #tpu.memory_space<vmem>>, vector<1x8x4xf32>
    %19 = vector.shape_cast %18 : vector<1x8x4xf32> to vector<8x4xf32>
    %20 = vector.extract_strided_slice %1 {offsets = [0, 35], sizes = [4, 1155], strides = [1, 1]} : vector<4x1280xf32> to vector<4x1155xf32>
    %cst_14 = arith.constant dense<0.000000e+00> : vector<8x1155xf32>
    %21 = tpu.matmul %19, %20, %cst_14 {dimension_numbers = #tpu.dot_dimension_numbers<[1], [0], [0], [1], [0, 0, 1, 1], [], []>} : vector<8x4xf32>, vector<4x1155xf32>, vector<8x1155xf32> -> vector<8x1155xf32>
    %22 = arith.addf %17, %21 : vector<8x1155xf32>
    %c4 = arith.constant 4 : index
    %c0_15 = arith.constant 0 : index
    %c0_16 = arith.constant 0 : index
    %23 = vector.load %arg4[%c4, %c0_15, %c0_16] : memref<9x8x4xf32, #tpu.memory_space<vmem>>, vector<1x8x4xf32>
    %24 = vector.shape_cast %23 : vector<1x8x4xf32> to vector<8x4xf32>
    %25 = vector.extract_strided_slice %1 {offsets = [0, 36], sizes = [4, 1155], strides = [1, 1]} : vector<4x1280xf32> to vector<4x1155xf32>
    %cst_17 = arith.constant dense<0.000000e+00> : vector<8x1155xf32>
    %26 = tpu.matmul %24, %25, %cst_17 {dimension_numbers = #tpu.dot_dimension_numbers<[1], [0], [0], [1], [0, 0, 1, 1], [], []>} : vector<8x4xf32>, vector<4x1155xf32>, vector<8x1155xf32> -> vector<8x1155xf32>
    %27 = arith.addf %22, %26 : vector<8x1155xf32>
    %c5 = arith.constant 5 : index
    %c0_18 = arith.constant 0 : index
    %c0_19 = arith.constant 0 : index
    %28 = vector.load %arg4[%c5, %c0_18, %c0_19] : memref<9x8x4xf32, #tpu.memory_space<vmem>>, vector<1x8x4xf32>
    %29 = vector.shape_cast %28 : vector<1x8x4xf32> to vector<8x4xf32>
    %30 = vector.extract_strided_slice %1 {offsets = [0, 37], sizes = [4, 1155], strides = [1, 1]} : vector<4x1280xf32> to vector<4x1155xf32>
    %cst_20 = arith.constant dense<0.000000e+00> : vector<8x1155xf32>
    %31 = tpu.matmul %29, %30, %cst_20 {dimension_numbers = #tpu.dot_dimension_numbers<[1], [0], [0], [1], [0, 0, 1, 1], [], []>} : vector<8x4xf32>, vector<4x1155xf32>, vector<8x1155xf32> -> vector<8x1155xf32>
    %32 = arith.addf %27, %31 : vector<8x1155xf32>
    %c6 = arith.constant 6 : index
    %c0_21 = arith.constant 0 : index
    %c0_22 = arith.constant 0 : index
    %33 = vector.load %arg4[%c6, %c0_21, %c0_22] : memref<9x8x4xf32, #tpu.memory_space<vmem>>, vector<1x8x4xf32>
    %34 = vector.shape_cast %33 : vector<1x8x4xf32> to vector<8x4xf32>
    %35 = vector.extract_strided_slice %1 {offsets = [0, 70], sizes = [4, 1155], strides = [1, 1]} : vector<4x1280xf32> to vector<4x1155xf32>
    %cst_23 = arith.constant dense<0.000000e+00> : vector<8x1155xf32>
    %36 = tpu.matmul %34, %35, %cst_23 {dimension_numbers = #tpu.dot_dimension_numbers<[1], [0], [0], [1], [0, 0, 1, 1], [], []>} : vector<8x4xf32>, vector<4x1155xf32>, vector<8x1155xf32> -> vector<8x1155xf32>
    %37 = arith.addf %32, %36 : vector<8x1155xf32>
    %c7 = arith.constant 7 : index
    %c0_24 = arith.constant 0 : index
    %c0_25 = arith.constant 0 : index
    %38 = vector.load %arg4[%c7, %c0_24, %c0_25] : memref<9x8x4xf32, #tpu.memory_space<vmem>>, vector<1x8x4xf32>
    %39 = vector.shape_cast %38 : vector<1x8x4xf32> to vector<8x4xf32>
    %40 = vector.extract_strided_slice %1 {offsets = [0, 71], sizes = [4, 1155], strides = [1, 1]} : vector<4x1280xf32> to vector<4x1155xf32>
    %cst_26 = arith.constant dense<0.000000e+00> : vector<8x1155xf32>
    %41 = tpu.matmul %39, %40, %cst_26 {dimension_numbers = #tpu.dot_dimension_numbers<[1], [0], [0], [1], [0, 0, 1, 1], [], []>} : vector<8x4xf32>, vector<4x1155xf32>, vector<8x1155xf32> -> vector<8x1155xf32>
    %42 = arith.addf %37, %41 : vector<8x1155xf32>
    %c8 = arith.constant 8 : index
    %c0_27 = arith.constant 0 : index
    %c0_28 = arith.constant 0 : index
    %43 = vector.load %arg4[%c8, %c0_27, %c0_28] : memref<9x8x4xf32, #tpu.memory_space<vmem>>, vector<1x8x4xf32>
    %44 = vector.shape_cast %43 : vector<1x8x4xf32> to vector<8x4xf32>
    %45 = vector.extract_strided_slice %1 {offsets = [0, 72], sizes = [4, 1155], strides = [1, 1]} : vector<4x1280xf32> to vector<4x1155xf32>
    %cst_29 = arith.constant dense<0.000000e+00> : vector<8x1155xf32>
    %46 = tpu.matmul %44, %45, %cst_29 {dimension_numbers = #tpu.dot_dimension_numbers<[1], [0], [0], [1], [0, 0, 1, 1], [], []>} : vector<8x4xf32>, vector<4x1155xf32>, vector<8x1155xf32> -> vector<8x1155xf32>
    %47 = arith.addf %42, %46 : vector<8x1155xf32>
    %c0_30 = arith.constant 0 : index
    %c0_31 = arith.constant 0 : index
    %48 = vector.load %arg5[%c0_30, %c0_31] : memref<8x1xf32, #tpu.memory_space<vmem>>, vector<8x1xf32>
    %49 = vector.broadcast %48 : vector<8x1xf32> to vector<8x1155xf32>
    %50 = arith.addf %47, %49 : vector<8x1155xf32>
    %cst_32 = arith.constant 0.000000e+00 : f32
    %51 = vector.broadcast %cst_32 : f32 to vector<8x1155xf32>
    %52 = arith.maximumf %50, %51 : vector<8x1155xf32>
    %c0_33 = arith.constant 0 : index
    %c0_34 = arith.constant 0 : index
    %53 = vector.load %arg3[%c0_33, %c0_34] : memref<1x1155xf32, #tpu.memory_space<vmem>>, vector<1x1155xf32>
    %54 = vector.broadcast %53 : vector<1x1155xf32> to vector<8x1155xf32>
    %55 = arith.mulf %52, %54 : vector<8x1155xf32>
    %cst_35 = arith.constant 0.000000e+00 : f32
    %56 = vector.broadcast %cst_35 : f32 to vector<8x1408xf32>
    %c0_36 = arith.constant 0 : index
    %c0_37 = arith.constant 0 : index
    %57 = vector.load %arg18[%c0_36, %c0_37] : memref<8x1408xf32, #tpu.memory_space<vmem>>, vector<8x1408xf32>
    tpu.vector_store %arg18[%c0_36, %c0_37], %56 {strides = array<i32>} : memref<8x1408xf32, #tpu.memory_space<vmem>>, vector<8x1408xf32>,
    %c0_38 = arith.constant 0 : index
    %c128 = arith.constant 128 : index
    %58 = vector.load %arg18[%c0_38, %c128] : memref<8x1408xf32, #tpu.memory_space<vmem>>, vector<8x1155xf32>
    tpu.vector_store %arg18[%c0_38, %c128], %55 {strides = array<i32>} : memref<8x1408xf32, #tpu.memory_space<vmem>>, vector<8x1155xf32>,
    %c0_39 = arith.constant 0 : index
    %c0_40 = arith.constant 0 : index
    %59 = vector.load %arg18[%c0_39, %c0_40] : memref<8x1408xf32, #tpu.memory_space<vmem>>, vector<8x1408xf32>
    %cst_41 = arith.constant 0.000000e+00 : f32
    %60 = vector.broadcast %cst_41 : f32 to vector<4x1155xf32>
    %c0_42 = arith.constant 0 : index
    %c0_43 = arith.constant 0 : index
    %c0_44 = arith.constant 0 : index
    %61 = vector.load %arg6[%c0_42, %c0_43, %c0_44] : memref<9x4x8xf32, #tpu.memory_space<vmem>>, vector<1x4x8xf32>
    %62 = vector.shape_cast %61 : vector<1x4x8xf32> to vector<4x8xf32>
    %63 = vector.extract_strided_slice %59 {offsets = [0, 92], sizes = [8, 1155], strides = [1, 1]} : vector<8x1408xf32> to vector<8x1155xf32>
    %cst_45 = arith.constant dense<0.000000e+00> : vector<4x1155xf32>
    %64 = tpu.matmul %62, %63, %cst_45 {dimension_numbers = #tpu.dot_dimension_numbers<[1], [0], [0], [1], [0, 0, 1, 1], [], []>} : vector<4x8xf32>, vector<8x1155xf32>, vector<4x1155xf32> -> vector<4x1155xf32>
    %65 = arith.addf %60, %64 : vector<4x1155xf32>
    %c1_46 = arith.constant 1 : index
    %c0_47 = arith.constant 0 : index
    %c0_48 = arith.constant 0 : index
    %66 = vector.load %arg6[%c1_46, %c0_47, %c0_48] : memref<9x4x8xf32, #tpu.memory_space<vmem>>, vector<1x4x8xf32>
    %67 = vector.shape_cast %66 : vector<1x4x8xf32> to vector<4x8xf32>
    %68 = vector.extract_strided_slice %59 {offsets = [0, 93], sizes = [8, 1155], strides = [1, 1]} : vector<8x1408xf32> to vector<8x1155xf32>
    %cst_49 = arith.constant dense<0.000000e+00> : vector<4x1155xf32>
    %69 = tpu.matmul %67, %68, %cst_49 {dimension_numbers = #tpu.dot_dimension_numbers<[1], [0], [0], [1], [0, 0, 1, 1], [], []>} : vector<4x8xf32>, vector<8x1155xf32>, vector<4x1155xf32> -> vector<4x1155xf32>
    %70 = arith.addf %65, %69 : vector<4x1155xf32>
    %c2_50 = arith.constant 2 : index
    %c0_51 = arith.constant 0 : index
    %c0_52 = arith.constant 0 : index
    %71 = vector.load %arg6[%c2_50, %c0_51, %c0_52] : memref<9x4x8xf32, #tpu.memory_space<vmem>>, vector<1x4x8xf32>
    %72 = vector.shape_cast %71 : vector<1x4x8xf32> to vector<4x8xf32>
    %73 = vector.extract_strided_slice %59 {offsets = [0, 94], sizes = [8, 1155], strides = [1, 1]} : vector<8x1408xf32> to vector<8x1155xf32>
    %cst_53 = arith.constant dense<0.000000e+00> : vector<4x1155xf32>
    %74 = tpu.matmul %72, %73, %cst_53 {dimension_numbers = #tpu.dot_dimension_numbers<[1], [0], [0], [1], [0, 0, 1, 1], [], []>} : vector<4x8xf32>, vector<8x1155xf32>, vector<4x1155xf32> -> vector<4x1155xf32>
    %75 = arith.addf %70, %74 : vector<4x1155xf32>
    %c3_54 = arith.constant 3 : index
    %c0_55 = arith.constant 0 : index
    %c0_56 = arith.constant 0 : index
    %76 = vector.load %arg6[%c3_54, %c0_55, %c0_56] : memref<9x4x8xf32, #tpu.memory_space<vmem>>, vector<1x4x8xf32>
    %77 = vector.shape_cast %76 : vector<1x4x8xf32> to vector<4x8xf32>
    %78 = vector.extract_strided_slice %59 {offsets = [0, 127], sizes = [8, 1155], strides = [1, 1]} : vector<8x1408xf32> to vector<8x1155xf32>
    %cst_57 = arith.constant dense<0.000000e+00> : vector<4x1155xf32>
    %79 = tpu.matmul %77, %78, %cst_57 {dimension_numbers = #tpu.dot_dimension_numbers<[1], [0], [0], [1], [0, 0, 1, 1], [], []>} : vector<4x8xf32>, vector<8x1155xf32>, vector<4x1155xf32> -> vector<4x1155xf32>
    %80 = arith.addf %75, %79 : vector<4x1155xf32>
    %c4_58 = arith.constant 4 : index
    %c0_59 = arith.constant 0 : index
    %c0_60 = arith.constant 0 : index
    %81 = vector.load %arg6[%c4_58, %c0_59, %c0_60] : memref<9x4x8xf32, #tpu.memory_space<vmem>>, vector<1x4x8xf32>
    %82 = vector.shape_cast %81 : vector<1x4x8xf32> to vector<4x8xf32>
    %83 = vector.extract_strided_slice %59 {offsets = [0, 128], sizes = [8, 1155], strides = [1, 1]} : vector<8x1408xf32> to vector<8x1155xf32>
    %cst_61 = arith.constant dense<0.000000e+00> : vector<4x1155xf32>
    %84 = tpu.matmul %82, %83, %cst_61 {dimension_numbers = #tpu.dot_dimension_numbers<[1], [0], [0], [1], [0, 0, 1, 1], [], []>} : vector<4x8xf32>, vector<8x1155xf32>, vector<4x1155xf32> -> vector<4x1155xf32>
    %85 = arith.addf %80, %84 : vector<4x1155xf32>
    %c5_62 = arith.constant 5 : index
    %c0_63 = arith.constant 0 : index
    %c0_64 = arith.constant 0 : index
    %86 = vector.load %arg6[%c5_62, %c0_63, %c0_64] : memref<9x4x8xf32, #tpu.memory_space<vmem>>, vector<1x4x8xf32>
    %87 = vector.shape_cast %86 : vector<1x4x8xf32> to vector<4x8xf32>
    %88 = vector.extract_strided_slice %59 {offsets = [0, 129], sizes = [8, 1155], strides = [1, 1]} : vector<8x1408xf32> to vector<8x1155xf32>
    %cst_65 = arith.constant dense<0.000000e+00> : vector<4x1155xf32>
    %89 = tpu.matmul %87, %88, %cst_65 {dimension_numbers = #tpu.dot_dimension_numbers<[1], [0], [0], [1], [0, 0, 1, 1], [], []>} : vector<4x8xf32>, vector<8x1155xf32>, vector<4x1155xf32> -> vector<4x1155xf32>
    %90 = arith.addf %85, %89 : vector<4x1155xf32>
    %c6_66 = arith.constant 6 : index
    %c0_67 = arith.constant 0 : index
    %c0_68 = arith.constant 0 : index
    %91 = vector.load %arg6[%c6_66, %c0_67, %c0_68] : memref<9x4x8xf32, #tpu.memory_space<vmem>>, vector<1x4x8xf32>
    %92 = vector.shape_cast %91 : vector<1x4x8xf32> to vector<4x8xf32>
    %93 = vector.extract_strided_slice %59 {offsets = [0, 162], sizes = [8, 1155], strides = [1, 1]} : vector<8x1408xf32> to vector<8x1155xf32>
    %cst_69 = arith.constant dense<0.000000e+00> : vector<4x1155xf32>
    %94 = tpu.matmul %92, %93, %cst_69 {dimension_numbers = #tpu.dot_dimension_numbers<[1], [0], [0], [1], [0, 0, 1, 1], [], []>} : vector<4x8xf32>, vector<8x1155xf32>, vector<4x1155xf32> -> vector<4x1155xf32>
    %95 = arith.addf %90, %94 : vector<4x1155xf32>
    %c7_70 = arith.constant 7 : index
    %c0_71 = arith.constant 0 : index
    %c0_72 = arith.constant 0 : index
    %96 = vector.load %arg6[%c7_70, %c0_71, %c0_72] : memref<9x4x8xf32, #tpu.memory_space<vmem>>, vector<1x4x8xf32>
    %97 = vector.shape_cast %96 : vector<1x4x8xf32> to vector<4x8xf32>
    %98 = vector.extract_strided_slice %59 {offsets = [0, 163], sizes = [8, 1155], strides = [1, 1]} : vector<8x1408xf32> to vector<8x1155xf32>
    %cst_73 = arith.constant dense<0.000000e+00> : vector<4x1155xf32>
    %99 = tpu.matmul %97, %98, %cst_73 {dimension_numbers = #tpu.dot_dimension_numbers<[1], [0], [0], [1], [0, 0, 1, 1], [], []>} : vector<4x8xf32>, vector<8x1155xf32>, vector<4x1155xf32> -> vector<4x1155xf32>
    %100 = arith.addf %95, %99 : vector<4x1155xf32>
    %c8_74 = arith.constant 8 : index
    %c0_75 = arith.constant 0 : index
    %c0_76 = arith.constant 0 : index
    %101 = vector.load %arg6[%c8_74, %c0_75, %c0_76] : memref<9x4x8xf32, #tpu.memory_space<vmem>>, vector<1x4x8xf32>
    %102 = vector.shape_cast %101 : vector<1x4x8xf32> to vector<4x8xf32>
    %103 = vector.extract_strided_slice %59 {offsets = [0, 164], sizes = [8, 1155], strides = [1, 1]} : vector<8x1408xf32> to vector<8x1155xf32>
    %cst_77 = arith.constant dense<0.000000e+00> : vector<4x1155xf32>
    %104 = tpu.matmul %102, %103, %cst_77 {dimension_numbers = #tpu.dot_dimension_numbers<[1], [0], [0], [1], [0, 0, 1, 1], [], []>} : vector<4x8xf32>, vector<8x1155xf32>, vector<4x1155xf32> -> vector<4x1155xf32>
    %105 = arith.addf %100, %104 : vector<4x1155xf32>
    %c0_78 = arith.constant 0 : index
    %c0_79 = arith.constant 0 : index
    %106 = vector.load %arg7[%c0_78, %c0_79] : memref<4x1xf32, #tpu.memory_space<vmem>>, vector<4x1xf32>
    %107 = vector.broadcast %106 : vector<4x1xf32> to vector<4x1155xf32>
    %108 = arith.addf %105, %107 : vector<4x1155xf32>
    %cst_80 = arith.constant 0.000000e+00 : f32
    %109 = vector.broadcast %cst_80 : f32 to vector<4x1155xf32>
    %110 = arith.maximumf %108, %109 : vector<4x1155xf32>
    %111 = vector.extract_strided_slice %110 {offsets = [0, 0], sizes = [1, 1155], strides = [1, 1]} : vector<4x1155xf32> to vector<1x1155xf32>
    %c0_81 = arith.constant 0 : index
    %c0_82 = arith.constant 0 : index
    %c0_83 = arith.constant 0 : index
    %112 = vector.load %arg8[%c0_81, %c0_82, %c0_83] : memref<4x1155x32xf32, #tpu.memory_space<vmem>>, vector<1x1155x32xf32>
    %113 = vector.shape_cast %112 : vector<1x1155x32xf32> to vector<1155x32xf32>
    %cst_84 = arith.constant dense<0.000000e+00> : vector<1x32xf32>
    %114 = tpu.matmul %111, %113, %cst_84 {dimension_numbers = #tpu.dot_dimension_numbers<[1], [0], [0], [1], [0, 0, 1, 1], [], []>} : vector<1x1155xf32>, vector<1155x32xf32>, vector<1x32xf32> -> vector<1x32xf32>
    %115 = vector.extract_strided_slice %110 {offsets = [1, 0], sizes = [1, 1155], strides = [1, 1]} : vector<4x1155xf32> to vector<1x1155xf32>
    %c1_85 = arith.constant 1 : index
    %c0_86 = arith.constant 0 : index
    %c0_87 = arith.constant 0 : index
    %116 = vector.load %arg8[%c1_85, %c0_86, %c0_87] : memref<4x1155x32xf32, #tpu.memory_space<vmem>>, vector<1x1155x32xf32>
    %117 = vector.shape_cast %116 : vector<1x1155x32xf32> to vector<1155x32xf32>
    %cst_88 = arith.constant dense<0.000000e+00> : vector<1x32xf32>
    %118 = tpu.matmul %115, %117, %cst_88 {dimension_numbers = #tpu.dot_dimension_numbers<[1], [0], [0], [1], [0, 0, 1, 1], [], []>} : vector<1x1155xf32>, vector<1155x32xf32>, vector<1x32xf32> -> vector<1x32xf32>
    %119 = arith.addf %114, %118 : vector<1x32xf32>
    %120 = vector.extract_strided_slice %110 {offsets = [2, 0], sizes = [1, 1155], strides = [1, 1]} : vector<4x1155xf32> to vector<1x1155xf32>
    %c2_89 = arith.constant 2 : index
    %c0_90 = arith.constant 0 : index
    %c0_91 = arith.constant 0 : index
    %121 = vector.load %arg8[%c2_89, %c0_90, %c0_91] : memref<4x1155x32xf32, #tpu.memory_space<vmem>>, vector<1x1155x32xf32>
    %122 = vector.shape_cast %121 : vector<1x1155x32xf32> to vector<1155x32xf32>
    %cst_92 = arith.constant dense<0.000000e+00> : vector<1x32xf32>
    %123 = tpu.matmul %120, %122, %cst_92 {dimension_numbers = #tpu.dot_dimension_numbers<[1], [0], [0], [1], [0, 0, 1, 1], [], []>} : vector<1x1155xf32>, vector<1155x32xf32>, vector<1x32xf32> -> vector<1x32xf32>
    %124 = arith.addf %119, %123 : vector<1x32xf32>
    %125 = vector.extract_strided_slice %110 {offsets = [3, 0], sizes = [1, 1155], strides = [1, 1]} : vector<4x1155xf32> to vector<1x1155xf32>
    %c3_93 = arith.constant 3 : index
    %c0_94 = arith.constant 0 : index
    %c0_95 = arith.constant 0 : index
    %126 = vector.load %arg8[%c3_93, %c0_94, %c0_95] : memref<4x1155x32xf32, #tpu.memory_space<vmem>>, vector<1x1155x32xf32>
    %127 = vector.shape_cast %126 : vector<1x1155x32xf32> to vector<1155x32xf32>
    %cst_96 = arith.constant dense<0.000000e+00> : vector<1x32xf32>
    %128 = tpu.matmul %125, %127, %cst_96 {dimension_numbers = #tpu.dot_dimension_numbers<[1], [0], [0], [1], [0, 0, 1, 1], [], []>} : vector<1x1155xf32>, vector<1155x32xf32>, vector<1x32xf32> -> vector<1x32xf32>
    %129 = arith.addf %124, %128 : vector<1x32xf32>
    %c0_97 = arith.constant 0 : index
    %c0_98 = arith.constant 0 : index
    %130 = vector.load %arg9[%c0_97, %c0_98] : memref<1x32xf32, #tpu.memory_space<vmem>>, vector<1x32xf32>
    %131 = arith.addf %129, %130 : vector<1x32xf32>
    %cst_99 = arith.constant 0.000000e+00 : f32
    %132 = vector.broadcast %cst_99 : f32 to vector<1x32xf32>
    %133 = arith.maximumf %131, %132 : vector<1x32xf32>
    %c0_100 = arith.constant 0 : index
    %c0_101 = arith.constant 0 : index
    %c0_102 = arith.constant 0 : index
    %134 = vector.load %arg1[%c0_100, %c0_101, %c0_102] : memref<1x1x8xf32, #tpu.memory_space<vmem>>, vector<1x1x8xf32>
    %135 = vector.shape_cast %134 : vector<1x1x8xf32> to vector<1x8xf32>
    %c0_103 = arith.constant 0 : index
    %c0_104 = arith.constant 0 : index
    %136 = vector.load %arg10[%c0_103, %c0_104] : memref<8x32xf32, #tpu.memory_space<vmem>>, vector<8x32xf32>
    %cst_105 = arith.constant dense<0.000000e+00> : vector<1x32xf32>
    %137 = tpu.matmul %135, %136, %cst_105 {dimension_numbers = #tpu.dot_dimension_numbers<[1], [0], [0], [1], [0, 0, 1, 1], [], []>} : vector<1x8xf32>, vector<8x32xf32>, vector<1x32xf32> -> vector<1x32xf32>
    %c0_106 = arith.constant 0 : index
    %c0_107 = arith.constant 0 : index
    %138 = vector.load %arg11[%c0_106, %c0_107] : memref<1x32xf32, #tpu.memory_space<vmem>>, vector<1x32xf32>
    %139 = arith.addf %137, %138 : vector<1x32xf32>
    %cst_108 = arith.constant 0.000000e+00 : f32
    %140 = vector.broadcast %cst_108 : f32 to vector<1x32xf32>
    %141 = arith.maximumf %139, %140 : vector<1x32xf32>
    %c0_109 = arith.constant 0 : index
    %c0_110 = arith.constant 0 : index
    %142 = vector.load %arg12[%c0_109, %c0_110] : memref<32x64xf32, #tpu.memory_space<vmem>>, vector<32x64xf32>
    %cst_111 = arith.constant dense<0.000000e+00> : vector<1x64xf32>
    %143 = tpu.matmul %141, %142, %cst_111 {dimension_numbers = #tpu.dot_dimension_numbers<[1], [0], [0], [1], [0, 0, 1, 1], [], []>} : vector<1x32xf32>, vector<32x64xf32>, vector<1x64xf32> -> vector<1x64xf32>
    %c0_112 = arith.constant 0 : index
    %c0_113 = arith.constant 0 : index
    %144 = vector.load %arg13[%c0_112, %c0_113] : memref<32x64xf32, #tpu.memory_space<vmem>>, vector<32x64xf32>
    %cst_114 = arith.constant dense<0.000000e+00> : vector<1x64xf32>
    %145 = tpu.matmul %133, %144, %cst_114 {dimension_numbers = #tpu.dot_dimension_numbers<[1], [0], [0], [1], [0, 0, 1, 1], [], []>} : vector<1x32xf32>, vector<32x64xf32>, vector<1x64xf32> -> vector<1x64xf32>
    %146 = arith.addf %143, %145 : vector<1x64xf32>
    %c0_115 = arith.constant 0 : index
    %c0_116 = arith.constant 0 : index
    %147 = vector.load %arg14[%c0_115, %c0_116] : memref<1x64xf32, #tpu.memory_space<vmem>>, vector<1x64xf32>
    %148 = arith.addf %146, %147 : vector<1x64xf32>
    %cst_117 = arith.constant 0.000000e+00 : f32
    %149 = vector.broadcast %cst_117 : f32 to vector<1x64xf32>
    %150 = arith.maximumf %148, %149 : vector<1x64xf32>
    %c0_118 = arith.constant 0 : index
    %c0_119 = arith.constant 0 : index
    %151 = vector.load %arg15[%c0_118, %c0_119] : memref<64x2xf32, #tpu.memory_space<vmem>>, vector<64x2xf32>
    %cst_120 = arith.constant dense<0.000000e+00> : vector<1x2xf32>
    %152 = tpu.matmul %150, %151, %cst_120 {dimension_numbers = #tpu.dot_dimension_numbers<[1], [0], [0], [1], [0, 0, 1, 1], [], []>} : vector<1x64xf32>, vector<64x2xf32>, vector<1x2xf32> -> vector<1x2xf32>
    %c0_121 = arith.constant 0 : index
    %c0_122 = arith.constant 0 : index
    %153 = vector.load %arg16[%c0_121, %c0_122] : memref<1x2xf32, #tpu.memory_space<vmem>>, vector<1x2xf32>
    %154 = arith.addf %152, %153 : vector<1x2xf32>
    %c0_123 = arith.constant 0 : index
    %c0_124 = arith.constant 0 : index
    %c0_125 = arith.constant 0 : index
    %155 = vector.load %arg17[%c0_123, %c0_124, %c0_125] : memref<1x1x2xf32, #tpu.memory_space<vmem>>, vector<1x1x2xf32>
    %156 = vector.shape_cast %155 : vector<1x1x2xf32> to vector<1x2xf32>
    %157 = vector.shape_cast %154 : vector<1x2xf32> to vector<1x1x2xf32>
    tpu.vector_store %arg17[%c0_123, %c0_124, %c0_125], %157 {strides = array<i32>} : memref<1x1x2xf32, #tpu.memory_space<vmem>>, vector<1x1x2xf32>,
    return
  }
  func.func @transform_0(%arg0: i32) -> (i32, i32, i32) {
    %c0_i32 = arith.constant 0 : i32
    %c0_i32_0 = arith.constant 0 : i32
    %c0_i32_1 = arith.constant 0 : i32
    return %arg0, %c0_i32, %c0_i32_0 : i32, i32, i32
  }
  func.func @transform_1(%arg0: i32) -> (i32, i32, i32) {
    %c0_i32 = arith.constant 0 : i32
    %c0_i32_0 = arith.constant 0 : i32
    %c0_i32_1 = arith.constant 0 : i32
    return %arg0, %c0_i32, %c0_i32_0 : i32, i32, i32
  }
  func.func @transform_2(%arg0: i32) -> (i32, i32) {
    %c0_i32 = arith.constant 0 : i32
    %c0_i32_0 = arith.constant 0 : i32
    %c0_i32_1 = arith.constant 0 : i32
    return %c0_i32, %c0_i32_0 : i32, i32
  }
  func.func @transform_3(%arg0: i32) -> (i32, i32, i32) {
    %c0_i32 = arith.constant 0 : i32
    %c0_i32_0 = arith.constant 0 : i32
    %c0_i32_1 = arith.constant 0 : i32
    %c0_i32_2 = arith.constant 0 : i32
    return %c0_i32, %c0_i32_0, %c0_i32_1 : i32, i32, i32
  }
  func.func @transform_4(%arg0: i32) -> (i32, i32) {
    %c0_i32 = arith.constant 0 : i32
    %c0_i32_0 = arith.constant 0 : i32
    %c0_i32_1 = arith.constant 0 : i32
    return %c0_i32, %c0_i32_0 : i32, i32
  }
  func.func @transform_5(%arg0: i32) -> (i32, i32, i32) {
    %c0_i32 = arith.constant 0 : i32
    %c0_i32_0 = arith.constant 0 : i32
    %c0_i32_1 = arith.constant 0 : i32
    %c0_i32_2 = arith.constant 0 : i32
    return %c0_i32, %c0_i32_0, %c0_i32_1 : i32, i32, i32
  }
  func.func @transform_6(%arg0: i32) -> (i32, i32) {
    %c0_i32 = arith.constant 0 : i32
    %c0_i32_0 = arith.constant 0 : i32
    %c0_i32_1 = arith.constant 0 : i32
    return %c0_i32, %c0_i32_0 : i32, i32
  }
  func.func @transform_7(%arg0: i32) -> (i32, i32, i32) {
    %c0_i32 = arith.constant 0 : i32
    %c0_i32_0 = arith.constant 0 : i32
    %c0_i32_1 = arith.constant 0 : i32
    %c0_i32_2 = arith.constant 0 : i32
    return %c0_i32, %c0_i32_0, %c0_i32_1 : i32, i32, i32
  }
  func.func @transform_8(%arg0: i32) -> (i32, i32) {
    %c0_i32 = arith.constant 0 : i32
    %c0_i32_0 = arith.constant 0 : i32
    %c0_i32_1 = arith.constant 0 : i32
    return %c0_i32, %c0_i32_0 : i32, i32
  }
  func.func @transform_9(%arg0: i32) -> (i32, i32) {
    %c0_i32 = arith.constant 0 : i32
    %c0_i32_0 = arith.constant 0 : i32
    %c0_i32_1 = arith.constant 0 : i32
    return %c0_i32, %c0_i32_0 : i32, i32
  }
  func.func @transform_10(%arg0: i32) -> (i32, i32) {
    %c0_i32 = arith.constant 0 : i32
    %c0_i32_0 = arith.constant 0 : i32
    %c0_i32_1 = arith.constant 0 : i32
    return %c0_i32, %c0_i32_0 : i32, i32
  }
  func.func @transform_11(%arg0: i32) -> (i32, i32) {
    %c0_i32 = arith.constant 0 : i32
    %c0_i32_0 = arith.constant 0 : i32
    %c0_i32_1 = arith.constant 0 : i32
    return %c0_i32, %c0_i32_0 : i32, i32
  }
  func.func @transform_12(%arg0: i32) -> (i32, i32) {
    %c0_i32 = arith.constant 0 : i32
    %c0_i32_0 = arith.constant 0 : i32
    %c0_i32_1 = arith.constant 0 : i32
    return %c0_i32, %c0_i32_0 : i32, i32
  }
  func.func @transform_13(%arg0: i32) -> (i32, i32) {
    %c0_i32 = arith.constant 0 : i32
    %c0_i32_0 = arith.constant 0 : i32
    %c0_i32_1 = arith.constant 0 : i32
    return %c0_i32, %c0_i32_0 : i32, i32
  }
  func.func @transform_14(%arg0: i32) -> (i32, i32) {
    %c0_i32 = arith.constant 0 : i32
    %c0_i32_0 = arith.constant 0 : i32
    %c0_i32_1 = arith.constant 0 : i32
    return %c0_i32, %c0_i32_0 : i32, i32
  }
  func.func @transform_15(%arg0: i32) -> (i32, i32) {
    %c0_i32 = arith.constant 0 : i32
    %c0_i32_0 = arith.constant 0 : i32
    %c0_i32_1 = arith.constant 0 : i32
    return %c0_i32, %c0_i32_0 : i32, i32
  }
  func.func @transform_16(%arg0: i32) -> (i32, i32, i32) {
    %c0_i32 = arith.constant 0 : i32
    %c0_i32_0 = arith.constant 0 : i32
    %c0_i32_1 = arith.constant 0 : i32
    return %arg0, %c0_i32, %c0_i32_0 : i32, i32, i32
  }
}

</mosaic_0001>

<bundles_post_ra>
// kernel: critic_forward.1
= control target key start
LH: loop header
LB: loop body
LE: loop exit
PB: predicated region body
PF: predicated region fallthrough
CT: control target
= control target key end

     0   :  { %s11943_s21 = smov 0   ;;  %s15317_s0 = inlined_call_operand.vmem [shape: f32[2,1,8], index: 0, kind: input, shape index: {}]   ;;  %s15318_s1 = inlined_call_operand.vmem [shape: f32[2,4,1280], index: 1, kind: input, shape index: {}]   ;;  %s15319_s2 = inlined_call_operand.vmem [shape: f32[1,1155], index: 2, kind: input, shape index: {}]   ;;  %s15320_s3 = inlined_call_operand.vmem [shape: f32[9,8,4], index: 3, kind: input, shape index: {}]   ;;  %s15321_s4 = inlined_call_operand.vmem [shape: f32[8,1], index: 4, kind: input, shape index: {}]   ;;  %s15322_s5 = inlined_call_operand.vmem [shape: f32[9,4,8], index: 5, kind: input, shape index: {}]   ;;  %s15323_s6 = inlined_call_operand.vmem [shape: f32[4,1], index: 6, kind: input, shape index: {}]   ;;  %s15324_s7 = inlined_call_operand.vmem [shape: f32[4,1155,32], index: 7, kind: input, shape index: {}]   ;;  %s15325_s8 = inlined_call_operand.vmem [shape: f32[1,32], index: 8, kind: input, shape index: {}]   ;;  %s15326_s9 = inlined_call_operand.vmem [shape: f32[8,32], index: 9, kind: input, shape index: {}]   ;;  %s15327_s10 = inlined_call_operand.vmem [shape: f32[1,32], index: 10, kind: input, shape index: {}]   ;;  %s15328_s11 = inlined_call_operand.vmem [shape: f32[32,64], index: 11, kind: input, shape index: {}]   ;;  %s15329_s12 = inlined_call_operand.vmem [shape: f32[32,64], index: 12, kind: input, shape index: {}]   ;;  %s15330_s13 = inlined_call_operand.vmem [shape: f32[1,64], index: 13, kind: input, shape index: {}]   ;;  %s15331_s14 = inlined_call_operand.vmem [shape: f32[64,2], index: 14, kind: input, shape index: {}]   ;;  %s15332_s15 = inlined_call_operand.vmem [shape: f32[1,2], index: 15, kind: input, shape index: {}]   ;;  %s15333_s16 = inlined_call_operand.vmem [shape: f32[2,1,2], index: 16, kind: output, shape index: {}]  }
   0x1   :  { %15334 = sst [smem:[#allocation17_spill]] %s15317_s0 }
   0x2 LB: > { %s10520_s22 = sadd.s32 4294967295, %s11840_s21   ;;  %p10524_p0 = scmp.ge.s32.totalorder %s11840_s21, 1  ;;  %s11840_s21 = sphi %s11943_s21, %s26_s21  }
   0x3   : > { %p470_p1 = scmp.lt.s32.totalorder %s11840_s21, 3 }
   0x5   : > { %p471_p2 = pnand %p10524_p0, %p470_p1 }
   0x7   : > { %474 = sbr.rel (%p471_p2) target bundleno = 1868 (0x74c), region = 84 }
   0xc   : > { %p521_p3 = scmp.lt.s32.totalorder %s10520_s22, 1  ;;  %s11842_s27 = smov 127   ;;  %v11843_v3 = vmov 0.0   ;;  %vm570_vm0 = vcmask 1039360   ;;  %vm584_vm1 = vcmask 1043456   ;;  %v10526_v17 = vld [vmem:[%s15320_s3 + $0x8] sm:$0xff] }
   0xd   : > { %4368 = vst [vmem:[#allocation2] sm:$0xff] %v11843_v3  ;;  %4378 = vst [vmem:[#allocation2 + $0x50] sm:$0xff] %v11843_v3  ;;  %740 = vmatprep.mubr.f32.mxu1 %v11843_v3  ;;  %669 = vmatprep.mubr.f32.mxu0 %v11843_v3  ;;  %s11844_s28 = smov 126   ;;  %s11845_s29 = smov 93   ;;  %vm580_vm2 = vcmask 31744   ;;  %v537_v33 = vld [vmem:[%s15320_s3] sm:$0xff] }
   0xe   : > { %s15365_s22 = smov (!%p521_p3, %s10520_s22), 1  ;;  %s11846_s30 = smov 92   ;;  %vm1360_vm3 = vcmask 1031168   ;;  %v10557_v47 = vld [vmem:[%s15320_s3 + $0x10] sm:$0xff]  ;;  %vm1780_vm4 = vcmask 760832   ;;  %v10573_v60 = vld [vmem:[%s15320_s3 + $0x18] sm:$0xff] }
   0xf   : > { %s11798_s23 = smul.u32 40, %s15365_s22  ;;  %s11847_s0 = smov 91   ;;  %v4278_v62 = vld [vmem:[%s15321_s4] sm:$0xff]  ;;  %v11851_v63 = vmov 0   ;;  %vm2200_vm5 = vcmask 752640   ;;  %vm2620_vm6 = vcmask 744448  }
  0x10   : > { %s11848_s17 = smov 58   ;;  %s11849_s18 = smov 57   ;;  %11823 = vset.pattern.permute.xlu0 %v11851_v63  ;;  %11824 = vset.pattern.permute.xlu1 %v11851_v63  ;;  %vm3040_vm7 = vcmask 474112   ;;  %vm3460_vm8 = vcmask 465920   ;;  %vm3880_vm9 = vcmask 457728   ;;  %vm4388_vm10 = vcmask 23552  }
  0x11   : > { %s528_s26 = scalar_lea.vmem %s15318_s1, %s11798_s23  ;;  %s11850_s25 = smov 56   ;;  %vm5233_vm11 = vcmask 277504   ;;  %vm5646_vm12 = vcmask 7168   ;;  %vm4434_vm13 = vcmask 285696   ;;  %vm4454_vm14 = vcmask 64512  }
  0x12   : > { %v11957_v0 = vld [vmem:[%s528_s26 + $0x10] sm:$0xff]  ;;  %v11959_v1 = vld [vmem:[%s528_s26 + $0x8] sm:$0xff]  ;;  %v11965_v2 = vld [vmem:[%s528_s26] sm:$0xff]  ;;  %s11852_s20 = smov 35   ;;  %s11853_s23 = smov 36   ;;  %vm4833_vm15 = vcmask 293888  }
  0x13   : > { %558 = vrot.lane.b32.xlu0 %v11957_v0, %s11842_s27  ;;  %554 = vrot.lane.b32.xlu1 %v11959_v1, %s11842_s27  ;;  %v11969_v4 = vld [vmem:[%s528_s26 + $0x18] sm:$0xff]  ;;  %v11973_v5 = vcombine.high %v11965_v2, %v11965_v2  ;;  %v11983_v6 = vcombine.high %v11959_v1, %v11959_v1  ;;  %v11995_v8 = vcombine.high %v11957_v0, %v11957_v0  ;;  %v11997_v9 = vld [vmem:[%s528_s26 + $0x20] sm:$0xff]  ;;  %s11854_s24 = smov 34  }
  0x14   : > { %v11987_v7 = vcombine.high %v11969_v4, %v11969_v4  ;;  %v12005_v10 = vcombine.high %v11997_v9, %v11997_v9 }
  0x17   : > { %550 = vrot.lane.b32.xlu0 %v11965_v2, %s11842_s27  ;;  %552 = vrot.lane.b32.xlu1 %v11973_v5, %s11842_s27 }
  0x1b   : > { %556 = vrot.lane.b32.xlu0 %v11983_v6, %s11842_s27  ;;  %564 = vrot.lane.b32.xlu1 %v11987_v7, %s11842_s27 }
  0x1f   : > { %566 = vrot.lane.b32.xlu0 %v11997_v9, %s11842_s27  ;;  %560 = vrot.lane.b32.xlu1 %v11995_v8, %s11842_s27 }
  0x23   : > { %562 = vrot.lane.b32.xlu0 %v11969_v4, %s11842_s27  ;;  %568 = vrot.lane.b32.xlu1 %v12005_v10, %s11842_s27 }
  0x27   : > { %1346 = vrot.lane.b32.xlu0 %v11983_v6, %s11844_s28  ;;  %1348 = vrot.lane.b32.xlu1 %v11957_v0, %s11844_s28 }
  0x2b   : > { %1342 = vrot.lane.b32.xlu0 %v11973_v5, %s11844_s28  ;;  %1344 = vrot.lane.b32.xlu1 %v11959_v1, %s11844_s28 }
  0x2f   : > { %1340 = vrot.lane.b32.xlu0 %v11965_v2, %s11844_s28  ;;  %1354 = vrot.lane.b32.xlu1 %v11987_v7, %s11844_s28 }
  0x33   : > { %1356 = vrot.lane.b32.xlu0 %v11997_v9, %s11844_s28  ;;  %1350 = vrot.lane.b32.xlu1 %v11995_v8, %s11844_s28 }
  0x37   : > { %1352 = vrot.lane.b32.xlu0 %v11969_v4, %s11844_s28  ;;  %1762 = vrot.lane.b32.xlu1 %v11973_v5, %s11845_s29 }
  0x3b   : > { %1764 = vrot.lane.b32.xlu0 %v11959_v1, %s11845_s29  ;;  %1760 = vrot.lane.b32.xlu1 %v11965_v2, %s11845_s29 }
  0x3f   : > { %1358 = vrot.lane.b32.xlu0 %v12005_v10, %s11844_s28  ;;  %1770 = vrot.lane.b32.xlu1 %v11995_v8, %s11845_s29 }
  0x43   : > { %1772 = vrot.lane.b32.xlu0 %v11969_v4, %s11845_s29  ;;  %1766 = vrot.lane.b32.xlu1 %v11983_v6, %s11845_s29 }
  0x47   : > { %1768 = vrot.lane.b32.xlu0 %v11957_v0, %s11845_s29  ;;  %1774 = vrot.lane.b32.xlu1 %v11987_v7, %s11845_s29 }
  0x4b   : > { %1776 = vrot.lane.b32.xlu0 %v11997_v9, %s11845_s29  ;;  %1778 = vrot.lane.b32.xlu1 %v12005_v10, %s11845_s29 }
  0x4f   : > { %2186 = vrot.lane.b32.xlu0 %v11983_v6, %s11846_s30  ;;  %2188 = vrot.lane.b32.xlu1 %v11957_v0, %s11846_s30 }
  0x53   : > { %2182 = vrot.lane.b32.xlu0 %v11973_v5, %s11846_s30  ;;  %2184 = vrot.lane.b32.xlu1 %v11959_v1, %s11846_s30 }
  0x57   : > { %2180 = vrot.lane.b32.xlu0 %v11965_v2, %s11846_s30  ;;  %2194 = vrot.lane.b32.xlu1 %v11987_v7, %s11846_s30 }
  0x5b   : > { %2196 = vrot.lane.b32.xlu0 %v11997_v9, %s11846_s30  ;;  %2190 = vrot.lane.b32.xlu1 %v11995_v8, %s11846_s30 }
  0x5f   : > { %2192 = vrot.lane.b32.xlu0 %v11969_v4, %s11846_s30  ;;  %2602 = vrot.lane.b32.xlu1 %v11973_v5, %s11847_s0 }
  0x63   : > { %2604 = vrot.lane.b32.xlu0 %v11959_v1, %s11847_s0  ;;  %2600 = vrot.lane.b32.xlu1 %v11965_v2, %s11847_s0 }
  0x67   : > { %2198 = vrot.lane.b32.xlu0 %v12005_v10, %s11846_s30  ;;  %2610 = vrot.lane.b32.xlu1 %v11995_v8, %s11847_s0 }
  0x6b   : > { %2612 = vrot.lane.b32.xlu0 %v11969_v4, %s11847_s0  ;;  %2606 = vrot.lane.b32.xlu1 %v11983_v6, %s11847_s0 }
  0x6f   : > { %2608 = vrot.lane.b32.xlu0 %v11957_v0, %s11847_s0  ;;  %2614 = vrot.lane.b32.xlu1 %v11987_v7, %s11847_s0 }
  0x73   : > { %2616 = vrot.lane.b32.xlu0 %v11997_v9, %s11847_s0  ;;  %2618 = vrot.lane.b32.xlu1 %v12005_v10, %s11847_s0 }
  0x77   : > { %3026 = vrot.lane.b32.xlu0 %v11983_v6, %s11848_s17  ;;  %3028 = vrot.lane.b32.xlu1 %v11957_v0, %s11848_s17 }
  0x7b   : > { %3022 = vrot.lane.b32.xlu0 %v11973_v5, %s11848_s17  ;;  %3024 = vrot.lane.b32.xlu1 %v11959_v1, %s11848_s17 }
  0x7f   : > { %3020 = vrot.lane.b32.xlu0 %v11965_v2, %s11848_s17  ;;  %3034 = vrot.lane.b32.xlu1 %v11987_v7, %s11848_s17 }
  0x83   : > { %3036 = vrot.lane.b32.xlu0 %v11997_v9, %s11848_s17  ;;  %3030 = vrot.lane.b32.xlu1 %v11995_v8, %s11848_s17 }
  0x85   : > { %v559_v11 = vpop.permute.xlu0 %558  ;;  %v555_v12 = vpop.permute.xlu1 %554 }
  0x87   : > { %3032 = vrot.lane.b32.xlu0 %v11969_v4, %s11848_s17  ;;  %3442 = vrot.lane.b32.xlu1 %v11973_v5, %s11849_s18 }
  0x89   : > { %v551_v13 = vpop.permute.xlu0 %550  ;;  %v553_v14 = vpop.permute.xlu1 %552 }
  0x8a   : > { %v572_v15 = vsel %vm570_vm0, %v553_v14, %v555_v12  ;;  %v571_v16 = vsel %vm570_vm0, %v551_v13, %v553_v14 }
  0x8b   : > { %3444 = vrot.lane.b32.xlu0 %v11959_v1, %s11849_s18  ;;  %3440 = vrot.lane.b32.xlu1 %v11965_v2, %s11849_s18 }
  0x8c   : > { %10527 = vmatprep.subr.msk.mxu0 %vm584_vm1, %v572_v15 }
  0x8d   : > { %10528 = vmatpush1.msk.msra.mxu0 %vm584_vm1, %v571_v16  ;;  %v557_v18 = vpop.permute.xlu0 %556  ;;  %v565_v19 = vpop.permute.xlu1 %564  ;;  %v10589_v16 = vld [vmem:[%s15320_s3 + $0x20] sm:$0xff] }
  0x8e   : > { %v574_v20 = vsel %vm570_vm0, %v557_v18, %v559_v11  ;;  %v573_v21 = vsel %vm570_vm0, %v555_v12, %v557_v18  ;;  %10529 = vmatmul.mubr.msk.f32.vlgmr.msra.gmra.mxu0 %vm580_vm2, %v10526_v17 }
  0x8f   : > { %10530 = vmatprep.subr.msk.mxu1 %vm584_vm1, %v574_v20  ;;  %3038 = vrot.lane.b32.xlu0 %v12005_v10, %s11848_s17 }
  0x90   : > { %3450 = vrot.lane.b32.xlu1 %v11995_v8, %s11849_s18  ;;  %10531 = vmatpush1.msk.msra.mxu1 %vm584_vm1, %v573_v21 }
  0x91   : > { %v567_v22 = vpop.permute.xlu0 %566  ;;  %v561_v23 = vpop.permute.xlu1 %560  ;;  %10532 = vmatmul.mubr.msk.f32.vlgmr.msra.gmra.mxu1 %vm580_vm2, %v10526_v17  ;;  %811 = vmatprep.mubr.f32.mxu0 %v11843_v3 }
  0x92   : > { %v578_v24 = vsel %vm570_vm0, %v565_v19, %v567_v22  ;;  %882 = vmatprep.mubr.f32.mxu1 %v11843_v3  ;;  %v575_v29 = vsel %vm570_vm0, %v559_v11, %v561_v23 }
  0x93   : > { %3452 = vrot.lane.b32.xlu0 %v11969_v4, %s11849_s18  ;;  %10536 = vmatprep.subr.msk.mxu1 %vm584_vm1, %v578_v24 }
  0x94   : > { %3446 = vrot.lane.b32.xlu1 %v11983_v6, %s11849_s18 }
  0x95   : > { %v563_v25 = vpop.permute.xlu0 %562  ;;  %v569_v26 = vpop.permute.xlu1 %568 }
  0x96   : > { %v577_v27 = vsel %vm570_vm0, %v563_v25, %v565_v19  ;;  %v576_v28 = vsel %vm570_vm0, %v561_v23, %v563_v25  ;;  %v579_v32 = vsel %vm570_vm0, %v567_v22, %v569_v26 }
  0x97   : > { %3448 = vrot.lane.b32.xlu0 %v11957_v0, %s11849_s18  ;;  %10533 = vmatprep.subr.msk.mxu0 %vm584_vm1, %v576_v28 }
  0x98   : > { %3454 = vrot.lane.b32.xlu1 %v11987_v7, %s11849_s18  ;;  %10537 = vmatpush1.msk.msra.mxu1 %vm584_vm1, %v577_v27 }
  0x99   : > { %10534 = vmatpush1.msk.msra.mxu0 %vm584_vm1, %v575_v29  ;;  %10538 = vmatmul.mubr.msk.f32.vlgmr.msra.gmra.mxu1 %vm580_vm2, %v10526_v17  ;;  %v1347_v30 = vpop.permute.xlu0 %1346  ;;  %v12131_v31 = vpop.permute.xlu1 %1348 }
  0x9a   : > { %10535 = vmatmul.mubr.msk.f32.vlgmr.msra.gmra.mxu0 %vm580_vm2, %v10526_v17  ;;  %10539 = vmatprep.subr.msk.mxu0 %vm584_vm1, %v569_v26  ;;  %v1364_v38 = vsel %vm1360_vm3, %v1347_v30, %v12131_v31 }
  0x9b   : > { %10540 = vmatpush1.msk.msra.mxu0 %vm584_vm1, %v579_v32  ;;  %10542 = vmatprep.subr.msk.mxu1 %vm584_vm1, %v11973_v5 }
  0x9c   : > { %3456 = vrot.lane.b32.xlu0 %v11997_v9, %s11849_s18  ;;  %3458 = vrot.lane.b32.xlu1 %v12005_v10, %s11849_s18  ;;  %s11856_s18 = smov 94  }
  0x9d   : > { %10543 = vmatpush1.msk.msra.mxu1 %vm584_vm1, %v11965_v2  ;;  %1047 = vmatprep.mubr.f32.mxu1 %v11843_v3  ;;  %v1343_v34 = vpop.permute.xlu0 %1342  ;;  %v1345_v35 = vpop.permute.xlu1 %1344 }
  0x9e   : > { %953 = vmatprep.mubr.f32.mxu0 %v11843_v3  ;;  %10544 = vmatmul.mubr.msk.f32.vlgmr.msra.gmra.mxu1 %vm580_vm2, %v537_v33  ;;  %v1362_v41 = vsel %vm1360_vm3, %v1343_v34, %v1345_v35  ;;  %v1363_v42 = vsel %vm1360_vm3, %v1345_v35, %v1347_v30 }
  0x9f   : > { %10541 = vmatmul.mubr.msk.f32.vlgmr.msra.gmra.mxu0 %vm580_vm2, %v10526_v17  ;;  %10548 = vmatprep.subr.msk.mxu1 %vm584_vm1, %v11995_v8 }
  0xa0   : > { %10545 = vmatprep.subr.msk.mxu0 %vm584_vm1, %v11983_v6  ;;  %10549 = vmatpush1.msk.msra.mxu1 %vm584_vm1, %v11957_v0 }
  0xa1   : > { %3866 = vrot.lane.b32.xlu0 %v11983_v6, %s11850_s25  ;;  %3868 = vrot.lane.b32.xlu1 %v11957_v0, %s11850_s25  ;;  %v1341_v36 = vpop.permute.xlu0 %1340  ;;  %v1355_v37 = vpop.permute.xlu1 %1354 }
  0xa2   : > { %10546 = vmatpush1.msk.msra.mxu0 %vm584_vm1, %v11959_v1  ;;  %1189 = vmatprep.mubr.f32.mxu1 %v11843_v3  ;;  %v1361_v46 = vsel %vm1360_vm3, %v1341_v36, %v1343_v34  ;;  %v10605_v34 = vld [vmem:[%s15320_s3 + $0x28] sm:$0xff] }
  0xa3   : > { %10554 = vmatprep.subr.msk.mxu1 %vm584_vm1, %v12005_v10  ;;  %1118 = vmatprep.mubr.f32.mxu0 %v11843_v3 }
  0xa4   : > { %10550 = vmatmul.mubr.msk.f32.vlgmr.msra.gmra.mxu1 %vm580_vm2, %v537_v33  ;;  %10551 = vmatprep.subr.msk.mxu0 %vm584_vm1, %v11987_v7 }
  0xa5   : > { %10555 = vmatpush1.msk.msra.mxu1 %vm584_vm1, %v11997_v9  ;;  %10547 = vmatmul.mubr.msk.f32.vlgmr.msra.gmra.mxu0 %vm580_vm2, %v537_v33  ;;  %v1357_v39 = vpop.permute.xlu0 %1356  ;;  %v1351_v40 = vpop.permute.xlu1 %1350 }
  0xa6   : > { %10552 = vmatpush1.msk.msra.mxu0 %vm584_vm1, %v11969_v4  ;;  %10561 = vmatprep.subr.msk.mxu1 %vm584_vm1, %v1364_v38  ;;  %v1368_v43 = vsel %vm1360_vm3, %v1355_v37, %v1357_v39  ;;  %v1365_v53 = vsel %vm1360_vm3, %v12131_v31, %v1351_v40 }
  0xa7   : > { %10558 = vmatprep.subr.msk.mxu0 %vm584_vm1, %v1362_v41  ;;  %3862 = vrot.lane.b32.xlu0 %v11973_v5, %s11850_s25 }
  0xa8   : > { %3864 = vrot.lane.b32.xlu1 %v11959_v1, %s11850_s25  ;;  %1331 = vmatprep.mubr.f32.mxu1 %v11843_v3 }
  0xa9   : > { %1260 = vmatprep.mubr.f32.mxu0 %v11843_v3  ;;  %10556 = vmatmul.mubr.msk.f32.vlgmr.msra.gmra.mxu1 %vm580_vm2, %v537_v33  ;;  %v1353_v44 = vpop.permute.xlu0 %1352  ;;  %v1763_v45 = vpop.permute.xlu1 %1762 }
  0xaa   : > { %10562 = vmatpush1.msk.msra.mxu1 %vm584_vm1, %v1363_v42  ;;  %10553 = vmatmul.mubr.msk.f32.vlgmr.msra.gmra.mxu0 %vm580_vm2, %v537_v33  ;;  %v1366_v48 = vsel %vm1360_vm3, %v1351_v40, %v1353_v44  ;;  %v1367_v49 = vsel %vm1360_vm3, %v1353_v44, %v1355_v37 }
  0xab   : > { %10559 = vmatpush1.msk.msra.mxu0 %vm584_vm1, %v1361_v46  ;;  %3860 = vrot.lane.b32.xlu0 %v11965_v2, %s11850_s25 }
  0xac   : > { %3874 = vrot.lane.b32.xlu1 %v11987_v7, %s11850_s25  ;;  %10567 = vmatprep.subr.msk.mxu1 %vm584_vm1, %v1368_v43 }
  0xad   : > { %1528 = vmatprep.mubr.f32.mxu1 %v11843_v3  ;;  %1457 = vmatprep.mubr.f32.mxu0 %v11843_v3  ;;  %v1765_v50 = vpop.permute.xlu0 %1764  ;;  %v1761_v51 = vpop.permute.xlu1 %1760 }
  0xae   : > { %10563 = vmatmul.mubr.msk.f32.vlgmr.msra.gmra.mxu1 %vm580_vm2, %v10557_v47  ;;  %10564 = vmatprep.subr.msk.mxu0 %vm584_vm1, %v1366_v48  ;;  %v1782_v52 = vsel %vm1780_vm4, %v1763_v45, %v1765_v50  ;;  %v1781_v54 = vsel %vm1780_vm4, %v1761_v51, %v1763_v45 }
  0xaf   : > { %3876 = vrot.lane.b32.xlu0 %v11997_v9, %s11850_s25  ;;  %10568 = vmatpush1.msk.msra.mxu1 %vm584_vm1, %v1367_v49 }
  0xb0   : > { %3870 = vrot.lane.b32.xlu1 %v11995_v8, %s11850_s25  ;;  %10560 = vmatmul.mubr.msk.f32.vlgmr.msra.gmra.mxu0 %vm580_vm2, %v10557_v47 }
  0xb1   : > { %10565 = vmatpush1.msk.msra.mxu0 %vm584_vm1, %v1365_v53  ;;  %1670 = vmatprep.mubr.f32.mxu1 %v11843_v3  ;;  %v1359_v55 = vpop.permute.xlu0 %1358  ;;  %v1771_v56 = vpop.permute.xlu1 %1770 }
  0xb2   : > { %10574 = vmatprep.subr.msk.mxu1 %vm584_vm1, %v1782_v52  ;;  %10569 = vmatmul.mubr.msk.f32.vlgmr.msra.gmra.mxu1 %vm580_vm2, %v10557_v47  ;;  %v1369_v57 = vsel %vm1360_vm3, %v1357_v39, %v1359_v55  ;;  %vm10229_vm3 = vcmask 261120  }
  0xb3   : > { %3872 = vrot.lane.b32.xlu0 %v11969_v4, %s11850_s25  ;;  %10575 = vmatpush1.msk.msra.mxu1 %vm584_vm1, %v1781_v54 }
  0xb4   : > { %1599 = vmatprep.mubr.f32.mxu0 %v11843_v3  ;;  %10570 = vmatprep.subr.msk.mxu0 %vm584_vm1, %v1359_v55 }
  0xb5   : > { %10566 = vmatmul.mubr.msk.f32.vlgmr.msra.gmra.mxu0 %vm580_vm2, %v10557_v47  ;;  %3878 = vrot.lane.b32.xlu1 %v12005_v10, %s11850_s25  ;;  %v1773_v58 = vpop.permute.xlu0 %1772  ;;  %v1767_v59 = vpop.permute.xlu1 %1766  ;;  %s11855_s25 = smov 1  }
  0xb6   : > { %10571 = vmatpush1.msk.msra.mxu0 %vm584_vm1, %v1369_v57  ;;  %v1786_v61 = vsel %vm1780_vm4, %v1771_v56, %v1773_v58  ;;  %1877 = vmatprep.mubr.f32.mxu1 %v11843_v3  ;;  %v1783_v5 = vsel %vm1780_vm4, %v1765_v50, %v1767_v59 }
  0xb7   : > { %10580 = vmatprep.subr.msk.mxu1 %vm584_vm1, %v1786_v61  ;;  %1741 = vmatprep.mubr.f32.mxu0 %v11843_v3 }
  0xb8   : > { %10576 = vmatmul.mubr.msk.f32.vlgmr.msra.gmra.mxu1 %vm580_vm2, %v10573_v60  ;;  %4281 = vperm.xlu0 %11823, %v4278_v62  }
  0xb9   : > { %v1769_v0 = vpop.permute.xlu0 %1768  ;;  %v1775_v1 = vpop.permute.xlu1 %1774  ;;  %10572 = vmatmul.mubr.msk.f32.vlgmr.msra.gmra.mxu0 %vm580_vm2, %v10557_v47  ;;  %2019 = vmatprep.mubr.f32.mxu1 %v11843_v3 }
  0xba   : > { %v1785_v2 = vsel %vm1780_vm4, %v1769_v0, %v1771_v56  ;;  %v1784_v4 = vsel %vm1780_vm4, %v1767_v59, %v1769_v0  ;;  %1948 = vmatprep.mubr.f32.mxu0 %v11843_v3  ;;  %v1787_v10 = vsel %vm1780_vm4, %v1773_v58, %v1775_v1  ;;  %v10621_v56 = vld [vmem:[%s15320_s3 + $0x30] sm:$0xff]  ;;  %4813 = vrot.lane.b32.xlu1 %v11843_v3, %s11853_s23 }
  0xbb   : > { %10577 = vmatprep.subr.msk.mxu0 %vm584_vm1, %v1784_v4  ;;  %10581 = vmatpush1.msk.msra.mxu1 %vm584_vm1, %v1785_v2 }
  0xbc   : > { %10578 = vmatpush1.msk.msra.mxu0 %vm584_vm1, %v1783_v5  ;;  %10582 = vmatmul.mubr.msk.f32.vlgmr.msra.gmra.mxu1 %vm580_vm2, %v10573_v60 }
  0xbd   : > { %v1777_v6 = vpop.permute.xlu0 %1776  ;;  %v1779_v7 = vpop.permute.xlu1 %1778  ;;  %10579 = vmatmul.mubr.msk.f32.vlgmr.msra.gmra.mxu0 %vm580_vm2, %v10573_v60  ;;  %2161 = vmatprep.mubr.f32.mxu1 %v11843_v3 }
  0xbe   : > { %v1789_v8 = vsel %vm1780_vm4, %v1777_v6, %v1779_v7  ;;  %10586 = vmatprep.subr.msk.mxu1 %vm584_vm1, %v1779_v7  ;;  %v1788_v9 = vsel %vm1780_vm4, %v1775_v1, %v1777_v6  ;;  %2090 = vmatprep.mubr.f32.mxu0 %v11843_v3 }
  0xbf   : > { %10583 = vmatprep.subr.msk.mxu0 %vm584_vm1, %v1788_v9  ;;  %10587 = vmatpush1.msk.msra.mxu1 %vm584_vm1, %v1789_v8 }
  0xc0   : > { %10584 = vmatpush1.msk.msra.mxu0 %vm584_vm1, %v1787_v10  ;;  %10588 = vmatmul.mubr.msk.f32.vlgmr.msra.gmra.mxu1 %vm580_vm2, %v10573_v60 }
  0xc1   : > { %v2187_v11 = vpop.permute.xlu0 %2186  ;;  %v2189_v12 = vpop.permute.xlu1 %2188  ;;  %10585 = vmatmul.mubr.msk.f32.vlgmr.msra.gmra.mxu0 %vm580_vm2, %v10573_v60  ;;  %2368 = vmatprep.mubr.f32.mxu1 %v11843_v3 }
  0xc2   : > { %v2204_v13 = vsel %vm2200_vm5, %v2187_v11, %v2189_v12  ;;  %2297 = vmatprep.mubr.f32.mxu0 %v11843_v3  ;;  %4414 = vrot.lane.b32.xlu0 %v11843_v3, %s11852_s20 }
  0xc3   : > { %10593 = vmatprep.subr.msk.mxu1 %vm584_vm1, %v2204_v13  ;;  %5624 = vrot.lane.b32.xlu1 %v11843_v3, %s11855_s25 }
  0xc5   : > { %v2183_v14 = vpop.permute.xlu0 %2182  ;;  %v2185_v15 = vpop.permute.xlu1 %2184 }
  0xc6   : > { %v2203_v17 = vsel %vm2200_vm5, %v2185_v15, %v2187_v11  ;;  %v2202_v18 = vsel %vm2200_vm5, %v2183_v14, %v2185_v15  ;;  %v10637_v11 = vld [vmem:[%s15320_s3 + $0x38] sm:$0xff]  ;;  %5213 = vrot.lane.b32.xlu0 %v11843_v3, %s11854_s24 }
  0xc7   : > { %10590 = vmatprep.subr.msk.mxu0 %vm584_vm1, %v2202_v18  ;;  %10594 = vmatpush1.msk.msra.mxu1 %vm584_vm1, %v2203_v17 }
  0xc8   : > { %10595 = vmatmul.mubr.msk.f32.vlgmr.msra.gmra.mxu1 %vm580_vm2, %v10589_v16 }
  0xc9   : > { %v2181_v19 = vpop.permute.xlu0 %2180  ;;  %v2195_v20 = vpop.permute.xlu1 %2194  ;;  %2510 = vmatprep.mubr.f32.mxu1 %v11843_v3 }
  0xca   : > { %v2201_v21 = vsel %vm2200_vm5, %v2181_v19, %v2183_v14 }
  0xcb   : > { %10591 = vmatpush1.msk.msra.mxu0 %vm584_vm1, %v2201_v21 }
  0xcc   : > { %10592 = vmatmul.mubr.msk.f32.vlgmr.msra.gmra.mxu0 %vm580_vm2, %v10589_v16 }
  0xcd   : > { %v2197_v22 = vpop.permute.xlu0 %2196  ;;  %v2191_v23 = vpop.permute.xlu1 %2190  ;;  %2439 = vmatprep.mubr.f32.mxu0 %v11843_v3 }
  0xce   : > { %v2208_v24 = vsel %vm2200_vm5, %v2195_v20, %v2197_v22  ;;  %v2205_v29 = vsel %vm2200_vm5, %v2189_v12, %v2191_v23 }
  0xcf   : > { %10599 = vmatprep.subr.msk.mxu1 %vm584_vm1, %v2208_v24 }
  0xd1   : > { %v2193_v25 = vpop.permute.xlu0 %2192  ;;  %v2603_v26 = vpop.permute.xlu1 %2602 }
  0xd2   : > { %v2207_v27 = vsel %vm2200_vm5, %v2193_v25, %v2195_v20  ;;  %v2206_v28 = vsel %vm2200_vm5, %v2191_v23, %v2193_v25 }
  0xd3   : > { %10596 = vmatprep.subr.msk.mxu0 %vm584_vm1, %v2206_v28  ;;  %10600 = vmatpush1.msk.msra.mxu1 %vm584_vm1, %v2207_v27 }
  0xd4   : > { %10597 = vmatpush1.msk.msra.mxu0 %vm584_vm1, %v2205_v29  ;;  %10601 = vmatmul.mubr.msk.f32.vlgmr.msra.gmra.mxu1 %vm580_vm2, %v10589_v16 }
  0xd5   : > { %v2605_v30 = vpop.permute.xlu0 %2604  ;;  %10598 = vmatmul.mubr.msk.f32.vlgmr.msra.gmra.mxu0 %vm580_vm2, %v10589_v16  ;;  %v2601_v31 = vpop.permute.xlu1 %2600  ;;  %2717 = vmatprep.mubr.f32.mxu1 %v11843_v3 }
  0xd6   : > { %v2621_v32 = vsel %vm2620_vm6, %v2601_v31, %v2603_v26  ;;  %v2622_v33 = vsel %vm2620_vm6, %v2603_v26, %v2605_v30  ;;  %2581 = vmatprep.mubr.f32.mxu0 %v11843_v3 }
  0xd7   : > { %10606 = vmatprep.subr.msk.mxu1 %vm584_vm1, %v2622_v33  ;;  %v10653_v33 = vld [vmem:[%s15320_s3 + $0x40] sm:$0xff] }
  0xd8   : > { %10607 = vmatpush1.msk.msra.mxu1 %vm584_vm1, %v2621_v32 }
  0xd9   : > { %v2199_v35 = vpop.permute.xlu0 %2198  ;;  %10608 = vmatmul.mubr.msk.f32.vlgmr.msra.gmra.mxu1 %vm580_vm2, %v10605_v34  ;;  %v2611_v36 = vpop.permute.xlu1 %2610 }
  0xda   : > { %v2209_v37 = vsel %vm2200_vm5, %v2197_v22, %v2199_v35  ;;  %10602 = vmatprep.subr.msk.mxu0 %vm584_vm1, %v2199_v35  ;;  %2859 = vmatprep.mubr.f32.mxu1 %v11843_v3 }
  0xdb   : > { %10603 = vmatpush1.msk.msra.mxu0 %vm584_vm1, %v2209_v37 }
  0xdc   : > { %10604 = vmatmul.mubr.msk.f32.vlgmr.msra.gmra.mxu0 %vm580_vm2, %v10589_v16 }
  0xdd   : > { %v2613_v38 = vpop.permute.xlu0 %2612  ;;  %v2607_v39 = vpop.permute.xlu1 %2606  ;;  %2788 = vmatprep.mubr.f32.mxu0 %v11843_v3 }
  0xde   : > { %v2626_v40 = vsel %vm2620_vm6, %v2611_v36, %v2613_v38  ;;  %v2623_v45 = vsel %vm2620_vm6, %v2605_v30, %v2607_v39 }
  0xdf   : > { %10612 = vmatprep.subr.msk.mxu1 %vm584_vm1, %v2626_v40 }
  0xe1   : > { %v2609_v41 = vpop.permute.xlu0 %2608  ;;  %v2615_v42 = vpop.permute.xlu1 %2614 }
  0xe2   : > { %v2625_v43 = vsel %vm2620_vm6, %v2609_v41, %v2611_v36  ;;  %v2624_v44 = vsel %vm2620_vm6, %v2607_v39, %v2609_v41  ;;  %v2627_v50 = vsel %vm2620_vm6, %v2613_v38, %v2615_v42 }
  0xe3   : > { %10609 = vmatprep.subr.msk.mxu0 %vm584_vm1, %v2624_v44  ;;  %10613 = vmatpush1.msk.msra.mxu1 %vm584_vm1, %v2625_v43 }
  0xe4   : > { %10610 = vmatpush1.msk.msra.mxu0 %vm584_vm1, %v2623_v45  ;;  %10614 = vmatmul.mubr.msk.f32.vlgmr.msra.gmra.mxu1 %vm580_vm2, %v10605_v34 }
  0xe5   : > { %v2617_v46 = vpop.permute.xlu0 %2616  ;;  %10611 = vmatmul.mubr.msk.f32.vlgmr.msra.gmra.mxu0 %vm580_vm2, %v10605_v34  ;;  %v2619_v47 = vpop.permute.xlu1 %2618  ;;  %3001 = vmatprep.mubr.f32.mxu1 %v11843_v3 }
  0xe6   : > { %v2629_v48 = vsel %vm2620_vm6, %v2617_v46, %v2619_v47  ;;  %10618 = vmatprep.subr.msk.mxu1 %vm584_vm1, %v2619_v47  ;;  %v2628_v49 = vsel %vm2620_vm6, %v2615_v42, %v2617_v46  ;;  %2930 = vmatprep.mubr.f32.mxu0 %v11843_v3 }
  0xe7   : > { %10615 = vmatprep.subr.msk.mxu0 %vm584_vm1, %v2628_v49  ;;  %10619 = vmatpush1.msk.msra.mxu1 %vm584_vm1, %v2629_v48 }
  0xe8   : > { %10616 = vmatpush1.msk.msra.mxu0 %vm584_vm1, %v2627_v50  ;;  %10620 = vmatmul.mubr.msk.f32.vlgmr.msra.gmra.mxu1 %vm580_vm2, %v10605_v34 }
  0xe9   : > { %v3027_v51 = vpop.permute.xlu0 %3026  ;;  %10617 = vmatmul.mubr.msk.f32.vlgmr.msra.gmra.mxu0 %vm580_vm2, %v10605_v34  ;;  %v3029_v52 = vpop.permute.xlu1 %3028  ;;  %3208 = vmatprep.mubr.f32.mxu1 %v11843_v3 }
  0xea   : > { %v3044_v53 = vsel %vm3040_vm7, %v3027_v51, %v3029_v52  ;;  %3137 = vmatprep.mubr.f32.mxu0 %v11843_v3 }
  0xeb   : > { %10625 = vmatprep.subr.msk.mxu1 %vm584_vm1, %v3044_v53 }
  0xed   : > { %v3023_v54 = vpop.permute.xlu0 %3022  ;;  %v3025_v55 = vpop.permute.xlu1 %3024 }
  0xee   : > { %v3043_v57 = vsel %vm3040_vm7, %v3025_v55, %v3027_v51  ;;  %v3042_v58 = vsel %vm3040_vm7, %v3023_v54, %v3025_v55 }
  0xef   : > { %10622 = vmatprep.subr.msk.mxu0 %vm584_vm1, %v3042_v58  ;;  %10626 = vmatpush1.msk.msra.mxu1 %vm584_vm1, %v3043_v57 }
  0xf0   : > { %10627 = vmatmul.mubr.msk.f32.vlgmr.msra.gmra.mxu1 %vm580_vm2, %v10621_v56 }
  0xf1   : > { %v3021_v59 = vpop.permute.xlu0 %3020  ;;  %v3035_v60 = vpop.permute.xlu1 %3034  ;;  %3350 = vmatprep.mubr.f32.mxu1 %v11843_v3 }
  0xf2   : > { %v3041_v61 = vsel %vm3040_vm7, %v3021_v59, %v3023_v54 }
  0xf3   : > { %10623 = vmatpush1.msk.msra.mxu0 %vm584_vm1, %v3041_v61 }
  0xf4   : > { %10624 = vmatmul.mubr.msk.f32.vlgmr.msra.gmra.mxu0 %vm580_vm2, %v10621_v56 }
  0xf5   : > { %v3037_v62 = vpop.permute.xlu0 %3036  ;;  %v3031_v63 = vpop.permute.xlu1 %3030  ;;  %3279 = vmatprep.mubr.f32.mxu0 %v11843_v3 }
  0xf6   : > { %v3048_v0 = vsel %vm3040_vm7, %v3035_v60, %v3037_v62  ;;  %v3045_v6 = vsel %vm3040_vm7, %v3029_v52, %v3031_v63 }
  0xf7   : > { %10631 = vmatprep.subr.msk.mxu1 %vm584_vm1, %v3048_v0 }
  0xf9   : > { %v3033_v1 = vpop.permute.xlu0 %3032  ;;  %v3443_v2 = vpop.permute.xlu1 %3442 }
  0xfa   : > { %v3047_v4 = vsel %vm3040_vm7, %v3033_v1, %v3035_v60  ;;  %v3046_v5 = vsel %vm3040_vm7, %v3031_v63, %v3033_v1 }
  0xfb   : > { %10628 = vmatprep.subr.msk.mxu0 %vm584_vm1, %v3046_v5  ;;  %10632 = vmatpush1.msk.msra.mxu1 %vm584_vm1, %v3047_v4 }
  0xfc   : > { %10629 = vmatpush1.msk.msra.mxu0 %vm584_vm1, %v3045_v6  ;;  %10633 = vmatmul.mubr.msk.f32.vlgmr.msra.gmra.mxu1 %vm580_vm2, %v10621_v56 }
  0xfd   : > { %v3445_v7 = vpop.permute.xlu0 %3444  ;;  %10630 = vmatmul.mubr.msk.f32.vlgmr.msra.gmra.mxu0 %vm580_vm2, %v10621_v56  ;;  %v3441_v8 = vpop.permute.xlu1 %3440  ;;  %3557 = vmatprep.mubr.f32.mxu1 %v11843_v3 }
  0xfe   : > { %v3461_v9 = vsel %vm3460_vm8, %v3441_v8, %v3443_v2  ;;  %v3462_v10 = vsel %vm3460_vm8, %v3443_v2, %v3445_v7  ;;  %3421 = vmatprep.mubr.f32.mxu0 %v11843_v3 }
  0xff   : > { %10638 = vmatprep.subr.msk.mxu1 %vm584_vm1, %v3462_v10 }
 0x100   : > { %10639 = vmatpush1.msk.msra.mxu1 %vm584_vm1, %v3461_v9 }
 0x101   : > { %v3039_v12 = vpop.permute.xlu0 %3038  ;;  %10640 = vmatmul.mubr.msk.f32.vlgmr.msra.gmra.mxu1 %vm580_vm2, %v10637_v11 }
 0x102   : > { %v3049_v13 = vsel %vm3040_vm7, %v3037_v62, %v3039_v12  ;;  %v3451_v14 = vpop.permute.xlu1 %3450  ;;  %10634 = vmatprep.subr.msk.mxu0 %vm584_vm1, %v3039_v12  ;;  %3699 = vmatprep.mubr.f32.mxu1 %v11843_v3 }
 0x103   : > { %10635 = vmatpush1.msk.msra.mxu0 %vm584_vm1, %v3049_v13 }
 0x104   : > { %10636 = vmatmul.mubr.msk.f32.vlgmr.msra.gmra.mxu0 %vm580_vm2, %v10621_v56 }
 0x105   : > { %v3453_v15 = vpop.permute.xlu0 %3452  ;;  %3628 = vmatprep.mubr.f32.mxu0 %v11843_v3 }
 0x106   : > { %v3466_v16 = vsel %vm3460_vm8, %v3451_v14, %v3453_v15  ;;  %v3447_v17 = vpop.permute.xlu1 %3446 }
 0x107   : > { %10644 = vmatprep.subr.msk.mxu1 %vm584_vm1, %v3466_v16  ;;  %v3463_v22 = vsel %vm3460_vm8, %v3445_v7, %v3447_v17 }
 0x109   : > { %v3449_v18 = vpop.permute.xlu0 %3448 }
 0x10a   : > { %v3464_v19 = vsel %vm3460_vm8, %v3447_v17, %v3449_v18  ;;  %v3465_v20 = vsel %vm3460_vm8, %v3449_v18, %v3451_v14  ;;  %v3455_v21 = vpop.permute.xlu1 %3454 }
 0x10b   : > { %10641 = vmatprep.subr.msk.mxu0 %vm584_vm1, %v3464_v19  ;;  %10645 = vmatpush1.msk.msra.mxu1 %vm584_vm1, %v3465_v20  ;;  %v3467_v27 = vsel %vm3460_vm8, %v3453_v15, %v3455_v21 }
 0x10c   : > { %10642 = vmatpush1.msk.msra.mxu0 %vm584_vm1, %v3463_v22  ;;  %10646 = vmatmul.mubr.msk.f32.vlgmr.msra.gmra.mxu1 %vm580_vm2, %v10637_v11 }
 0x10d   : > { %10643 = vmatmul.mubr.msk.f32.vlgmr.msra.gmra.mxu0 %vm580_vm2, %v10637_v11  ;;  %3841 = vmatprep.mubr.f32.mxu1 %v11843_v3 }
 0x10e   : > { %v3457_v23 = vpop.permute.xlu0 %3456  ;;  %v3459_v24 = vpop.permute.xlu1 %3458  ;;  %3770 = vmatprep.mubr.f32.mxu0 %v11843_v3 }
 0x10f   : > { %v3468_v25 = vsel %vm3460_vm8, %v3455_v21, %v3457_v23  ;;  %v3469_v26 = vsel %vm3460_vm8, %v3457_v23, %v3459_v24  ;;  %10650 = vmatprep.subr.msk.mxu1 %vm584_vm1, %v3459_v24 }
 0x110   : > { %10647 = vmatprep.subr.msk.mxu0 %vm584_vm1, %v3468_v25  ;;  %10651 = vmatpush1.msk.msra.mxu1 %vm584_vm1, %v3469_v26 }
 0x111   : > { %10648 = vmatpush1.msk.msra.mxu0 %vm584_vm1, %v3467_v27  ;;  %10652 = vmatmul.mubr.msk.f32.vlgmr.msra.gmra.mxu1 %vm580_vm2, %v10637_v11 }
 0x112   : > { %10649 = vmatmul.mubr.msk.f32.vlgmr.msra.gmra.mxu0 %vm580_vm2, %v10637_v11  ;;  %4048 = vmatprep.mubr.f32.mxu1 %v11843_v3 }
 0x113   : > { %v3867_v28 = vpop.permute.xlu0 %3866  ;;  %v3869_v29 = vpop.permute.xlu1 %3868  ;;  %3977 = vmatprep.mubr.f32.mxu0 %v11843_v3 }
 0x114   : > { %v3884_v30 = vsel %vm3880_vm9, %v3867_v28, %v3869_v29 }
 0x115   : > { %10657 = vmatprep.subr.msk.mxu1 %vm584_vm1, %v3884_v30 }
 0x119   : > { %v3863_v31 = vpop.permute.xlu0 %3862 }
 0x11a   : > { %v3865_v32 = vpop.permute.xlu1 %3864 }
 0x11b   : > { %v3882_v34 = vsel %vm3880_vm9, %v3863_v31, %v3865_v32  ;;  %v3883_v35 = vsel %vm3880_vm9, %v3865_v32, %v3867_v28 }
 0x11c   : > { %10654 = vmatprep.subr.msk.mxu0 %vm584_vm1, %v3882_v34  ;;  %10658 = vmatpush1.msk.msra.mxu1 %vm584_vm1, %v3883_v35 }
 0x11d   : > { %10659 = vmatmul.mubr.msk.f32.vlgmr.msra.gmra.mxu1 %vm580_vm2, %v10653_v33  ;;  %v3861_v36 = vpop.permute.xlu0 %3860 }
 0x11e   : > { %v3881_v37 = vsel %vm3880_vm9, %v3861_v36, %v3863_v31  ;;  %v3875_v38 = vpop.permute.xlu1 %3874  ;;  %4190 = vmatprep.mubr.f32.mxu1 %v11843_v3 }
 0x11f   : > { %10655 = vmatpush1.msk.msra.mxu0 %vm584_vm1, %v3881_v37 }
 0x120   : > { %10656 = vmatmul.mubr.msk.f32.vlgmr.msra.gmra.mxu0 %vm580_vm2, %v10653_v33 }
 0x121   : > { %v3877_v39 = vpop.permute.xlu0 %3876  ;;  %4119 = vmatprep.mubr.f32.mxu0 %v11843_v3 }
 0x122   : > { %v3888_v40 = vsel %vm3880_vm9, %v3875_v38, %v3877_v39  ;;  %v3871_v41 = vpop.permute.xlu1 %3870 }
 0x123   : > { %10663 = vmatprep.subr.msk.mxu1 %vm584_vm1, %v3888_v40  ;;  %v3885_v45 = vsel %vm3880_vm9, %v3869_v29, %v3871_v41 }
 0x125   : > { %v3873_v42 = vpop.permute.xlu0 %3872 }
 0x126   : > { %v3886_v43 = vsel %vm3880_vm9, %v3871_v41, %v3873_v42  ;;  %v3887_v44 = vsel %vm3880_vm9, %v3873_v42, %v3875_v38 }
 0x127   : > { %10660 = vmatprep.subr.msk.mxu0 %vm584_vm1, %v3886_v43  ;;  %10664 = vmatpush1.msk.msra.mxu1 %vm584_vm1, %v3887_v44  ;;  %v3879_v46 = vpop.permute.xlu1 %3878 }
 0x128   : > { %10661 = vmatpush1.msk.msra.mxu0 %vm584_vm1, %v3885_v45  ;;  %10665 = vmatmul.mubr.msk.f32.vlgmr.msra.gmra.mxu1 %vm580_vm2, %v10653_v33  ;;  %v3889_v47 = vsel %vm3880_vm9, %v3877_v39, %v3879_v46 }
 0x129   : > { %10662 = vmatmul.mubr.msk.f32.vlgmr.msra.gmra.mxu0 %vm580_vm2, %v10653_v33  ;;  %10666 = vmatprep.subr.msk.mxu0 %vm584_vm1, %v3879_v46 }
 0x12a   : > { %10667 = vmatpush1.msk.msra.mxu0 %vm584_vm1, %v3889_v47  ;;  %4261 = vmatprep.mubr.f32.mxu0 %v11843_v3  ;;  %vm6836_vm1 = vcmask 769024  }
 0x12b   : > { %4522 = vmatprep.mubr.f32.mxu1 %v11843_v3 }
 0x12d   : > { %10668 = vmatmul.mubr.msk.f32.vlgmr.msra.gmra.mxu0 %vm580_vm2, %v10653_v33  ;;  %vm11857_vm2 = vmmov 0  }
 0x12e   : > { %4593 = vmatprep.mubr.f32.mxu0 %v11843_v3 }
 0x14e   : > { %v12429_v49 = vpop.f32.mrf.mxu0 }
 0x150   : > { %v12433_v51 = vpop.f32.mrf.mxu0 }
 0x151   : > { %v12427_v48 = vpop.f32.mrf.mxu1 }
 0x153   : > { %v12431_v50 = vpop.f32.mrf.mxu1 }
 0x159   : > { %v12435_v52 = vpop.f32.mrf.mxu1 }
 0x15a   : > { %v813_v53 = vpop.f32.mrf.mxu0 }
 0x15b   : > { %v12437_v54 = vpop.f32.mrf.mxu1 }
 0x15c   : > { %v815_v55 = vpop.f32.mrf.mxu0 }
 0x15e   : > { %v12439_v56 = vpop.f32.mrf.mxu1 }
 0x15f   : > { %v955_v57 = vpop.f32.mrf.mxu0 }
 0x160   : > { %v12445_v58 = vpop.f32.mrf.mxu1 }
 0x161   : > { %v957_v59 = vpop.f32.mrf.mxu0 }
 0x164   : > { %v1191_v60 = vpop.f32.mrf.mxu1 }
 0x165   : > { %v12451_v61 = vadd.f32 %v1191_v60, %v813_v53  ;;  %v1120_v63 = vpop.f32.mrf.mxu0 }
 0x166   : > { %v1193_v62 = vpop.f32.mrf.mxu1 }
 0x167   : > { %v12453_v0 = vadd.f32 %v1193_v62, %v815_v55  ;;  %v1122_v4 = vpop.f32.mrf.mxu0 }
 0x169   : > { %v1333_v1 = vpop.f32.mrf.mxu1 }
 0x16a   : > { %v12455_v2 = vadd.f32 %v1333_v1, %v955_v57  ;;  %v12459_v7 = vpop.f32.mrf.mxu0 }
 0x16b   : > { %v1335_v5 = vpop.f32.mrf.mxu1 }
 0x16c   : > { %v12457_v6 = vadd.f32 %v1335_v5, %v957_v59  ;;  %v12461_v9 = vpop.f32.mrf.mxu0 }
 0x16e   : > { %v1530_v8 = vpop.f32.mrf.mxu1 }
 0x170   : > { %v1532_v3 = vpop.f32.mrf.mxu1  ;;  %v1459_v10 = vpop.f32.mrf.mxu0 }
 0x172   : > { %v12463_v11 = vpop.f32.mrf.mxu1  ;;  %v1461_v12 = vpop.f32.mrf.mxu0 }
 0x174   : > { %v12465_v13 = vpop.f32.mrf.mxu1 }
 0x175   : > { %v12467_v14 = vpop.f32.mrf.mxu0 }
 0x177   : > { %v12469_v16 = vpop.f32.mrf.mxu0 }
 0x178   : > { %v1879_v15 = vpop.f32.mrf.mxu1 }
 0x179   : > { %v12473_v18 = vpop.f32.mrf.mxu0 }
 0x17a   : > { %v12471_v17 = vpop.f32.mrf.mxu1 }
 0x17b   : > { %v12477_v20 = vpop.f32.mrf.mxu0 }
 0x17c   : > { %v12475_v19 = vpop.f32.mrf.mxu1 }
 0x17d   : > { %v1950_v22 = vpop.f32.mrf.mxu0 }
 0x17e   : > { %v12479_v21 = vpop.f32.mrf.mxu1 }
 0x17f   : > { %v1952_v24 = vpop.f32.mrf.mxu0 }
 0x180   : > { %v12481_v23 = vpop.f32.mrf.mxu1 }
 0x181   : > { %v12485_v26 = vpop.f32.mrf.mxu0 }
 0x182   : > { %v12483_v25 = vpop.f32.mrf.mxu1 }
 0x183   : > { %v12487_v28 = vpop.f32.mrf.mxu0 }
 0x188   : > { %v2370_v27 = vpop.f32.mrf.mxu1 }
 0x18a   : > { %v2372_v29 = vpop.f32.mrf.mxu1 }
 0x18c   : > { %v2299_v30 = vpop.f32.mrf.mxu0 }
 0x18e   : > { %v12491_v32 = vpop.f32.mrf.mxu0 }
 0x194   : > { %v12489_v31 = vpop.f32.mrf.mxu1 }
 0x195   : > { %v12495_v34 = vpop.f32.mrf.mxu0 }
 0x196   : > { %v12493_v33 = vpop.f32.mrf.mxu1 }
 0x197   : > { %v12499_v36 = vpop.f32.mrf.mxu0 }
 0x198   : > { %15335 = vst [vmem:[#allocation3_spill] sm:$0xff] %v12499_v36 }
 0x199   : > { %v12497_v35 = vpop.f32.mrf.mxu1 }
 0x19b   : > { %v12501_v37 = vpop.f32.mrf.mxu1 }
 0x19c   : > { %v12503_v38 = vpop.f32.mrf.mxu0 }
 0x19d   : > { %15336 = vst [vmem:[#allocation4_spill] sm:$0xff] %v12503_v38 }
 0x19e   : > { %v12507_v40 = vpop.f32.mrf.mxu0 }
 0x19f   : > { %15338 = vst [vmem:[#allocation6_spill] sm:$0xff] %v12507_v40 }
 0x1a4   : > { %v12505_v39 = vpop.f32.mrf.mxu1 }
 0x1a5   : > { %15337 = vst [vmem:[#allocation5_spill] sm:$0xff] %v12505_v39  ;;  %v2790_v42 = vpop.f32.mrf.mxu0 }
 0x1a6   : > { %v12509_v41 = vpop.f32.mrf.mxu1 }
 0x1a7   : > { %15339 = vst [vmem:[#allocation7_spill] sm:$0xff] %v12509_v41  ;;  %v2792_v44 = vpop.f32.mrf.mxu0  ;;  %v1123_v41 = vadd.f32 %v1122_v4, %v12431_v50 }
 0x1a8   : > { %v12511_v43 = vpop.f32.mrf.mxu1 }
 0x1a9   : > { %15340 = vst [vmem:[#allocation8_spill] sm:$0xff] %v12511_v43  ;;  %v12515_v46 = vpop.f32.mrf.mxu0  ;;  %v1121_v43 = vadd.f32 %v1120_v63, %v12427_v48  ;;  %v1751_v38 = vadd.f32 %v1532_v3, %v1123_v41 }
 0x1aa   : > { %v12513_v45 = vpop.f32.mrf.mxu1  ;;  %15342 = vst [vmem:[#allocation10_spill] sm:$0xff] %v12515_v46 }
 0x1ab   : > { %15341 = vst [vmem:[#allocation9_spill] sm:$0xff] %v12513_v45  ;;  %v12517_v53 = vpop.f32.mrf.mxu0  ;;  %v1750_v46 = vadd.f32 %v1530_v8, %v1121_v43 }
 0x1ac   : > { %15343 = vst [vmem:[#allocation11_spill] sm:$0xff] %v12517_v53  ;;  %v4308_v53 = vlaneseq }
 0x1ad   : > { %v2170_v4 = vadd.f32 %v1950_v22, %v1750_v46 }
 0x1ae   : > { %v12545_v63 = vshrl.u32 %v4308_v53, 7 }
 0x1af   : > { %v2590_v41 = vadd.f32 %v2370_v27, %v2170_v4  ;;  %v1752_v27 = vadd.f32 %v12467_v14, %v12451_v61  ;;  %v1756_v14 = vadd.f32 %v12473_v18, %v12455_v2  ;;  %v12593_v2 = vpop.permute.xlu0 %4281 }
 0x1b0   : > { %v3210_v47 = vpop.f32.mrf.mxu1  ;;  %v4310_v3 = vsub.s32 0, %v12545_v63  ;;  %v4314_v22 = vsub.s32 1, %v12545_v63  ;;  %v4334_v18 = vsub.s32 6, %v12545_v63 }
 0x1b1   : > { %v3010_v46 = vadd.f32 %v2790_v42, %v2590_v41 }
 0x1b2   : > { %v3212_v55 = vpop.f32.mrf.mxu1 }
 0x1b4   : > { %v3139_v57 = vpop.f32.mrf.mxu0 }
 0x1b6   : > { %v12521_v60 = vpop.f32.mrf.mxu0 }
 0x1bc   : > { %v12519_v59 = vpop.f32.mrf.mxu1 }
 0x1bd   : > { %15344 = vst [vmem:[#allocation12_spill] sm:$0xff] %v12519_v59  ;;  %v12525_v1 = vpop.f32.mrf.mxu0  ;;  %v1050_v59 = vadd.f32 %v12439_v56, %v12429_v49  ;;  %v2171_v49 = vadd.f32 %v1952_v24, %v1751_v38  ;;  %v4318_v56 = vsub.s32 2, %v12545_v63 }
 0x1be   : > { %v12523_v62 = vpop.f32.mrf.mxu1  ;;  %15346 = vst [vmem:[#allocation14_spill] sm:$0xff] %v12525_v1 }
 0x1bf   : > { %15345 = vst [vmem:[#allocation13_spill] sm:$0xff] %v12523_v62  ;;  %v12530_v45 = vpop.f32.mrf.mxu0  ;;  %v1052_v62 = vadd.f32 %v12445_v58, %v12433_v51  ;;  %v1748_v50 = vadd.f32 %v1459_v10, %v1050_v59  ;;  %v12553_v51 = vld [vmem:[%s15319_s2] sm:$0xff]  ;;  %v4322_v58 = vsub.s32 3, %v12545_v63  ;;  %v2591_v43 = vadd.f32 %v2372_v29, %v2171_v49 }
 0x1c0   : > { %15347 = vst [vmem:[#allocation15_spill] sm:$0xff] %v12530_v45  ;;  %v4319_v53 = vrot.slane %v12553_v51, %v4318_v56  ;;  %v12579_v29 = vrot.slane %v12553_v51, %v4314_v22 }
 0x1c1   : > { %v12527_v5 = vpop.f32.mrf.mxu1  ;;  %v1749_v45 = vadd.f32 %v1461_v12, %v1052_v62  ;;  %v2168_v8 = vadd.f32 %v1879_v15, %v1748_v50  ;;  %v1263_v12 = vadd.f32 %v12459_v7, %v12435_v52  ;;  %v1265_v15 = vadd.f32 %v12461_v9, %v12437_v54 }
 0x1c2   : > { %v4323_v62 = vrot.slane %v12553_v51, %v4322_v58  ;;  %v12572_v52 = vrot.slane %v12553_v51, %v4310_v3  ;;  %v1753_v7 = vadd.f32 %v12469_v16, %v12453_v0  ;;  %v3430_v54 = vadd.f32 %v3210_v47, %v3010_v46 }
 0x1c3   : > { %v12537_v40 = vpop.f32.mrf.mxu1  ;;  %v2169_v24 = vadd.f32 %v12471_v17, %v1749_v45  ;;  %v2588_v59 = vadd.f32 %v2299_v30, %v2168_v8  ;;  %v3011_v17 = vadd.f32 %v2792_v44, %v2591_v43  ;;  %v1754_v61 = vadd.f32 %v12463_v11, %v1263_v12 }
 0x1c4   : > { %v12533_v39 = vpop.f32.mrf.mxu0  ;;  %v1755_v0 = vadd.f32 %v12465_v13, %v1265_v15  ;;  %v1757_v16 = vadd.f32 %v12477_v20, %v12457_v6  ;;  %v2172_v50 = vadd.f32 %v12475_v19, %v1752_v27  ;;  %v4326_v8 = vsub.s32 4, %v12545_v63  ;;  %v15351_v27 = vld [vmem:[#allocation10_spill] sm:$0xff] }
 0x1c5   : > { %15348 = vst [vmem:[#allocation16_spill] sm:$0xff] %v12533_v39  ;;  %v2589_v30 = vadd.f32 %v12491_v32, %v2169_v24  ;;  %v3008_v42 = vadd.f32 %v12497_v35, %v2588_v59  ;;  %v3431_v44 = vadd.f32 %v3212_v55, %v3011_v17  ;;  %v2173_v32 = vadd.f32 %v12479_v21, %v1753_v7  ;;  %v15349_v24 = vld [vmem:[#allocation3_spill] sm:$0xff]  ;;  %v15352_v17 = vld [vmem:[#allocation6_spill] sm:$0xff] }
 0x1c6   : > { %v12543_v48 = vpop.f32.mrf.mxu0  ;;  %v2176_v6 = vadd.f32 %v12481_v23, %v1756_v14  ;;  %v2174_v20 = vadd.f32 %v12485_v26, %v1754_v61  ;;  %v2177_v55 = vadd.f32 %v12483_v25, %v1757_v16  ;;  %v2592_v12 = vadd.f32 %v12495_v34, %v2172_v50 }
 0x1c7   : > { %v3009_v11 = vadd.f32 %v12501_v37, %v2589_v30  ;;  %v3428_v4 = vadd.f32 %v3139_v57, %v3008_v42  ;;  %v2175_v57 = vadd.f32 %v12487_v28, %v1755_v0  ;;  %v15350_v28 = vld [vmem:[#allocation4_spill] sm:$0xff] }
 0x1c8   : > { %v2596_v46 = vadd.f32 %v15350_v28, %v2176_v6  ;;  %v2597_v34 = vadd.f32 %v15352_v17, %v2177_v55  ;;  %v15355_v42 = vld [vmem:[#allocation12_spill] sm:$0xff] }
 0x1c9   : > { %v3429_v19 = vadd.f32 %v12521_v60, %v3009_v11  ;;  %v3848_v37 = vadd.f32 %v12527_v5, %v3428_v4  ;;  %v2595_v60 = vadd.f32 %v12493_v33, %v2175_v57  ;;  %v2593_v5 = vadd.f32 %v15349_v24, %v2173_v32  ;;  %v15354_v33 = vld [vmem:[#allocation11_spill] sm:$0xff]  ;;  %v15357_v11 = vld [vmem:[#allocation14_spill] sm:$0xff] }
 0x1ca   : > { %v4338_v32 = vsub.s32 7, %v12545_v63 }
 0x1cb   : > { %v3849_v23 = vadd.f32 %v12537_v40, %v3429_v19  ;;  %v3015_v30 = vadd.f32 %v15354_v33, %v2595_v60  ;;  %v15359_v19 = vld [vmem:[#allocation8_spill] sm:$0xff] }
 0x1cc   : > { %v12541_v1 = vpop.f32.mrf.mxu1 }
 0x1cd   : > { %v3630_v39 = vpop.f32.mrf.mxu0 }
 0x1ce   : > { %v12547_v36 = vpop.f32.mrf.mxu1  ;;  %v3850_v47 = vadd.f32 %v3630_v39, %v3430_v54  ;;  %v15353_v54 = vld [vmem:[#allocation5_spill] sm:$0xff] }
 0x1cf   : > { %v3632_v10 = vpop.f32.mrf.mxu0  ;;  %v3012_v40 = vadd.f32 %v15353_v54, %v2592_v12 }
 0x1d0   : > { %v3851_v35 = vadd.f32 %v3632_v10, %v3431_v44  ;;  %v2594_v10 = vadd.f32 %v12489_v31, %v2174_v20 }
 0x1d1   : > { %v12561_v38 = vpop.f32.mrf.mxu1  ;;  %v3432_v4 = vadd.f32 %v15357_v11, %v3012_v40 }
 0x1d2   : > { %v3772_v9 = vpop.f32.mrf.mxu0  ;;  %v3014_v59 = vadd.f32 %v15351_v27, %v2594_v10  ;;  %v4305_v27 = vld [vmem:[%s15319_s2 + $0x8] sm:$0x3] }
 0x1d3   : > { %v12586_v45 = vpop.f32.mrf.mxu1  ;;  %v3852_v55 = vadd.f32 %v12541_v1, %v3432_v4 }
 0x1d4   : > { %v3774_v56 = vpop.f32.mrf.mxu0  ;;  %v3434_v0 = vadd.f32 %v15355_v42, %v3014_v59 }
 0x1dd   : > { %v4050_v49 = vpop.f32.mrf.mxu1 }
 0x1de   : > { %v4270_v13 = vadd.f32 %v4050_v49, %v3850_v47  ;;  %v15356_v47 = vld [vmem:[#allocation7_spill] sm:$0xff] }
 0x1df   : > { %v4052_v39 = vpop.f32.mrf.mxu1  ;;  %v3013_v50 = vadd.f32 %v15356_v47, %v2593_v5 }
 0x1e0   : > { %v4286_v21 = vadd.f32 %v12593_v2, %v4270_v13  ;;  %v4271_v58 = vadd.f32 %v4052_v39, %v3851_v35  ;;  %v3979_v41 = vpop.f32.mrf.mxu0  ;;  %v3854_v13 = vadd.f32 %v3772_v9, %v3434_v0  ;;  %v15360_v39 = vld [vmem:[#allocation15_spill] sm:$0xff] }
 0x1e1   : > { %v4268_v26 = vadd.f32 %v3979_v41, %v3848_v37  ;;  %v3016_v37 = vadd.f32 %v15359_v19, %v2596_v46 }
 0x1e2   : > { %v4296_v15 = vmax.f32 %v4286_v21, 0.0  ;;  %v4287_v25 = vadd.f32 %v12593_v2, %v4271_v58  ;;  %v3981_v43 = vpop.f32.mrf.mxu0  ;;  %v4330_v21 = vsub.s32 5, %v12545_v63  ;;  %v15361_v58 = vld [vmem:[#allocation9_spill] sm:$0xff] }
 0x1e3   : > { %v4284_v7 = vadd.f32 %v12593_v2, %v4268_v26  ;;  %v4269_v31 = vadd.f32 %v3981_v43, %v3849_v23  ;;  %v3017_v41 = vadd.f32 %v15361_v58, %v2597_v34 }
 0x1e4   : > { %v4297_v61 = vmax.f32 %v4287_v25, 0.0  ;;  %v12616_v14 = vmul.f32 %v4319_v53, %v4296_v15  ;;  %v15358_v53 = vld [vmem:[#allocation13_spill] sm:$0xff] }
 0x1e5   : > { %v4294_v16 = vmax.f32 %v4284_v7, 0.0  ;;  %v4285_v44 = vadd.f32 %v12593_v2, %v4269_v31  ;;  %v3435_v35 = vadd.f32 %v15358_v53, %v3015_v30 }
 0x1e6   : > { %v12623_v49 = vmul.f32 %v4323_v62, %v4297_v61  ;;  %4819 = vrot.lane.b32.xlu0 %v12616_v14, %s11853_s23  ;;  %4420 = vrot.lane.b32.xlu1 %v12616_v14, %s11852_s20  ;;  %v3433_v62 = vadd.f32 %v15360_v39, %v3013_v50  ;;  %v4343_v61 = vrot.slane %v4305_v27, %v4310_v3 }
 0x1e7   : > { %v12632_v6 = vmul.f32 %v12572_v52, %v4294_v16  ;;  %v4295_v20 = vmax.f32 %v4285_v44, 0.0  ;;  %v3855_v10 = vadd.f32 %v3774_v56, %v3435_v35  ;;  %v15362_v52 = vld [vmem:[#allocation16_spill] sm:$0xff]  ;;  %v4327_v56 = vrot.slane %v12553_v51, %v4326_v8 }
 0x1e8   : > { %v4192_v57 = vpop.f32.mrf.mxu1  ;;  %v3436_v26 = vadd.f32 %v15362_v52, %v3016_v37  ;;  %v3853_v60 = vadd.f32 %v12547_v36, %v3433_v62  ;;  %v3437_v36 = vadd.f32 %v12543_v48, %v3017_v41  ;;  %v4331_v8 = vrot.slane %v12553_v51, %v4330_v21 }
 0x1e9   : > { %v12640_v12 = vmul.f32 %v12579_v29, %v4295_v20  ;;  %v4274_v9 = vadd.f32 %v4192_v57, %v3854_v13  ;;  %v4121_v23 = vpop.f32.mrf.mxu0  ;;  %v4335_v29 = vrot.slane %v12553_v51, %v4334_v18  ;;  %v4339_v18 = vrot.slane %v12553_v51, %v4338_v32 }
 0x1ea   : > { %v4272_v24 = vadd.f32 %v4121_v23, %v3852_v55  ;;  %v4194_v5 = vpop.f32.mrf.mxu1  ;;  %5219 = vrot.lane.b32.xlu0 %v12616_v14, %s11854_s24  ;;  %4416 = vrot.lane.b32.xlu1 %v12632_v6, %s11852_s20  ;;  %v3856_v43 = vadd.f32 %v12561_v38, %v3436_v26  ;;  %v3857_v17 = vadd.f32 %v12586_v45, %v3437_v36 }
 0x1eb   : > { %v4290_v1 = vadd.f32 %v12593_v2, %v4274_v9  ;;  %v4275_v15 = vadd.f32 %v4194_v5, %v3855_v10  ;;  %v4123_v25 = vpop.f32.mrf.mxu0  ;;  %v4347_v50 = vrot.slane %v4305_v27, %v4314_v22  ;;  %v4415_v22 = vpop.permute.xlu0 %4414  ;;  %v12839_v9 = vld [vmem:[%s15322_s5 + $0x4] sm:$0xf]  ;;  %v8042_v27 = vld [vmem:[%s15323_s6] sm:$0xf] }
 0x1ec   : > { %v4288_v28 = vadd.f32 %v12593_v2, %v4272_v24  ;;  %v4273_v46 = vadd.f32 %v4123_v25, %v3853_v60  ;;  %v12850_v60 = vld [vmem:[#allocation2] sm:$0xff] }
 0x1ed   : > { %v4300_v59 = vmax.f32 %v4290_v1, 0.0  ;;  %v4291_v7 = vadd.f32 %v12593_v2, %v4275_v15  ;;  %v4263_v31 = vpop.f32.mrf.mxu0 }
 0x1ee   : > { %v4298_v48 = vmax.f32 %v4288_v28, 0.0  ;;  %v4289_v38 = vadd.f32 %v12593_v2, %v4273_v46  ;;  %v4276_v34 = vadd.f32 %v4263_v31, %v3856_v43  ;;  %5630 = vrot.lane.b32.xlu0 %v12616_v14, %s11855_s25  ;;  %4815 = vrot.lane.b32.xlu1 %v12632_v6, %s11853_s23 }
 0x1ef   : > { %v12668_v54 = vmul.f32 %v4335_v29, %v4300_v59  ;;  %v4301_v40 = vmax.f32 %v4291_v7, 0.0  ;;  %v4265_v51 = vpop.f32.mrf.mxu0  ;;  %v5214_v32 = vpop.permute.xlu0 %5213 }
 0x1f0   : > { %v12672_v33 = vmul.f32 %v4327_v56, %v4298_v48  ;;  %v4299_v45 = vmax.f32 %v4289_v38, 0.0  ;;  %v4292_v30 = vadd.f32 %v12593_v2, %v4276_v34  ;;  %v4277_v42 = vadd.f32 %v4265_v51, %v3857_v17 }
 0x1f1   : > { %v12675_v0 = vmul.f32 %v4339_v18, %v4301_v40 }
 0x1f2   : > { %v12677_v16 = vmul.f32 %v4331_v8, %v4299_v45  ;;  %v4302_v44 = vmax.f32 %v4292_v30, 0.0  ;;  %v4293_v47 = vadd.f32 %v12593_v2, %v4277_v42  ;;  %6411 = vrot.lane.b32.xlu0 %v12616_v14, %s11842_s27  ;;  %5215 = vrot.lane.b32.xlu1 %v12632_v6, %s11854_s24  ;;  %v12779_v2 = vpop.permute.xlu1 %4813 }
 0x1f4   : > { %v12686_v3 = vmul.f32 %v4343_v61, %v4302_v44  ;;  %v4303_v11 = vmax.f32 %v4293_v47, 0.0 }
 0x1f6   : > { %v4367_v4 = vmul.f32 %v4347_v50, %v4303_v11  ;;  %5626 = vrot.lane.b32.xlu1 %v12632_v6, %s11855_s25  ;;  %4418 = vrot.lane.b32.xlu0 %v12640_v12, %s11852_s20  ;;  %v5625_v53 = vpop.permute.xlu1 %5624 }
 0x1f8   : > { %4389 = vst.msk [vmem:[#allocation2 + $0x50] sm:$0xff] %vm4388_vm10, %v4367_v4 }
 0x1fa   : > { %6407 = vrot.lane.b32.xlu1 %v12632_v6, %s11842_s27  ;;  %4817 = vrot.lane.b32.xlu0 %v12640_v12, %s11853_s23 }
 0x1fe   : > { %4422 = vrot.lane.b32.xlu1 %v12623_v49, %s11852_s20  ;;  %5217 = vrot.lane.b32.xlu0 %v12640_v12, %s11854_s24 }
 0x1ff   : > { %v12761_v63 = vld [vmem:[#allocation2 + $0x50] sm:$0xff] }
 0x202   : > { %4821 = vrot.lane.b32.xlu1 %v12623_v49, %s11853_s23  ;;  %5628 = vrot.lane.b32.xlu0 %v12640_v12, %s11855_s25 }
 0x206   : > { %5221 = vrot.lane.b32.xlu1 %v12623_v49, %s11854_s24  ;;  %4424 = vrot.lane.b32.xlu0 %v12672_v33, %s11852_s20 }
 0x20a   : > { %5632 = vrot.lane.b32.xlu1 %v12623_v49, %s11855_s25  ;;  %5223 = vrot.lane.b32.xlu0 %v12672_v33, %s11854_s24 }
 0x20e   : > { %6409 = vrot.lane.b32.xlu1 %v12640_v12, %s11842_s27  ;;  %5638 = vrot.lane.b32.xlu0 %v12668_v54, %s11855_s25 }
 0x212   : > { %4428 = vrot.lane.b32.xlu1 %v12668_v54, %s11852_s20  ;;  %4430 = vrot.lane.b32.xlu0 %v12675_v0, %s11852_s20 }
 0x216   : > { %4823 = vrot.lane.b32.xlu1 %v12672_v33, %s11853_s23  ;;  %4825 = vrot.lane.b32.xlu0 %v12677_v16, %s11853_s23 }
 0x21a   : > { %4827 = vrot.lane.b32.xlu1 %v12668_v54, %s11853_s23  ;;  %5229 = vrot.lane.b32.xlu0 %v12675_v0, %s11854_s24 }
 0x21e   : > { %5227 = vrot.lane.b32.xlu1 %v12668_v54, %s11854_s24  ;;  %5636 = vrot.lane.b32.xlu0 %v12677_v16, %s11855_s25 }
 0x222   : > { %5634 = vrot.lane.b32.xlu1 %v12672_v33, %s11855_s25  ;;  %6417 = vrot.lane.b32.xlu0 %v12677_v16, %s11842_s27 }
 0x226   : > { %4426 = vrot.lane.b32.xlu1 %v12677_v16, %s11852_s20  ;;  %4432 = vrot.lane.b32.xlu0 %v12686_v3, %s11852_s20 }
 0x22a   : > { %6419 = vrot.lane.b32.xlu1 %v12668_v54, %s11842_s27  ;;  %4831 = vrot.lane.b32.xlu0 %v12686_v3, %s11853_s23 }
 0x22e   : > { %4829 = vrot.lane.b32.xlu1 %v12675_v0, %s11853_s23  ;;  %6415 = vrot.lane.b32.xlu0 %v12672_v33, %s11842_s27 }
 0x232   : > { %5225 = vrot.lane.b32.xlu1 %v12677_v16, %s11854_s24  ;;  %6421 = vrot.lane.b32.xlu0 %v12675_v0, %s11842_s27 }
 0x236   : > { %5640 = vrot.lane.b32.xlu1 %v12675_v0, %s11855_s25  ;;  %5231 = vrot.lane.b32.xlu0 %v12686_v3, %s11854_s24  ;;  %s531_s24 = scalar_lea.vmem %s15333_s16, %s15365_s22 }
 0x23a   : > { %6413 = vrot.lane.b32.xlu1 %v12623_v49, %s11842_s27  ;;  %6423 = vrot.lane.b32.xlu0 %v12686_v3, %s11842_s27 }
 0x23e   : > { %6822 = vrot.lane.b32.xlu1 %v12623_v49, %s11856_s18  ;;  %5644 = vrot.lane.b32.xlu0 %v12761_v63, %s11855_s25 }
 0x242   : > { %5642 = vrot.lane.b32.xlu1 %v12686_v3, %s11855_s25  ;;  %6824 = vrot.lane.b32.xlu0 %v12672_v33, %s11856_s18 }
 0x246   : > { %6820 = vrot.lane.b32.xlu1 %v12616_v14, %s11856_s18  ;;  %6818 = vrot.lane.b32.xlu0 %v12640_v12, %s11856_s18 }
 0x24a   : > { %6816 = vrot.lane.b32.xlu1 %v12632_v6, %s11856_s18  ;;  %6830 = vrot.lane.b32.xlu0 %v12675_v0, %s11856_s18 }
 0x24e   : > { %6832 = vrot.lane.b32.xlu1 %v12686_v3, %s11856_s18  ;;  %6828 = vrot.lane.b32.xlu0 %v12668_v54, %s11856_s18 }
 0x252   : > { %6826 = vrot.lane.b32.xlu1 %v12677_v16, %s11856_s18  ;;  %7228 = vrot.lane.b32.xlu0 %v12640_v12, %s11845_s29 }
 0x256   : > { %7230 = vrot.lane.b32.xlu1 %v12616_v14, %s11845_s29  ;;  %7226 = vrot.lane.b32.xlu0 %v12632_v6, %s11845_s29 }
 0x258   : > { %v12793_v35 = vpop.permute.xlu0 %4819  ;;  %v4421_v13 = vpop.permute.xlu1 %4420 }
 0x25a   : > { %6425 = vrot.lane.b32.xlu1 %v12761_v63, %s11842_s27  ;;  %7236 = vrot.lane.b32.xlu0 %v12677_v16, %s11845_s29 }
 0x25c   : > { %v12799_v20 = vpop.permute.xlu0 %5219  ;;  %v4417_v19 = vpop.permute.xlu1 %4416 }
 0x25d   : > { %v4435_v23 = vsel %vm4434_vm13, %v4415_v22, %v4417_v19 }
 0x25e   : > { %7238 = vrot.lane.b32.xlu1 %v12668_v54, %s11845_s29  ;;  %7234 = vrot.lane.b32.xlu0 %v12672_v33, %s11845_s29 }
 0x260   : > { %v12805_v37 = vpop.permute.xlu0 %5630  ;;  %v12807_v39 = vpop.permute.xlu1 %4815 }
 0x261   : > { %v4834_v22 = vsel %vm4833_vm15, %v12779_v2, %v12807_v39 }
 0x262   : > { %7232 = vrot.lane.b32.xlu1 %v12623_v49, %s11845_s29  ;;  %7242 = vrot.lane.b32.xlu0 %v12686_v3, %s11845_s29 }
 0x264   : > { %v12813_v62 = vpop.permute.xlu0 %6411  ;;  %v12815_v55 = vpop.permute.xlu1 %5215 }
 0x265   : > { %v12819_v57 = vsel %vm5233_vm11, %v5214_v32, %v12815_v55 }
 0x266   : > { %7641 = vrot.lane.b32.xlu1 %v12623_v49, %s11846_s30  ;;  %7240 = vrot.lane.b32.xlu0 %v12675_v0, %s11845_s29 }
 0x268   : > { %v4419_v21 = vpop.permute.xlu0 %4418  ;;  %v12825_v58 = vpop.permute.xlu1 %5626 }
 0x269   : > { %v12829_v41 = vsel %vm5646_vm12, %v5625_v53, %v12825_v58  ;;  %v4436_v10 = vsel %vm4434_vm13, %v4417_v19, %v4419_v21  ;;  %v4437_v29 = vsel %vm4434_vm13, %v4419_v21, %v4421_v13  ;;  %v4401_v21 = vld [vmem:[%s15322_s5] sm:$0xf] }
 0x26a   : > { %6834 = vrot.lane.b32.xlu1 %v12761_v63, %s11856_s18  ;;  %7643 = vrot.lane.b32.xlu0 %v12672_v33, %s11846_s30 }
 0x26b   : > { %4488 = vmatprep.subr.mxu1 %v4436_v10 }
 0x26c   : > { %4489 = vmatpush1.msra.mxu1 %v4435_v23  ;;  %v12842_v52 = vpop.permute.xlu0 %4817  ;;  %v6408_v26 = vpop.permute.xlu1 %6407 }
 0x26d   : > { %10670 = vmatmul.mubr.msk.f32.vlgmr.msra.gmra.mxu1 %vm4454_vm14, %v12839_v9  ;;  %v4835_v4 = vsel %vm4833_vm15, %v12807_v39, %v12842_v52 }
 0x26e   : > { %7244 = vrot.lane.b32.xlu1 %v12761_v63, %s11845_s29  ;;  %7637 = vrot.lane.b32.xlu0 %v12640_v12, %s11846_s30 }
 0x26f   : > { %4664 = vmatprep.mubr.f32.mxu1 %v12850_v60 }
 0x270   : > { %v12853_v24 = vpop.permute.xlu0 %5217  ;;  %v4423_v5 = vpop.permute.xlu1 %4422 }
 0x271   : > { %v4438_v1 = vsel %vm4434_vm13, %v4421_v13, %v4423_v5 }
 0x272   : > { %7639 = vrot.lane.b32.xlu1 %v12616_v14, %s11846_s30  ;;  %7649 = vrot.lane.b32.xlu0 %v12675_v0, %s11846_s30 }
 0x273   : > { %4559 = vmatprep.subr.mxu0 %v4438_v1 }
 0x274   : > { %4560 = vmatpush1.msra.mxu0 %v4437_v29  ;;  %v12861_v56 = vpop.permute.xlu0 %5628  ;;  %v4822_v15 = vpop.permute.xlu1 %4821 }
 0x275   : > { %v12866_v25 = vsel %vm5646_vm12, %v12861_v56, %v12805_v37  ;;  %10671 = vmatmul.mubr.msk.f32.vlgmr.msra.gmra.mxu0 %vm4454_vm14, %v12839_v9  ;;  %v4837_v2 = vsel %vm4833_vm15, %v12793_v35, %v4822_v15 }
 0x276   : > { %7635 = vrot.lane.b32.xlu1 %v12632_v6, %s11846_s30  ;;  %7647 = vrot.lane.b32.xlu0 %v12668_v54, %s11846_s30 }
 0x277   : > { %4735 = vmatprep.mubr.f32.mxu0 %v12850_v60 }
 0x278   : > { %v4425_v36 = vpop.permute.xlu0 %4424  ;;  %v12875_v43 = vpop.permute.xlu1 %5221 }
 0x279   : > { %v4439_v11 = vsel %vm4434_vm13, %v4423_v5, %v4425_v36 }
 0x27a   : > { %7651 = vrot.lane.b32.xlu1 %v12686_v3, %s11846_s30  ;;  %7653 = vrot.lane.b32.xlu0 %v12761_v63, %s11846_s30 }
 0x27c   : > { %v12881_v28 = vpop.permute.xlu0 %5223  ;;  %v12883_v46 = vpop.permute.xlu1 %5632 }
 0x27e   : > { %7645 = vrot.lane.b32.xlu1 %v12677_v16, %s11846_s30  ;;  %s15363_s30 = sld [smem:[#allocation17_spill]] }
 0x280   : > { %v12890_v59 = vpop.permute.xlu0 %5638  ;;  %v12892_v7 = vpop.permute.xlu1 %6409 }
 0x281   : > { %v12896_v18 = vsel %vm570_vm0, %v6408_v26, %v12892_v7  ;;  %v4836_v26 = vsel %vm4833_vm15, %v12842_v52, %v12793_v35 }
 0x282   : > { %8045 = vperm.xlu1 %11824, %v8042_v27  }
 0x284   : > { %v4431_v8 = vpop.permute.xlu0 %4430  ;;  %v4429_v31 = vpop.permute.xlu1 %4428  ;;  %s523_s23 = scalar_lea.vmem %s15363_s30, %s15365_s22 }
 0x285   : > { %v4442_v17 = vsel %vm4434_vm13, %v4429_v31, %v4431_v8 }
 0x286   : > { %4701 = vmatprep.subr.mxu0 %v4442_v17 }
 0x288   : > { %v4826_v48 = vpop.permute.xlu0 %4825  ;;  %v4824_v38 = vpop.permute.xlu1 %4823 }
 0x289   : > { %v4839_v19 = vsel %vm4833_vm15, %v4824_v38, %v4826_v48  ;;  %v4838_v39 = vsel %vm4833_vm15, %v4822_v15, %v4824_v38  ;;  %v5235_v15 = vsel %vm5233_vm11, %v12815_v55, %v12853_v24  ;;  %v5648_v38 = vsel %vm5646_vm12, %v12825_v58, %v12861_v56  ;;  %v10686_v56 = vld [vmem:[%s15322_s5 + $0xc] sm:$0xf] }
 0x28c   : > { %v12899_v34 = vpop.permute.xlu0 %5229  ;;  %v4828_v40 = vpop.permute.xlu1 %4827 }
 0x28d   : > { %v4840_v52 = vsel %vm4833_vm15, %v4826_v48, %v4828_v40 }
 0x290   : > { %v12901_v61 = vpop.permute.xlu0 %5636  ;;  %v12903_v51 = vpop.permute.xlu1 %5227 }
 0x291   : > { %v5241_v55 = vsel %vm5233_vm11, %v12903_v51, %v12899_v34 }
 0x294   : > { %v12905_v45 = vpop.permute.xlu0 %6417  ;;  %v12907_v30 = vpop.permute.xlu1 %5634 }
 0x295   : > { %v5652_v58 = vsel %vm5646_vm12, %v12907_v30, %v12901_v61 }
 0x298   : > { %v4433_v42 = vpop.permute.xlu0 %4432  ;;  %v4427_v44 = vpop.permute.xlu1 %4426 }
 0x299   : > { %v4441_v47 = vsel %vm4434_vm13, %v4427_v44, %v4429_v31  ;;  %v4440_v50 = vsel %vm4434_vm13, %v4425_v36, %v4427_v44  ;;  %v4443_v13 = vsel %vm4434_vm13, %v4431_v8, %v4433_v42  ;;  %v5236_v36 = vsel %vm5233_vm11, %v12853_v24, %v12799_v20  ;;  %v10680_v31 = vld [vmem:[%s15322_s5 + $0x8] sm:$0xf] }
 0x29a   : > { %4630 = vmatprep.subr.mxu1 %v4440_v50  ;;  %4702 = vmatpush1.msra.mxu0 %v4441_v47 }
 0x29b   : > { %4631 = vmatpush1.msra.mxu1 %v4439_v11  ;;  %10673 = vmatmul.mubr.msk.f32.vlgmr.msra.gmra.mxu0 %vm4454_vm14, %v12839_v9 }
 0x29c   : > { %4886 = vmatprep.subr.mxu0 %v4835_v4  ;;  %v4832_v32 = vpop.permute.xlu0 %4831  ;;  %10672 = vmatmul.mubr.msk.f32.vlgmr.msra.gmra.mxu1 %vm4454_vm14, %v12839_v9  ;;  %v12922_v53 = vpop.permute.xlu1 %6419 }
 0x29d   : > { %4772 = vmatprep.subr.mxu1 %v4433_v42  ;;  %4887 = vmatpush1.msra.mxu0 %v4834_v22 }
 0x29e   : > { %4773 = vmatpush1.msra.mxu1 %v4443_v13  ;;  %5028 = vmatprep.subr.mxu0 %v4839_v19 }
 0x29f   : > { %4920 = vmatprep.mubr.f32.mxu0 %v12850_v60  ;;  %4957 = vmatprep.subr.mxu1 %v4837_v2 }
 0x2a0   : > { %4806 = vmatprep.mubr.f32.mxu1 %v12850_v60  ;;  %10675 = vmatmul.mubr.msk.f32.vlgmr.msra.gmra.mxu0 %vm4454_vm14, %v4401_v21  ;;  %v12935_v10 = vpop.permute.xlu0 %6415  ;;  %v4830_v23 = vpop.permute.xlu1 %4829 }
 0x2a1   : > { %5029 = vmatpush1.msra.mxu0 %v4838_v39  ;;  %10674 = vmatmul.mubr.msk.f32.vlgmr.msra.gmra.mxu1 %vm4454_vm14, %v12839_v9  ;;  %v4841_v5 = vsel %vm4833_vm15, %v4828_v40, %v4830_v23  ;;  %v4842_v1 = vsel %vm4833_vm15, %v4830_v23, %v4832_v32  ;;  %v5237_v9 = vsel %vm5233_vm11, %v12799_v20, %v12875_v43  ;;  %v10704_v23 = vld [vmem:[%s15322_s5 + $0x18] sm:$0xf] }
 0x2a2   : > { %4958 = vmatpush1.msra.mxu1 %v4836_v26  ;;  %5170 = vmatprep.subr.mxu0 %v4832_v32 }
 0x2a3   : > { %5062 = vmatprep.mubr.f32.mxu0 %v12850_v60  ;;  %5099 = vmatprep.subr.mxu1 %v4841_v5 }
 0x2a4   : > { %4991 = vmatprep.mubr.f32.mxu1 %v12850_v60  ;;  %10677 = vmatmul.mubr.msk.f32.vlgmr.msra.gmra.mxu0 %vm4454_vm14, %v4401_v21  ;;  %v12947_v29 = vpop.permute.xlu0 %6421  ;;  %v5226_v35 = vpop.permute.xlu1 %5225 }
 0x2a5   : > { %5171 = vmatpush1.msra.mxu0 %v4842_v1  ;;  %10676 = vmatmul.mubr.msk.f32.vlgmr.msra.gmra.mxu1 %vm4454_vm14, %v4401_v21  ;;  %v5239_v20 = vsel %vm5233_vm11, %v12881_v28, %v5226_v35  ;;  %v5240_v24 = vsel %vm5233_vm11, %v5226_v35, %v12903_v51 }
 0x2a6   : > { %5100 = vmatpush1.msra.mxu1 %v4840_v52  ;;  %5357 = vmatprep.subr.mxu0 %v5237_v9 }
 0x2a7   : > { %5286 = vmatprep.subr.mxu1 %v5235_v15  ;;  %5204 = vmatprep.mubr.f32.mxu0 %v12850_v60 }
 0x2a8   : > { %5133 = vmatprep.mubr.f32.mxu1 %v12850_v60  ;;  %10679 = vmatmul.mubr.msk.f32.vlgmr.msra.gmra.mxu0 %vm4454_vm14, %v4401_v21  ;;  %v5232_v27 = vpop.permute.xlu0 %5231  ;;  %v5641_v8 = vpop.permute.xlu1 %5640 }
 0x2a9   : > { %5358 = vmatpush1.msra.mxu0 %v5236_v36  ;;  %10678 = vmatmul.mubr.msk.f32.vlgmr.msra.gmra.mxu1 %vm4454_vm14, %v4401_v21  ;;  %v5654_v47 = vsel %vm5646_vm12, %v12890_v59, %v5641_v8 }
 0x2aa   : > { %5287 = vmatpush1.msra.mxu1 %v12819_v57  ;;  %5499 = vmatprep.subr.mxu0 %v5241_v55  ;;  %v5238_v57 = vsel %vm5233_vm11, %v12875_v43, %v12881_v28  ;;  %v5242_v43 = vsel %vm5233_vm11, %v12899_v34, %v5232_v27  ;;  %v5650_v28 = vsel %vm5646_vm12, %v12805_v37, %v12883_v46 }
 0x2ab   : > { %5428 = vmatprep.subr.mxu1 %v5239_v20  ;;  %5391 = vmatprep.mubr.f32.mxu0 %v12850_v60 }
 0x2ac   : > { %5320 = vmatprep.mubr.f32.mxu1 %v12850_v60  ;;  %10682 = vmatmul.mubr.msk.f32.vlgmr.msra.gmra.mxu0 %vm4454_vm14, %v10680_v31  ;;  %v12978_v17 = vpop.permute.xlu0 %6423  ;;  %v12980_v48 = vpop.permute.xlu1 %6413 }
 0x2ad   : > { %5500 = vmatpush1.msra.mxu0 %v5240_v24  ;;  %10681 = vmatmul.mubr.msk.f32.vlgmr.msra.gmra.mxu1 %vm4454_vm14, %v10680_v31 }
 0x2ae   : > { %5429 = vmatpush1.msra.mxu1 %v5238_v57  ;;  %5700 = vmatprep.subr.mxu0 %v5648_v38 }
 0x2af   : > { %5570 = vmatprep.subr.mxu1 %v5232_v27  ;;  %5533 = vmatprep.mubr.f32.mxu0 %v12850_v60  ;;  %v10710_v27 = vld [vmem:[%s15322_s5 + $0x1c] sm:$0xf] }
 0x2b0   : > { %5462 = vmatprep.mubr.f32.mxu1 %v12850_v60  ;;  %10684 = vmatmul.mubr.msk.f32.vlgmr.msra.gmra.mxu0 %vm4454_vm14, %v10680_v31  ;;  %v5645_v40 = vpop.permute.xlu0 %5644  ;;  %v12992_v51 = vpop.permute.xlu1 %6822 }
 0x2b1   : > { %5701 = vmatpush1.msra.mxu0 %v12829_v41  ;;  %10683 = vmatmul.mubr.msk.f32.vlgmr.msra.gmra.mxu1 %vm4454_vm14, %v10680_v31  ;;  %v5651_v41 = vsel %vm5646_vm12, %v12883_v46, %v12907_v30 }
 0x2b2   : > { %5571 = vmatpush1.msra.mxu1 %v5242_v43  ;;  %5842 = vmatprep.subr.mxu0 %v5652_v58 }
 0x2b3   : > { %5771 = vmatprep.subr.mxu1 %v5650_v28  ;;  %5734 = vmatprep.mubr.f32.mxu0 %v12850_v60 }
 0x2b4   : > { %5604 = vmatprep.mubr.f32.mxu1 %v12850_v60  ;;  %10687 = vmatmul.mubr.msk.f32.vlgmr.msra.gmra.mxu0 %vm4454_vm14, %v10686_v56  ;;  %v13013_v34 = vpop.permute.xlu0 %6824  ;;  %v5643_v42 = vpop.permute.xlu1 %5642 }
 0x2b5   : > { %5843 = vmatpush1.msra.mxu0 %v5651_v41  ;;  %10685 = vmatmul.mubr.msk.f32.vlgmr.msra.gmra.mxu1 %vm4454_vm14, %v10680_v31  ;;  %v5656_v44 = vsel %vm5646_vm12, %v5643_v42, %v5645_v40  ;;  %v5655_v37 = vsel %vm5646_vm12, %v5641_v8, %v5643_v42 }
 0x2b6   : > { %5772 = vmatpush1.msra.mxu1 %v12866_v25  ;;  %5876 = vmatprep.mubr.f32.mxu0 %v12850_v60  ;;  %v5653_v25 = vsel %vm5646_vm12, %v12901_v61, %v12890_v59  ;;  %v6431_v59 = vsel %vm570_vm0, %v12935_v10, %v12905_v45  ;;  %v6434_v61 = vsel %vm570_vm0, %v12947_v29, %v12978_v17 }
 0x2b7   : > { %5913 = vmatprep.subr.mxu1 %v5654_v47  ;;  %5984 = vmatprep.subr.mxu0 %v5656_v44 }
 0x2b8   : > { %5805 = vmatprep.mubr.f32.mxu1 %v12850_v60  ;;  %10689 = vmatmul.mubr.msk.f32.vlgmr.msra.gmra.mxu0 %vm4454_vm14, %v10686_v56  ;;  %v13024_v46 = vpop.permute.xlu0 %6818  ;;  %v13026_v30 = vpop.permute.xlu1 %6820 }
 0x2b9   : > { %5985 = vmatpush1.msra.mxu0 %v5655_v37  ;;  %10688 = vmatmul.mubr.msk.f32.vlgmr.msra.gmra.mxu1 %vm4454_vm14, %v10686_v56  ;;  %v6838_v32 = vsel %vm6836_vm1, %v13024_v46, %v13026_v30  ;;  %v6839_v21 = vsel %vm6836_vm1, %v13026_v30, %v12992_v51 }
 0x2ba   : > { %5914 = vmatpush1.msra.mxu1 %v5653_v25  ;;  %6141 = vmatprep.subr.mxu0 %v12623_v49  ;;  %v10692_v49 = vld [vmem:[%s15322_s5 + $0x10] sm:$0xf] }
 0x2bb   : > { %6070 = vmatprep.subr.mxu1 %v12640_v12  ;;  %6018 = vmatprep.mubr.f32.mxu0 %v12850_v60 }
 0x2bc   : > { %5947 = vmatprep.mubr.f32.mxu1 %v12850_v60  ;;  %10691 = vmatmul.mubr.msk.f32.vlgmr.msra.gmra.mxu0 %vm4454_vm14, %v10686_v56  ;;  %v13037_v50 = vpop.permute.xlu0 %6830  ;;  %v13039_v11 = vpop.permute.xlu1 %6816 }
 0x2bd   : > { %6142 = vmatpush1.msra.mxu0 %v12616_v14  ;;  %10690 = vmatmul.mubr.msk.f32.vlgmr.msra.gmra.mxu1 %vm4454_vm14, %v10686_v56  ;;  %v6837_v2 = vsel %vm6836_vm1, %v13039_v11, %v13024_v46 }
 0x2be   : > { %6071 = vmatpush1.msra.mxu1 %v12632_v6  ;;  %6283 = vmatprep.subr.mxu0 %v12675_v0  ;;  %v6428_v6 = vsel %vm570_vm0, %v12892_v7, %v12813_v62 }
 0x2bf   : > { %6212 = vmatprep.subr.mxu1 %v12677_v16  ;;  %6175 = vmatprep.mubr.f32.mxu0 %v12850_v60  ;;  %v10698_v16 = vld [vmem:[%s15322_s5 + $0x14] sm:$0xf] }
 0x2c0   : > { %6104 = vmatprep.mubr.f32.mxu1 %v12850_v60  ;;  %10694 = vmatmul.mubr.msk.f32.vlgmr.msra.gmra.mxu0 %vm4454_vm14, %v10692_v49  ;;  %v13052_v12 = vpop.permute.xlu0 %6828  ;;  %v13054_v14 = vpop.permute.xlu1 %6832 }
 0x2c1   : > { %6284 = vmatpush1.msra.mxu0 %v12668_v54  ;;  %10693 = vmatmul.mubr.msk.f32.vlgmr.msra.gmra.mxu1 %vm4454_vm14, %v10692_v49  ;;  %v6843_v1 = vsel %vm6836_vm1, %v13052_v12, %v13037_v50 }
 0x2c2   : > { %6213 = vmatpush1.msra.mxu1 %v12672_v33  ;;  %6479 = vmatprep.subr.mxu0 %v6428_v6  ;;  %v6432_v33 = vsel %vm570_vm0, %v12905_v45, %v12922_v53  ;;  %v10769_v6 = vld [vmem:[%s15324_s7 + $0x600] sm:$0xff] }
 0x2c3   : > { %6354 = vmatprep.subr.mxu1 %v12761_v63  ;;  %6317 = vmatprep.mubr.f32.mxu0 %v12850_v60  ;;  %v6430_v63 = vsel %vm570_vm0, %v12980_v48, %v12935_v10  ;;  %v6844_v10 = vsel %vm6836_vm1, %v13037_v50, %v13054_v14 }
 0x2c4   : > { %6246 = vmatprep.mubr.f32.mxu1 %v12850_v60  ;;  %10696 = vmatmul.mubr.msk.f32.vlgmr.msra.gmra.mxu0 %vm4454_vm14, %v10692_v49  ;;  %v13066_v0 = vpop.permute.xlu0 %7228  ;;  %v6827_v54 = vpop.permute.xlu1 %6826 }
 0x2c5   : > { %6480 = vmatpush1.msra.mxu0 %v12896_v18  ;;  %10695 = vmatmul.mubr.msk.f32.vlgmr.msra.gmra.mxu1 %vm4454_vm14, %v10692_v49  ;;  %v6842_v39 = vsel %vm6836_vm1, %v6827_v54, %v13052_v12 }
 0x2c6   : > { %6355 = vmatpush1.msra.mxu1 %v12686_v3  ;;  %6621 = vmatprep.subr.mxu0 %v6432_v33  ;;  %v6429_v3 = vsel %vm570_vm0, %v12813_v62, %v12980_v48  ;;  %v6433_v62 = vsel %vm570_vm0, %v12922_v53, %v12947_v29  ;;  %v6840_v53 = vsel %vm6836_vm1, %v12992_v51, %v13013_v34  ;;  %v10783_v33 = vld [vmem:[%s15324_s7 + $0x670] sm:$0xff] }
 0x2c7   : > { %6550 = vmatprep.subr.mxu1 %v6430_v63  ;;  %6513 = vmatprep.mubr.f32.mxu0 %v12850_v60  ;;  %v6841_v29 = vsel %vm6836_vm1, %v13013_v34, %v6827_v54  ;;  %v10716_v34 = vld [vmem:[%s15322_s5 + $0x20] sm:$0xf]  ;;  %v10767_v63 = vld [vmem:[%s15324_s7 + $0x5f0] sm:$0xff] }
 0x2c8   : > { %6388 = vmatprep.mubr.f32.mxu1 %v12850_v60  ;;  %10699 = vmatmul.mubr.msk.f32.vlgmr.msra.gmra.mxu0 %vm4454_vm14, %v10698_v16  ;;  %v7227_v7 = vpop.permute.xlu0 %7226  ;;  %v13086_v18 = vpop.permute.xlu1 %7230  ;;  %v10753_v54 = vld [vmem:[%s15324_s7 + $0x580] sm:$0xff] }
 0x2c9   : > { %6622 = vmatpush1.msra.mxu0 %v6431_v59  ;;  %10697 = vmatmul.mubr.msk.f32.vlgmr.msra.gmra.mxu1 %vm4454_vm14, %v10692_v49  ;;  %v7247_v35 = vsel %vm1780_vm4, %v13066_v0, %v13086_v18  ;;  %v7246_v15 = vsel %vm1780_vm4, %v7227_v7, %v13066_v0  ;;  %v10784_v0 = vld [vmem:[%s15324_s7 + $0x678] sm:$0xff]  ;;  %v10782_v7 = vld [vmem:[%s15324_s7 + $0x668] sm:$0xff] }
 0x2ca   : > { %6551 = vmatpush1.msra.mxu1 %v6429_v3  ;;  %6655 = vmatprep.mubr.f32.mxu0 %v12850_v60  ;;  %v10752_v59 = vld [vmem:[%s15324_s7 + $0x578] sm:$0xff]  ;;  %v10766_v3 = vld [vmem:[%s15324_s7 + $0x5e8] sm:$0xff] }
 0x2cb   : > { %6692 = vmatprep.subr.mxu1 %v6434_v61  ;;  %6584 = vmatprep.mubr.f32.mxu1 %v12850_v60  ;;  %v10751_v61 = vld [vmem:[%s15324_s7 + $0x570] sm:$0xff] }
 0x2cc   : > { %10701 = vmatmul.mubr.msk.f32.vlgmr.msra.gmra.mxu0 %vm4454_vm14, %v10698_v16  ;;  %v7237_v45 = vpop.permute.xlu0 %7236  ;;  %v6426_v4 = vpop.permute.xlu1 %6425 }
 0x2cd   : > { %10700 = vmatmul.mubr.msk.f32.vlgmr.msra.gmra.mxu1 %vm4454_vm14, %v10698_v16  ;;  %v6435_v22 = vsel %vm570_vm0, %v12978_v17, %v6426_v4  ;;  %6763 = vmatprep.subr.mxu0 %v6426_v4  ;;  %v10735_v4 = vld [vmem:[%s15324_s7 + $0x4f0] sm:$0xff]  ;;  %vm8390_vm0 = vcmask 1042432  }
 0x2ce   : > { %6693 = vmatpush1.msra.mxu1 %v6433_v62  ;;  %6764 = vmatpush1.msra.mxu0 %v6435_v22  ;;  %v10765_v62 = vld [vmem:[%s15324_s7 + $0x5e0] sm:$0xff]  ;;  %v10750_v22 = vld [vmem:[%s15324_s7 + $0x568] sm:$0xff] }
 0x2cf   : > { %6889 = vmatprep.subr.mxu1 %v6838_v32  ;;  %6797 = vmatprep.mubr.f32.mxu0 %v12850_v60  ;;  %v10780_v32 = vld [vmem:[%s15324_s7 + $0x658] sm:$0xff] }
 0x2d0   : > { %6726 = vmatprep.mubr.f32.mxu1 %v12850_v60  ;;  %10703 = vmatmul.mubr.msk.f32.vlgmr.msra.gmra.mxu0 %vm4454_vm14, %v10698_v16  ;;  %v7235_v13 = vpop.permute.xlu0 %7234  ;;  %v13113_v19 = vpop.permute.xlu1 %7238 }
 0x2d1   : > { %6960 = vmatprep.subr.mxu0 %v6840_v53  ;;  %10702 = vmatmul.mubr.msk.f32.vlgmr.msra.gmra.mxu1 %vm4454_vm14, %v10698_v16  ;;  %v7251_v36 = vsel %vm1780_vm4, %v7237_v45, %v13113_v19  ;;  %v7250_v31 = vsel %vm1780_vm4, %v7235_v13, %v7237_v45  ;;  %v10737_v16 = vld [vmem:[%s15324_s7 + $0x500] sm:$0xff]  ;;  %v10734_v53 = vld [vmem:[%s15324_s7 + $0x4e8] sm:$0xff] }
 0x2d2   : > { %6890 = vmatpush1.msra.mxu1 %v6837_v2  ;;  %6961 = vmatpush1.msra.mxu0 %v6839_v21  ;;  %v10781_v45 = vld [vmem:[%s15324_s7 + $0x660] sm:$0xff]  ;;  %v10779_v21 = vld [vmem:[%s15324_s7 + $0x650] sm:$0xff] }
 0x2d3   : > { %7031 = vmatprep.subr.mxu1 %v6842_v39  ;;  %7102 = vmatprep.subr.mxu0 %v6844_v10  ;;  %v10733_v2 = vld [vmem:[%s15324_s7 + $0x4e0] sm:$0xff]  ;;  %v10763_v39 = vld [vmem:[%s15324_s7 + $0x5d0] sm:$0xff]  ;;  %v10748_v10 = vld [vmem:[%s15324_s7 + $0x558] sm:$0xff] }
 0x2d4   : > { %6994 = vmatprep.mubr.f32.mxu0 %v12850_v60  ;;  %6923 = vmatprep.mubr.f32.mxu1 %v12850_v60  ;;  %v7243_v26 = vpop.permute.xlu0 %7242  ;;  %v7233_v5 = vpop.permute.xlu1 %7232 }
 0x2d5   : > { %10706 = vmatmul.mubr.msk.f32.vlgmr.msra.gmra.mxu0 %vm4454_vm14, %v10704_v23  ;;  %10705 = vmatmul.mubr.msk.f32.vlgmr.msra.gmra.mxu1 %vm4454_vm14, %v10704_v23  ;;  %v7249_v24 = vsel %vm1780_vm4, %v7233_v5, %v7235_v13  ;;  %v7248_v17 = vsel %vm1780_vm4, %v13086_v18, %v7233_v5  ;;  %v10736_v18 = vld [vmem:[%s15324_s7 + $0x4f8] sm:$0xff]  ;;  %v10762_v5 = vld [vmem:[%s15324_s7 + $0x5c8] sm:$0xff] }
 0x2d6   : > { %7103 = vmatpush1.msra.mxu0 %v6843_v1  ;;  %7032 = vmatpush1.msra.mxu1 %v6841_v29  ;;  %v10764_v13 = vld [vmem:[%s15324_s7 + $0x5d8] sm:$0xff]  ;;  %v10747_v1 = vld [vmem:[%s15324_s7 + $0x550] sm:$0xff]  ;;  %v10777_v29 = vld [vmem:[%s15324_s7 + $0x640] sm:$0xff] }
 0x2d7   : > { %7298 = vmatprep.subr.mxu0 %v7247_v35  ;;  %7136 = vmatprep.mubr.f32.mxu0 %v12850_v60  ;;  %v10731_v35 = vld [vmem:[%s15324_s7 + $0x4d0] sm:$0xff] }
 0x2d8   : > { %7065 = vmatprep.mubr.f32.mxu1 %v12850_v60  ;;  %v7241_v52 = vpop.permute.xlu0 %7240  ;;  %v7642_v9 = vpop.permute.xlu1 %7641 }
 0x2d9   : > { %10708 = vmatmul.mubr.msk.f32.vlgmr.msra.gmra.mxu0 %vm4454_vm14, %v10704_v23  ;;  %10707 = vmatmul.mubr.msk.f32.vlgmr.msra.gmra.mxu1 %vm4454_vm14, %v10704_v23  ;;  %v7253_v40 = vsel %vm1780_vm4, %v7241_v52, %v7243_v26  ;;  %v7252_v43 = vsel %vm1780_vm4, %v13113_v19, %v7241_v52  ;;  %v10749_v19 = vld [vmem:[%s15324_s7 + $0x560] sm:$0xff] }
 0x2da   : > { %7299 = vmatpush1.msra.mxu0 %v7246_v15  ;;  %7332 = vmatprep.mubr.f32.mxu0 %v12850_v60  ;;  %v10761_v52 = vld [vmem:[%s15324_s7 + $0x5c0] sm:$0xff]  ;;  %v10776_v15 = vld [vmem:[%s15324_s7 + $0x638] sm:$0xff] }
 0x2db   : > { %7440 = vmatprep.subr.mxu0 %v7251_v36  ;;  %7207 = vmatprep.mubr.f32.mxu1 %v12850_v60  ;;  %v10730_v36 = vld [vmem:[%s15324_s7 + $0x4c8] sm:$0xff] }
 0x2dc   : > { %v7644_v8 = vpop.permute.xlu0 %7643  ;;  %v6835_v55 = vpop.permute.xlu1 %6834 }
 0x2dd   : > { %10711 = vmatmul.mubr.msk.f32.vlgmr.msra.gmra.mxu0 %vm4454_vm14, %v10710_v27  ;;  %v6845_v20 = vsel %vm6836_vm1, %v13054_v14, %v6835_v55  ;;  %7173 = vmatprep.subr.mxu1 %v6835_v55  ;;  %v7658_v51 = vsel %vm2200_vm5, %v7642_v9, %v7644_v8  ;;  %v10785_v14 = vld [vmem:[%s15324_s7 + $0x680] sm:$0xff]  ;;  %v10775_v55 = vld [vmem:[%s15324_s7 + $0x630] sm:$0xff] }
 0x2de   : > { %7441 = vmatpush1.msra.mxu0 %v7250_v31  ;;  %7174 = vmatpush1.msra.mxu1 %v6845_v20  ;;  %v10729_v31 = vld [vmem:[%s15324_s7 + $0x4c0] sm:$0xff]  ;;  %v10759_v20 = vld [vmem:[%s15324_s7 + $0x5b0] sm:$0xff] }
 0x2df   : > { %7474 = vmatprep.mubr.f32.mxu0 %v12850_v60  ;;  %10709 = vmatmul.mubr.msk.f32.vlgmr.msra.gmra.mxu1 %vm4454_vm14, %v10704_v23  ;;  %v10778_v23 = vld [vmem:[%s15324_s7 + $0x648] sm:$0xff] }
 0x2e0   : > { %7369 = vmatprep.subr.mxu1 %v7249_v24  ;;  %v7638_v48 = vpop.permute.xlu0 %7637  ;;  %v7245_v57 = vpop.permute.xlu1 %7244  ;;  %7403 = vmatprep.mubr.f32.mxu1 %v12850_v60  ;;  %v10744_v24 = vld [vmem:[%s15324_s7 + $0x538] sm:$0xff] }
 0x2e1   : > { %10713 = vmatmul.mubr.msk.f32.vlgmr.msra.gmra.mxu0 %vm4454_vm14, %v10710_v27  ;;  %7370 = vmatpush1.msra.mxu1 %v7248_v17  ;;  %v7254_v38 = vsel %vm1780_vm4, %v7243_v26, %v7245_v57  ;;  %v10732_v26 = vld [vmem:[%s15324_s7 + $0x4d8] sm:$0xff]  ;;  %v10774_v17 = vld [vmem:[%s15324_s7 + $0x628] sm:$0xff]  ;;  %vm10388_vm4 = vcmask 523264  }
 0x2e2   : > { %7511 = vmatprep.subr.mxu1 %v7253_v40  ;;  %7582 = vmatprep.subr.mxu0 %v7245_v57  ;;  %v10758_v57 = vld [vmem:[%s15324_s7 + $0x5a8] sm:$0xff]  ;;  %v10773_v40 = vld [vmem:[%s15324_s7 + $0x620] sm:$0xff] }
 0x2e3   : > { %7583 = vmatpush1.msra.mxu0 %v7254_v38  ;;  %7616 = vmatprep.mubr.f32.mxu0 %v12850_v60  ;;  %v10743_v38 = vld [vmem:[%s15324_s7 + $0x530] sm:$0xff] }
 0x2e4   : > { %10712 = vmatmul.mubr.msk.f32.vlgmr.msra.gmra.mxu1 %vm4454_vm14, %v10710_v27  ;;  %7778 = vmatprep.subr.mxu0 %v7658_v51  ;;  %v7640_v58 = vpop.permute.xlu1 %7639  ;;  %v7650_v56 = vpop.permute.xlu0 %7649  ;;  %v10727_v51 = vld [vmem:[%s15324_s7 + $0x4b0] sm:$0xff] }
 0x2e5   : > { %7512 = vmatpush1.msra.mxu1 %v7252_v43  ;;  %10715 = vmatmul.mubr.msk.f32.vlgmr.msra.gmra.mxu0 %vm4454_vm14, %v10710_v27  ;;  %v7657_v28 = vsel %vm2200_vm5, %v7640_v58, %v7642_v9  ;;  %v7656_v41 = vsel %vm2200_vm5, %v7638_v48, %v7640_v58  ;;  %v10746_v9 = vld [vmem:[%s15324_s7 + $0x548] sm:$0xff]  ;;  %v10757_v43 = vld [vmem:[%s15324_s7 + $0x5a0] sm:$0xff] }
 0x2e6   : > { %7545 = vmatprep.mubr.f32.mxu1 %v12850_v60  ;;  %7707 = vmatprep.subr.mxu1 %v7656_v41  ;;  %v10742_v58 = vld [vmem:[%s15324_s7 + $0x528] sm:$0xff]  ;;  %v10756_v41 = vld [vmem:[%s15324_s7 + $0x598] sm:$0xff] }
 0x2e7   : > { %7779 = vmatpush1.msra.mxu0 %v7657_v28  ;;  %7812 = vmatprep.mubr.f32.mxu0 %v12850_v60  ;;  %v10726_v28 = vld [vmem:[%s15324_s7 + $0x4a8] sm:$0xff] }
 0x2e8   : > { %10714 = vmatmul.mubr.msk.f32.vlgmr.msra.gmra.mxu1 %vm4454_vm14, %v10710_v27  ;;  %v7636_v42 = vpop.permute.xlu1 %7635  ;;  %v7648_v37 = vpop.permute.xlu0 %7647  ;;  %v10760_v27 = vld [vmem:[%s15324_s7 + $0x5b8] sm:$0xff] }
 0x2e9   : > { %10718 = vmatmul.mubr.msk.f32.vlgmr.msra.gmra.mxu0 %vm4454_vm14, %v10716_v34  ;;  %v7655_v44 = vsel %vm2200_vm5, %v7636_v42, %v7638_v48  ;;  %7741 = vmatprep.mubr.f32.mxu1 %v12850_v60  ;;  %v7661_v30 = vsel %vm2200_vm5, %v7648_v37, %v7650_v56  ;;  %v10728_v48 = vld [vmem:[%s15324_s7 + $0x4b8] sm:$0xff]  ;;  %v10771_v42 = vld [vmem:[%s15324_s7 + $0x610] sm:$0xff] }
 0x2ea   : > { %7708 = vmatpush1.msra.mxu1 %v7655_v44  ;;  %7954 = vmatprep.mubr.f32.mxu0 %v12850_v60  ;;  %v10725_v44 = vld [vmem:[%s15324_s7 + $0x4a0] sm:$0xff] }
 0x2ec   : > { %10717 = vmatmul.mubr.msk.f32.vlgmr.msra.gmra.mxu1 %vm4454_vm14, %v10716_v34  ;;  %v7652_v47 = vpop.permute.xlu1 %7651  ;;  %v7654_v50 = vpop.permute.xlu0 %7653 }
 0x2ed   : > { %v7662_v46 = vsel %vm2200_vm5, %v7650_v56, %v7652_v47  ;;  %7883 = vmatprep.mubr.f32.mxu1 %v12850_v60  ;;  %v7663_v12 = vsel %vm2200_vm5, %v7652_v47, %v7654_v50  ;;  %v10772_v56 = vld [vmem:[%s15324_s7 + $0x618] sm:$0xff] }
 0x2ee   : > { %7920 = vmatprep.subr.mxu0 %v7662_v46  ;;  %v10740_v47 = vld [vmem:[%s15324_s7 + $0x518] sm:$0xff]  ;;  %v10770_v46 = vld [vmem:[%s15324_s7 + $0x608] sm:$0xff] }
 0x2ef   : > { %7921 = vmatpush1.msra.mxu0 %v7661_v30  ;;  %v10724_v30 = vld [vmem:[%s15324_s7 + $0x498] sm:$0xff] }
 0x2f0   : > { %10720 = vmatmul.mubr.msk.f32.vlgmr.msra.gmra.mxu0 %vm4454_vm14, %v10716_v34  ;;  %v7646_v25 = vpop.permute.xlu1 %7645  ;;  %11171 = vmatprep.subr.mxu0 %v10753_v54 }
 0x2f1   : > { %v7659_v11 = vsel %vm2200_vm5, %v7644_v8, %v7646_v25  ;;  %v7660_v49 = vsel %vm2200_vm5, %v7646_v25, %v7648_v37  ;;  %11172 = vmatpush3.msra.mxu0 %v10737_v16  ;;  %v10745_v8 = vld [vmem:[%s15324_s7 + $0x540] sm:$0xff]  ;;  %v10755_v37 = vld [vmem:[%s15324_s7 + $0x590] sm:$0xff]  ;;  %v10754_v25 = vld [vmem:[%s15324_s7 + $0x588] sm:$0xff]  ;;  %vm10462_vm5 = vcmask 8192  }
 0x2f2   : > { %7849 = vmatprep.subr.mxu1 %v7660_v49  ;;  %11173 = vmatprep.subr.mxu0 %v10752_v59  ;;  %v10723_v49 = vld [vmem:[%s15324_s7 + $0x490] sm:$0xff] }
 0x2f3   : > { %7850 = vmatpush1.msra.mxu1 %v7659_v11  ;;  %11174 = vmatpush3.msra.mxu0 %v10736_v18  ;;  %v10849_v11 = vld [vmem:[%s15324_s7 + $0x880] sm:$0xff] }
 0x2f4   : > { %10719 = vmatmul.mubr.msk.f32.vlgmr.msra.gmra.mxu1 %vm4454_vm14, %v10716_v34  ;;  %7991 = vmatprep.subr.mxu1 %v7654_v50  ;;  %v10739_v50 = vld [vmem:[%s15324_s7 + $0x510] sm:$0xff] }
 0x2f5   : > { %7992 = vmatpush1.msra.mxu1 %v7663_v12  ;;  %8025 = vmatprep.mubr.f32.mxu1 %v12850_v60  ;;  %v10768_v60 = vld [vmem:[%s15324_s7 + $0x5f8] sm:$0xff]  ;;  %v10738_v12 = vld [vmem:[%s15324_s7 + $0x508] sm:$0xff] }
 0x2f6   : > { %11206 = vmatprep.subr.mxu1 %v10785_v14  ;;  %11175 = vmatprep.subr.mxu0 %v10751_v61  ;;  %v10722_v14 = vld [vmem:[%s15324_s7 + $0x488] sm:$0xff] }
 0x2f7   : > { %11176 = vmatpush3.msra.mxu0 %v10735_v4 }
 0x2f8   : > { %10721 = vmatmul.mubr.msk.f32.vlgmr.msra.gmra.mxu1 %vm4454_vm14, %v10716_v34  ;;  %11177 = vmatprep.subr.mxu0 %v10750_v22  ;;  %v10741_v34 = vld [vmem:[%s15324_s7 + $0x520] sm:$0xff] }
 0x2f9   : > { %11207 = vmatpush3.msra.mxu1 %v10769_v6  ;;  %11178 = vmatpush3.msra.mxu0 %v10734_v53  ;;  %v10817_v6 = vld [vmem:[%s15324_s7 + $0x780] sm:$0xff] }
 0x2fa   : > { %11208 = vmatprep.subr.mxu1 %v10784_v0  ;;  %11179 = vmatprep.subr.mxu0 %v10749_v19 }
 0x2fb   : > { %11209 = vmatpush3.msra.mxu1 %v10768_v60  ;;  %11180 = vmatpush3.msra.mxu0 %v10733_v2 }
 0x2fc   : > { %11210 = vmatprep.subr.mxu1 %v10783_v33  ;;  %11181 = vmatprep.subr.mxu0 %v10748_v10 }
 0x2fd   : > { %11211 = vmatpush3.msra.mxu1 %v10767_v63  ;;  %11182 = vmatpush3.msra.mxu0 %v10732_v26 }
 0x2fe   : > { %11212 = vmatprep.subr.mxu1 %v10782_v7  ;;  %11183 = vmatprep.subr.mxu0 %v10747_v1 }
 0x2ff   : > { %11213 = vmatpush3.msra.mxu1 %v10766_v3  ;;  %11184 = vmatpush3.msra.mxu0 %v10731_v35 }
 0x300   : > { %11214 = vmatprep.subr.mxu1 %v10781_v45  ;;  %11185 = vmatprep.subr.mxu0 %v10746_v9 }
 0x301   : > { %11215 = vmatpush3.msra.mxu1 %v10765_v62  ;;  %11186 = vmatpush3.msra.mxu0 %v10730_v36 }
 0x302   : > { %11216 = vmatprep.subr.mxu1 %v10780_v32  ;;  %11187 = vmatprep.subr.mxu0 %v10745_v8 }
 0x303   : > { %11217 = vmatpush3.msra.mxu1 %v10764_v13  ;;  %11188 = vmatpush3.msra.mxu0 %v10729_v31 }
 0x304   : > { %11218 = vmatprep.subr.mxu1 %v10779_v21  ;;  %11189 = vmatprep.subr.mxu0 %v10744_v24 }
 0x305   : > { %11219 = vmatpush3.msra.mxu1 %v10763_v39  ;;  %11190 = vmatpush3.msra.mxu0 %v10728_v48 }
 0x306   : > { %11220 = vmatprep.subr.mxu1 %v10778_v23  ;;  %11191 = vmatprep.subr.mxu0 %v10743_v38 }
 0x307   : > { %11221 = vmatpush3.msra.mxu1 %v10762_v5  ;;  %11192 = vmatpush3.msra.mxu0 %v10727_v51 }
 0x308   : > { %11222 = vmatprep.subr.mxu1 %v10777_v29  ;;  %11193 = vmatprep.subr.mxu0 %v10742_v58 }
 0x309   : > { %11223 = vmatpush3.msra.mxu1 %v10761_v52  ;;  %11194 = vmatpush3.msra.mxu0 %v10726_v28 }
 0x30a   : > { %11224 = vmatprep.subr.mxu1 %v10776_v15  ;;  %11195 = vmatprep.subr.mxu0 %v10741_v34 }
 0x30b   : > { %11225 = vmatpush3.msra.mxu1 %v10760_v27  ;;  %11196 = vmatpush3.msra.mxu0 %v10725_v44 }
 0x30c   : > { %11226 = vmatprep.subr.mxu1 %v10775_v55  ;;  %11197 = vmatprep.subr.mxu0 %v10740_v47 }
 0x30d   : > { %11227 = vmatpush3.msra.mxu1 %v10759_v20  ;;  %11198 = vmatpush3.msra.mxu0 %v10724_v30 }
 0x30e   : > { %11228 = vmatprep.subr.mxu1 %v10774_v17  ;;  %11199 = vmatprep.subr.mxu0 %v10739_v50 }
 0x30f   : > { %11229 = vmatpush3.msra.mxu1 %v10758_v57  ;;  %11200 = vmatpush3.msra.mxu0 %v10723_v49 }
 0x310   : > { %11230 = vmatprep.subr.mxu1 %v10773_v40  ;;  %11201 = vmatprep.subr.mxu0 %v10738_v12 }
 0x311   : > { %11231 = vmatpush3.msra.mxu1 %v10757_v43  ;;  %11202 = vmatpush3.msra.mxu0 %v10722_v14 }
 0x312   : > { %11232 = vmatprep.subr.mxu1 %v10772_v56  ;;  %11241 = vmatprep.subr.mxu0 %v10817_v6 }
 0x313   : > { %11233 = vmatpush3.msra.mxu1 %v10756_v41 }
 0x314   : > { %11234 = vmatprep.subr.mxu1 %v10771_v42 }
 0x315   : > { %11235 = vmatpush3.msra.mxu1 %v10755_v37 }
 0x316   : > { %11236 = vmatprep.subr.mxu1 %v10770_v46 }
 0x317   : > { %11237 = vmatpush3.msra.mxu1 %v10754_v25 }
 0x318   : > { %11276 = vmatprep.subr.mxu1 %v10849_v11 }
 0x32d   : > { %v4524_v60 = vpop.f32.mrf.mxu1 }
 0x32f   : > { %v13399_v33 = vpop.f32.mrf.mxu1 }
 0x335   : > { %v13395_v0 = vpop.f32.mrf.mxu0 }
 0x337   : > { %v13397_v54 = vpop.f32.mrf.mxu0 }
 0x35b   : > { %v4737_v16 = vpop.f32.mrf.mxu0 }
 0x35c   : > { %v4666_v63 = vpop.f32.mrf.mxu1 }
 0x35d   : > { %v13401_v59 = vpop.f32.mrf.mxu0 }
 0x35e   : > { %v4668_v7 = vpop.f32.mrf.mxu1 }
 0x360   : > { %v4922_v18 = vpop.f32.mrf.mxu0 }
 0x361   : > { %v13403_v3 = vadd.f32 %v4922_v18, %v4524_v60  ;;  %v4808_v61 = vpop.f32.mrf.mxu1 }
 0x362   : > { %v13405_v45 = vpop.f32.mrf.mxu0 }
 0x363   : > { %v4810_v4 = vpop.f32.mrf.mxu1 }
 0x364   : > { %v5064_v62 = vpop.f32.mrf.mxu0 }
 0x365   : > { %v5065_v22 = vadd.f32 %v5064_v62, %v4666_v63  ;;  %v13407_v32 = vpop.f32.mrf.mxu1 }
 0x366   : > { %v5066_v53 = vpop.f32.mrf.mxu0 }
 0x367   : > { %v13409_v13 = vadd.f32 %v5066_v53, %v4668_v7  ;;  %v13411_v19 = vpop.f32.mrf.mxu1 }
 0x368   : > { %v5206_v21 = vpop.f32.mrf.mxu0 }
 0x369   : > { %v5207_v2 = vadd.f32 %v5206_v21, %v4808_v61  ;;  %v5135_v39 = vpop.f32.mrf.mxu1 }
 0x36a   : > { %v5136_v10 = vadd.f32 %v5135_v39, %v4737_v16  ;;  %v5208_v23 = vpop.f32.mrf.mxu0 }
 0x36b   : > { %v5209_v26 = vadd.f32 %v5208_v23, %v4810_v4  ;;  %v13413_v5 = vpop.f32.mrf.mxu1 }
 0x36c   : > { %v13415_v1 = vpop.f32.mrf.mxu0 }
 0x36d   : > { %v13417_v29 = vpop.f32.mrf.mxu1 }
 0x36e   : > { %v13419_v35 = vpop.f32.mrf.mxu0 }
 0x36f   : > { %v13421_v52 = vpop.f32.mrf.mxu1 }
 0x370   : > { %v5535_v9 = vpop.f32.mrf.mxu0 }
 0x371   : > { %v5617_v15 = vadd.f32 %v5535_v9, %v5136_v10  ;;  %v5464_v36 = vpop.f32.mrf.mxu1 }
 0x372   : > { %v5615_v27 = vadd.f32 %v5464_v36, %v5065_v22  ;;  %v13423_v8 = vpop.f32.mrf.mxu0 }
 0x373   : > { %v13425_v55 = vpop.f32.mrf.mxu1 }
 0x374   : > { %v13427_v31 = vpop.f32.mrf.mxu0 }
 0x375   : > { %v5606_v20 = vpop.f32.mrf.mxu1 }
 0x376   : > { %v5619_v24 = vadd.f32 %v5606_v20, %v5207_v2  ;;  %v13429_v17 = vpop.f32.mrf.mxu0 }
 0x377   : > { %v5608_v48 = vpop.f32.mrf.mxu1 }
 0x378   : > { %v5620_v57 = vadd.f32 %v5608_v48, %v5209_v26  ;;  %v5878_v38 = vpop.f32.mrf.mxu0 }
 0x379   : > { %v6029_v40 = vadd.f32 %v5878_v38, %v5615_v27  ;;  %v5807_v51 = vpop.f32.mrf.mxu1  ;;  %v4996_v38 = vadd.f32 %v13411_v19, %v13397_v54 }
 0x37a   : > { %v13431_v43 = vpop.f32.mrf.mxu0 }
 0x37b   : > { %v5809_v58 = vpop.f32.mrf.mxu1 }
 0x37c   : > { %v6020_v56 = vpop.f32.mrf.mxu0 }
 0x37d   : > { %v6033_v28 = vadd.f32 %v6020_v56, %v5619_v24  ;;  %v5949_v41 = vpop.f32.mrf.mxu1  ;;  %v4994_v24 = vadd.f32 %v13407_v32, %v13395_v0  ;;  %v5611_v0 = vadd.f32 %v13417_v29, %v13403_v3 }
 0x37e   : > { %v6031_v34 = vadd.f32 %v5949_v41, %v5617_v15  ;;  %v6022_v42 = vpop.f32.mrf.mxu0  ;;  %v5614_v41 = vadd.f32 %v13419_v35, %v4996_v38 }
 0x37f   : > { %v13433_v44 = vadd.f32 %v6022_v42, %v5620_v57  ;;  %v13435_v37 = vpop.f32.mrf.mxu1 }
 0x380   : > { %v6177_v47 = vpop.f32.mrf.mxu0 }
 0x381   : > { %v6106_v46 = vpop.f32.mrf.mxu1 }
 0x382   : > { %v6179_v30 = vpop.f32.mrf.mxu0 }
 0x383   : > { %v6108_v25 = vpop.f32.mrf.mxu1 }
 0x384   : > { %v6319_v50 = vpop.f32.mrf.mxu0 }
 0x385   : > { %v13437_v11 = vadd.f32 %v6319_v50, %v6031_v34  ;;  %v6248_v49 = vpop.f32.mrf.mxu1  ;;  %v4925_v50 = vadd.f32 %v13405_v45, %v13399_v33  ;;  %v5138_v33 = vadd.f32 %v13413_v5, %v13401_v59 }
 0x386   : > { %v13439_v12 = vadd.f32 %v6248_v49, %v6029_v40  ;;  %v13441_v14 = vpop.f32.mrf.mxu0  ;;  %v5613_v40 = vadd.f32 %v13415_v1, %v4994_v24  ;;  %v6025_v1 = vadd.f32 %v13427_v31, %v5611_v0 }
 0x387   : > { %v13443_v6 = vpop.f32.mrf.mxu1  ;;  %v5612_v19 = vadd.f32 %v13421_v52, %v4925_v50  ;;  %v5618_v52 = vadd.f32 %v13423_v8, %v5138_v33 }
 0x388   : > { %v6515_v60 = vpop.f32.mrf.mxu0  ;;  %v6027_v34 = vadd.f32 %v5807_v51, %v5613_v40  ;;  %v6395_v3 = vadd.f32 %v6106_v46, %v6025_v1 }
 0x389   : > { %v6390_v16 = vpop.f32.mrf.mxu1  ;;  %v6026_v45 = vadd.f32 %v13429_v17, %v5612_v19  ;;  %v6032_v59 = vadd.f32 %v13435_v37, %v5618_v52 }
 0x38a   : > { %v6403_v63 = vadd.f32 %v6390_v16, %v6033_v28  ;;  %v6517_v7 = vpop.f32.mrf.mxu0  ;;  %v6028_v16 = vadd.f32 %v5809_v58, %v5614_v41  ;;  %v6397_v54 = vadd.f32 %v6177_v47, %v6027_v34  ;;  %v6804_v31 = vadd.f32 %v6515_v60, %v6395_v3 }
 0x38b   : > { %v13445_v18 = vpop.f32.mrf.mxu1  ;;  %v6396_v47 = vadd.f32 %v6108_v25, %v6026_v45  ;;  %v6402_v60 = vadd.f32 %v13441_v14, %v6032_v59 }
 0x38c   : > { %v13447_v61 = vpop.f32.mrf.mxu0  ;;  %v6398_v35 = vadd.f32 %v6179_v30, %v6028_v16 }
 0x38d   : > { %v6586_v4 = vpop.f32.mrf.mxu1  ;;  %v6805_v5 = vadd.f32 %v6517_v7, %v6396_v47 }
 0x38e   : > { %v13449_v62 = vpop.f32.mrf.mxu0  ;;  %v6806_v51 = vadd.f32 %v6586_v4, %v6397_v54 }
 0x38f   : > { %v6588_v22 = vpop.f32.mrf.mxu1 }
 0x390   : > { %v6799_v53 = vpop.f32.mrf.mxu0 }
 0x391   : > { %v6812_v21 = vadd.f32 %v6799_v53, %v6403_v63  ;;  %v13451_v2 = vpop.f32.mrf.mxu1 }
 0x392   : > { %v13453_v39 = vpop.f32.mrf.mxu0 }
 0x393   : > { %v6730_v10 = vpop.f32.mrf.mxu1 }
 0x395   : > { %v6996_v23 = vpop.f32.mrf.mxu0  ;;  %v6925_v26 = vpop.f32.mrf.mxu1 }
 0x396   : > { %v7216_v24 = vadd.f32 %v6996_v23, %v6806_v51  ;;  %v7214_v17 = vadd.f32 %v6925_v26, %v6804_v31  ;;  %v5616_v23 = vadd.f32 %v13425_v55, %v13409_v13  ;;  %v6811_v26 = vadd.f32 %v6730_v10, %v6402_v60 }
 0x397   : > { %v6998_v9 = vpop.f32.mrf.mxu0  ;;  %v6927_v15 = vpop.f32.mrf.mxu1 }
 0x398   : > { %v7215_v34 = vadd.f32 %v6927_v15, %v6805_v5  ;;  %v6030_v50 = vadd.f32 %v13431_v43, %v5616_v23 }
 0x399   : > { %v13455_v36 = vpop.f32.mrf.mxu0  ;;  %v13457_v27 = vpop.f32.mrf.mxu1 }
 0x39a   : > { %v6400_v19 = vadd.f32 %v13443_v6, %v6030_v50  ;;  %v10799_v50 = vld [vmem:[%s15324_s7 + $0x6f0] sm:$0xff] }
 0x39b   : > { %v7140_v20 = vpop.f32.mrf.mxu0  ;;  %v13461_v48 = vpop.f32.mrf.mxu1 }
 0x39c   : > { %v7221_v1 = vadd.f32 %v7140_v20, %v6811_v26  ;;  %v6809_v51 = vadd.f32 %v13449_v62, %v6400_v19  ;;  %v10814_v26 = vld [vmem:[%s15324_s7 + $0x768] sm:$0xff]  ;;  %v10828_v19 = vld [vmem:[%s15324_s7 + $0x7d8] sm:$0xff] }
 0x39d   : > { %v7334_v57 = vpop.f32.mrf.mxu0 }
 0x39e   : > { %v7219_v20 = vadd.f32 %v13461_v48, %v6809_v51  ;;  %v10832_v48 = vld [vmem:[%s15324_s7 + $0x7f8] sm:$0xff] }
 0x39f   : > { %v7336_v56 = vpop.f32.mrf.mxu0  ;;  %v7209_v28 = vpop.f32.mrf.mxu1  ;;  %v10812_v51 = vld [vmem:[%s15324_s7 + $0x758] sm:$0xff] }
 0x3a0   : > { %v7222_v42 = vadd.f32 %v7209_v28, %v6812_v21  ;;  %v6807_v21 = vadd.f32 %v6588_v22, %v6398_v35  ;;  %v13488_v22 = vpop.permute.xlu1 %8045  ;;  %v7624_v16 = vadd.f32 %v7336_v56, %v7215_v34  ;;  %v10830_v34 = vld [vmem:[%s15324_s7 + $0x7e8] sm:$0xff] }
 0x3a1   : > { %v13471_v32 = vpop.f32.mrf.mxu0  ;;  %v13473_v49 = vpop.f32.mrf.mxu1 }
 0x3a2   : > { %v7217_v30 = vadd.f32 %v6998_v9, %v6807_v21  ;;  %v7623_v9 = vadd.f32 %v7334_v57, %v7214_v17  ;;  %v10833_v21 = vld [vmem:[%s15324_s7 + $0x800] sm:$0xff]  ;;  %v10831_v17 = vld [vmem:[%s15324_s7 + $0x7f0] sm:$0xff] }
 0x3a3   : > { %v7478_v63 = vpop.f32.mrf.mxu0 }
 0x3a4   : > { %v7405_v53 = vpop.f32.mrf.mxu1 }
 0x3a5   : > { %v7618_v29 = vpop.f32.mrf.mxu0  ;;  %v7625_v4 = vadd.f32 %v7405_v53, %v7216_v24  ;;  %v10848_v24 = vld [vmem:[%s15324_s7 + $0x878] sm:$0xff] }
 0x3a6   : > { %v13480_v38 = vadd.f32 %v7618_v29, %v7222_v42  ;;  %v7407_v58 = vpop.f32.mrf.mxu1 }
 0x3a7   : > { %v13483_v40 = vpop.f32.mrf.mxu0  ;;  %v7626_v41 = vadd.f32 %v7407_v58, %v7217_v30  ;;  %v7628_v58 = vadd.f32 %v7478_v63, %v7219_v20  ;;  %v10847_v30 = vld [vmem:[%s15324_s7 + $0x870] sm:$0xff]  ;;  %v10801_v63 = vld [vmem:[%s15324_s7 + $0x700] sm:$0xff] }
 0x3a8   : > { %v13485_v28 = vpop.f32.mrf.mxu1  ;;  %v10811_v20 = vld [vmem:[%s15324_s7 + $0x750] sm:$0xff] }
 0x3a9   : > { %v7814_v46 = vpop.f32.mrf.mxu0 }
 0x3aa   : > { %v8034_v8 = vadd.f32 %v7814_v46, %v7625_v4  ;;  %v7549_v25 = vpop.f32.mrf.mxu1  ;;  %v10816_v46 = vld [vmem:[%s15324_s7 + $0x778] sm:$0xff] }
 0x3ab   : > { %v7816_v42 = vpop.f32.mrf.mxu0  ;;  %v7630_v10 = vadd.f32 %v7549_v25, %v7221_v1 }
 0x3ac   : > { %v8035_v0 = vadd.f32 %v7816_v42, %v7626_v41  ;;  %v7743_v37 = vpop.f32.mrf.mxu1  ;;  %v8050_v7 = vadd.f32 %v13488_v22, %v8034_v8  ;;  %v10846_v41 = vld [vmem:[%s15324_s7 + $0x868] sm:$0xff]  ;;  %v10800_v8 = vld [vmem:[%s15324_s7 + $0x6f8] sm:$0xff]  ;;  %v10845_v42 = vld [vmem:[%s15324_s7 + $0x860] sm:$0xff] }
 0x3ad   : > { %v8032_v54 = vadd.f32 %v7743_v37, %v7623_v9  ;;  %v10815_v9 = vld [vmem:[%s15324_s7 + $0x770] sm:$0xff] }
 0x3ae   : > { %v7745_v13 = vpop.f32.mrf.mxu1  ;;  %v8051_v55 = vadd.f32 %v13488_v22, %v8035_v0  ;;  %v13498_v57 = vmax.f32 %v8050_v7, 0.0  ;;  %v10829_v7 = vld [vmem:[%s15324_s7 + $0x7e0] sm:$0xff] }
 0x3af   : > { %v8048_v14 = vadd.f32 %v13488_v22, %v8032_v54  ;;  %v8033_v15 = vadd.f32 %v7745_v13, %v7624_v16  ;;  %v10844_v16 = vld [vmem:[%s15324_s7 + $0x858] sm:$0xff]  ;;  %v10798_v54 = vld [vmem:[%s15324_s7 + $0x6e8] sm:$0xff]  ;;  %v10813_v13 = vld [vmem:[%s15324_s7 + $0x760] sm:$0xff] }
 0x3b0   : > { %v13500_v35 = vpop.f32.mrf.mxu0  ;;  %v13502_v43 = vmax.f32 %v8051_v55, 0.0  ;;  %v8371_v29 = vrot.slane %v13498_v57, 1  ;;  %v10843_v55 = vld [vmem:[%s15324_s7 + $0x850] sm:$0xff] }
 0x3b1   : > { %v8049_v56 = vadd.f32 %v13488_v22, %v8033_v15  ;;  %v13506_v53 = vmax.f32 %v8048_v14, 0.0  ;;  %v10797_v14 = vld [vmem:[%s15324_s7 + $0x6e0] sm:$0xff]  ;;  %v10827_v15 = vld [vmem:[%s15324_s7 + $0x7d0] sm:$0xff] }
 0x3b2   : > { %v7958_v6 = vpop.f32.mrf.mxu0  ;;  %v8372_v33 = vrot.slane %v13502_v43, 1 }
 0x3b3   : > { %v13510_v45 = vmax.f32 %v8049_v56, 0.0  ;;  %v8039_v3 = vadd.f32 %v7958_v6, %v7630_v10  ;;  %v8369_v4 = vrot.slane %v13506_v53, 1  ;;  %v10842_v10 = vld [vmem:[%s15324_s7 + $0x848] sm:$0xff]  ;;  %v10796_v56 = vld [vmem:[%s15324_s7 + $0x6d8] sm:$0xff]  ;;  %v6810_v6 = vadd.f32 %v13451_v2, %v13437_v11  ;;  %v10795_v11 = vld [vmem:[%s15324_s7 + $0x6d0] sm:$0xff] }
 0x3b4   : > { %8528 = vmatprep.mubr.f32.mxu1 %v8372_v33  ;;  %v13516_v62 = vpop.f32.mrf.mxu1  ;;  %v10826_v33 = vld [vmem:[%s15324_s7 + $0x7c8] sm:$0xff] }
 0x3b5   : > { %v8055_v52 = vadd.f32 %v13488_v22, %v8039_v3  ;;  %8529 = vmatmul.mubr.f32.vlgmr.msra.gmra.mxu1 %v8371_v29  ;;  %v8370_v47 = vrot.slane %v13510_v45, 1  ;;  %v10841_v3 = vld [vmem:[%s15324_s7 + $0x840] sm:$0xff]  ;;  %v7220_v2 = vadd.f32 %v13455_v36, %v6810_v6  ;;  %v10794_v36 = vld [vmem:[%s15324_s7 + $0x6c8] sm:$0xff] }
 0x3b6   : > { %11277 = vmatpush3.msra.mxu1 %v10833_v21  ;;  %v7887_v31 = vpop.f32.mrf.mxu1  ;;  %v10825_v29 = vld [vmem:[%s15324_s7 + $0x7c0] sm:$0xff]  ;;  %v10810_v21 = vld [vmem:[%s15324_s7 + $0x748] sm:$0xff] }
 0x3b7   : > { %v13533_v59 = vmax.f32 %v8055_v52, 0.0  ;;  %11278 = vmatprep.subr.mxu1 %v10848_v24  ;;  %v8037_v5 = vadd.f32 %v7887_v31, %v7628_v58  ;;  %8458 = vmatprep.mubr.f32.mxu0 %v8370_v47  ;;  %v10840_v24 = vld [vmem:[%s15324_s7 + $0x838] sm:$0xff]  ;;  %v6404_v58 = vadd.f32 %v13445_v18, %v13433_v44  ;;  %v6808_v52 = vadd.f32 %v13447_v61, %v13439_v12  ;;  %v10809_v31 = vld [vmem:[%s15324_s7 + $0x740] sm:$0xff]  ;;  %v10839_v44 = vld [vmem:[%s15324_s7 + $0x830] sm:$0xff] }
 0x3b8   : > { %11279 = vmatpush3.msra.mxu1 %v10832_v48  ;;  %8459 = vmatmul.mubr.f32.vlgmr.msra.gmra.mxu0 %v8369_v4  ;;  %v8027_v23 = vpop.f32.mrf.mxu1  ;;  %v7629_v48 = vadd.f32 %v13485_v28, %v7220_v2  ;;  %v10824_v47 = vld [vmem:[%s15324_s7 + $0x7b8] sm:$0xff]  ;;  %v10793_v12 = vld [vmem:[%s15324_s7 + $0x6c0] sm:$0xff]  ;;  %v10802_v6 = vld [vmem:[%s15324_s7 + $0x708] sm:$0xff] }
 0x3b9   : > { %v8053_v25 = vadd.f32 %v13488_v22, %v8037_v5  ;;  %11280 = vmatprep.subr.mxu1 %v10847_v30  ;;  %11242 = vmatpush3.msra.mxu0 %v10801_v63  ;;  %v8040_v60 = vadd.f32 %v8027_v23, %v13480_v38  ;;  %v8376_v38 = vrot.slane %v13533_v59, 1  ;;  %v6813_v18 = vadd.f32 %v13453_v39, %v6404_v58  ;;  %v10823_v30 = vld [vmem:[%s15324_s7 + $0x7b0] sm:$0xff]  ;;  %v10808_v4 = vld [vmem:[%s15324_s7 + $0x738] sm:$0xff]  ;;  %v10838_v39 = vld [vmem:[%s15324_s7 + $0x828] sm:$0xff] }
 0x3ba   : > { %11281 = vmatpush3.msra.mxu1 %v10831_v17  ;;  %11243 = vmatprep.subr.mxu0 %v10816_v46  ;;  %v7218_v61 = vadd.f32 %v13457_v27, %v6808_v52  ;;  %v8038_v28 = vadd.f32 %v13500_v35, %v7629_v48  ;;  %v10792_v27 = vld [vmem:[%s15324_s7 + $0x6b8] sm:$0xff]  ;;  %v10822_v5 = vld [vmem:[%s15324_s7 + $0x7a8] sm:$0xff]  ;;  %v10807_v17 = vld [vmem:[%s15324_s7 + $0x730] sm:$0xff]  ;;  %v8029_v46 = vpop.f32.mrf.mxu1 }
 0x3bb   : > { %v13562_v0 = vmax.f32 %v8053_v25, 0.0  ;;  %v13565_v37 = vadd.f32 %v13488_v22, %v8040_v60  ;;  %11282 = vmatprep.subr.mxu1 %v10846_v41  ;;  %11244 = vmatpush3.msra.mxu0 %v10800_v8  ;;  %v7223_v63 = vadd.f32 %v13473_v49, %v6813_v18  ;;  %v10837_v23 = vld [vmem:[%s15324_s7 + $0x820] sm:$0xff]  ;;  %v10806_v60 = vld [vmem:[%s15324_s7 + $0x728] sm:$0xff]  ;;  %v10864_v48 = vld [vmem:[%s15324_s7 + $0x8f8] sm:$0xff] }
 0x3bc   : > { %11283 = vmatpush3.msra.mxu1 %v10830_v34  ;;  %11245 = vmatprep.subr.mxu0 %v10815_v9  ;;  %v7627_v35 = vadd.f32 %v13471_v32, %v7218_v61  ;;  %v10791_v32 = vld [vmem:[%s15324_s7 + $0x6b0] sm:$0xff]  ;;  %v8054_v41 = vadd.f32 %v13488_v22, %v8038_v28  ;;  %v10821_v25 = vld [vmem:[%s15324_s7 + $0x7a0] sm:$0xff]  ;;  %v10820_v9 = vld [vmem:[%s15324_s7 + $0x798] sm:$0xff] }
 0x3bd   : > { %11284 = vmatprep.subr.mxu1 %v10845_v42  ;;  %11246 = vmatpush3.msra.mxu0 %v10799_v50  ;;  %v8374_v1 = vrot.slane %v13562_v0, 1  ;;  %v7632_v49 = vadd.f32 %v13483_v40, %v7223_v63  ;;  %v10836_v40 = vld [vmem:[%s15324_s7 + $0x818] sm:$0xff]  ;;  %v10805_v42 = vld [vmem:[%s15324_s7 + $0x720] sm:$0xff]  ;;  %v10835_v50 = vld [vmem:[%s15324_s7 + $0x810] sm:$0xff] }
 0x3be   : > { %11285 = vmatpush3.msra.mxu1 %v10829_v7  ;;  %8668 = vmatprep.mubr.f32.mxu1 %v8376_v38  ;;  %v8036_v8 = vadd.f32 %v13516_v62, %v7627_v35  ;;  %v10790_v62 = vld [vmem:[%s15324_s7 + $0x6a8] sm:$0xff]  ;;  %v10789_v38 = vld [vmem:[%s15324_s7 + $0x6a0] sm:$0xff]  ;;  %v13704_v7 = vmax.f32 %v8054_v41, 0.0  ;;  %v8094_v18 = vld [vmem:[%s15324_s7 + $0xd0] sm:$0xff] }
 0x3bf   : > { %11247 = vmatprep.subr.mxu0 %v10814_v26  ;;  %11286 = vmatprep.subr.mxu1 %v10844_v16  ;;  %v8041_v34 = vadd.f32 %v8029_v46, %v7632_v49  ;;  %v10819_v16 = vld [vmem:[%s15324_s7 + $0x790] sm:$0xff]  ;;  %v13764_v58 = vld [vmem:[#allocation2] sm:$0xff]  ;;  %v10862_v61 = vld [vmem:[%s15324_s7 + $0x8e8] sm:$0xff] }
 0x3c0   : > { %11248 = vmatpush3.msra.mxu0 %v10798_v54  ;;  %11287 = vmatpush3.msra.mxu1 %v10828_v19  ;;  %v8052_v26 = vadd.f32 %v13488_v22, %v8036_v8  ;;  %v10804_v54 = vld [vmem:[%s15324_s7 + $0x718] sm:$0xff]  ;;  %v10834_v19 = vld [vmem:[%s15324_s7 + $0x808] sm:$0xff]  ;;  %v8096_v52 = vld [vmem:[%s15324_s7 + $0xe0] sm:$0xff] }
 0x3c1   : > { %11249 = vmatprep.subr.mxu0 %v10813_v13  ;;  %11288 = vmatprep.subr.mxu1 %v10843_v55  ;;  %v10788_v13 = vld [vmem:[%s15324_s7 + $0x698] sm:$0xff]  ;;  %v8057_v55 = vadd.f32 %v13488_v22, %v8041_v34  ;;  %v8375_v22 = vrot.slane %v13704_v7, 1  ;;  %v8078_v28 = vld [vmem:[%s15324_s7 + $0x50] sm:$0xff]  ;;  %v8076_v63 = vld [vmem:[%s15324_s7 + $0x40] sm:$0xff] }
 0x3c2   : > { %11250 = vmatpush3.msra.mxu0 %v10797_v14  ;;  %8598 = vmatprep.mubr.f32.mxu0 %v8374_v1  ;;  %v10818_v1 = vld [vmem:[%s15324_s7 + $0x788] sm:$0xff]  ;;  %v10803_v14 = vld [vmem:[%s15324_s7 + $0x710] sm:$0xff]  ;;  %v10860_v35 = vld [vmem:[%s15324_s7 + $0x8d8] sm:$0xff] }
 0x3c3   : > { %11289 = vmatpush3.msra.mxu1 %v10827_v15  ;;  %11251 = vmatprep.subr.mxu0 %v10812_v51  ;;  %v8099_v15 = vld [vmem:[%s15324_s7 + $0xf8] sm:$0xff]  ;;  %v13729_v51 = vmax.f32 %v8052_v26, 0.0  ;;  %v8074_v49 = vld [vmem:[%s15324_s7 + $0x30] sm:$0xff]  ;;  %v8089_v41 = vld [vmem:[%s15324_s7 + $0xa8] sm:$0xff] }
 0x3c4   : > { %11290 = vmatprep.subr.mxu1 %v10842_v10  ;;  %11252 = vmatpush3.msra.mxu0 %v10796_v56  ;;  %v10787_v10 = vld [vmem:[%s15324_s7 + $0x690] sm:$0xff]  ;;  %v8083_v56 = vld [vmem:[%s15324_s7 + $0x78] sm:$0xff]  ;;  %v10857_v8 = vld [vmem:[%s15324_s7 + $0x8c0] sm:$0xff] }
 0x3c5   : > { %11291 = vmatpush3.msra.mxu1 %v10826_v33  ;;  %11253 = vmatprep.subr.mxu0 %v10811_v20  ;;  %v13741_v33 = vmax.f32 %v8057_v55, 0.0  ;;  %v8098_v20 = vld [vmem:[%s15324_s7 + $0xf0] sm:$0xff]  ;;  %v8373_v2 = vrot.slane %v13729_v51, 1  ;;  %v8075_v46 = vld [vmem:[%s15324_s7 + $0x38] sm:$0xff] }
 0x3c6   : > { %11292 = vmatprep.subr.mxu1 %v10841_v3  ;;  %11254 = vmatpush3.msra.mxu0 %v10795_v11  ;;  %v10786_v3 = vld [vmem:[%s15324_s7 + $0x688] sm:$0xff]  ;;  %v8082_v11 = vld [vmem:[%s15324_s7 + $0x70] sm:$0xff]  ;;  %v8087_v34 = vld [vmem:[%s15324_s7 + $0x98] sm:$0xff] }
 0x3c7   : > { %11293 = vmatpush3.msra.mxu1 %v10825_v29  ;;  %11255 = vmatprep.subr.mxu0 %v10810_v21  ;;  %v8097_v29 = vld [vmem:[%s15324_s7 + $0xe8] sm:$0xff]  ;;  %v10865_v21 = vld [vmem:[%s15324_s7 + $0x900] sm:$0xff]  ;;  %v8070_v26 = vld [vmem:[%s15324_s7 + $0x10] sm:$0xff] }
 0x3c8   : > { %11294 = vmatprep.subr.mxu1 %v10840_v24  ;;  %11256 = vmatpush3.msra.mxu0 %v10794_v36  ;;  %v8378_v24 = vrot.slane %v13741_v33, 1  ;;  %v8081_v36 = vld [vmem:[%s15324_s7 + $0x68] sm:$0xff]  ;;  %v10852_v55 = vld [vmem:[%s15324_s7 + $0x898] sm:$0xff] }
 0x3c9   : > { %11295 = vmatpush3.msra.mxu1 %v10824_v47  ;;  %11257 = vmatprep.subr.mxu0 %v10809_v31  ;;  %v8080_v47 = vld [vmem:[%s15324_s7 + $0x60] sm:$0xff]  ;;  %v8095_v31 = vld [vmem:[%s15324_s7 + $0xd8] sm:$0xff] }
 0x3ca   : > { %11296 = vmatprep.subr.mxu1 %v10839_v44  ;;  %11258 = vmatpush3.msra.mxu0 %v10793_v12  ;;  %v10863_v44 = vld [vmem:[%s15324_s7 + $0x8f0] sm:$0xff]  ;;  %v8079_v12 = vld [vmem:[%s15324_s7 + $0x58] sm:$0xff] }
 0x3cb   : > { %11297 = vmatpush3.msra.mxu1 %v10823_v30  ;;  %11259 = vmatprep.subr.mxu0 %v10808_v4  ;;  %v8093_v30 = vld [vmem:[%s15324_s7 + $0xc8] sm:$0xff]  ;;  %v10861_v4 = vld [vmem:[%s15324_s7 + $0x8e0] sm:$0xff] }
 0x3cc   : > { %11298 = vmatprep.subr.mxu1 %v10838_v39  ;;  %11260 = vmatpush3.msra.mxu0 %v10792_v27  ;;  %v8077_v39 = vld [vmem:[%s15324_s7 + $0x48] sm:$0xff]  ;;  %v8092_v27 = vld [vmem:[%s15324_s7 + $0xc0] sm:$0xff] }
 0x3cd   : > { %11299 = vmatpush3.msra.mxu1 %v10822_v5  ;;  %11261 = vmatprep.subr.mxu0 %v10807_v17  ;;  %v8091_v5 = vld [vmem:[%s15324_s7 + $0xb8] sm:$0xff]  ;;  %v10859_v17 = vld [vmem:[%s15324_s7 + $0x8d0] sm:$0xff] }
 0x3ce   : > { %11300 = vmatprep.subr.mxu1 %v10837_v23  ;;  %11262 = vmatpush3.msra.mxu0 %v10791_v32  ;;  %v8090_v23 = vld [vmem:[%s15324_s7 + $0xb0] sm:$0xff]  ;;  %v10858_v32 = vld [vmem:[%s15324_s7 + $0x8c8] sm:$0xff] }
 0x3cf   : > { %11301 = vmatpush3.msra.mxu1 %v10821_v25  ;;  %11263 = vmatprep.subr.mxu0 %v10806_v60  ;;  %v8073_v25 = vld [vmem:[%s15324_s7 + $0x28] sm:$0xff]  ;;  %v8088_v60 = vld [vmem:[%s15324_s7 + $0xa0] sm:$0xff] }
 0x3d0   : > { %11302 = vmatprep.subr.mxu1 %v10836_v40  ;;  %11264 = vmatpush3.msra.mxu0 %v10790_v62  ;;  %v10856_v40 = vld [vmem:[%s15324_s7 + $0x8b8] sm:$0xff]  ;;  %v8072_v62 = vld [vmem:[%s15324_s7 + $0x20] sm:$0xff] }
 0x3d1   : > { %11303 = vmatpush3.msra.mxu1 %v10820_v9  ;;  %11265 = vmatprep.subr.mxu0 %v10805_v42  ;;  %v10855_v9 = vld [vmem:[%s15324_s7 + $0x8b0] sm:$0xff]  ;;  %v8071_v42 = vld [vmem:[%s15324_s7 + $0x18] sm:$0xff] }
 0x3d2   : > { %11304 = vmatprep.subr.mxu1 %v10835_v50  ;;  %11266 = vmatpush3.msra.mxu0 %v10789_v38  ;;  %v8086_v50 = vld [vmem:[%s15324_s7 + $0x90] sm:$0xff]  ;;  %v10854_v38 = vld [vmem:[%s15324_s7 + $0x8a8] sm:$0xff] }
 0x3d3   : > { %11305 = vmatpush3.msra.mxu1 %v10819_v16  ;;  %11267 = vmatprep.subr.mxu0 %v10804_v54  ;;  %v8085_v16 = vld [vmem:[%s15324_s7 + $0x88] sm:$0xff]  ;;  %v10853_v54 = vld [vmem:[%s15324_s7 + $0x8a0] sm:$0xff] }
 0x3d4   : > { %11306 = vmatprep.subr.mxu1 %v10834_v19  ;;  %11268 = vmatpush3.msra.mxu0 %v10788_v13  ;;  %v8069_v19 = vld [vmem:[%s15324_s7 + $0x8] sm:$0xff]  ;;  %v8084_v13 = vld [vmem:[%s15324_s7 + $0x80] sm:$0xff] }
 0x3d5   : > { %11307 = vmatpush3.msra.mxu1 %v10818_v1  ;;  %11269 = vmatprep.subr.mxu0 %v10803_v14  ;;  %v8068_v1 = vld [vmem:[%s15324_s7] sm:$0xff]  ;;  %v8131_v14 = vld [vmem:[%s15324_s7 + $0x1f8] sm:$0xff] }
 0x3d6   : > { %8669 = vmatmul.mubr.f32.vlgmr.msra.gmra.mxu1 %v8375_v22  ;;  %11311 = vmatprep.subr.mxu1 %v8099_v15  ;;  %v10851_v15 = vld [vmem:[%s15324_s7 + $0x890] sm:$0xff]  ;;  %v8115_v22 = vld [vmem:[%s15324_s7 + $0x178] sm:$0xff] }
 0x3d7   : > { %11270 = vmatpush3.msra.mxu0 %v10787_v10  ;;  %11312 = vmatpush3.msra.mxu1 %v8083_v56  ;;  %v13909_v10 = vmax.f32 %v13565_v37, 0.0  ;;  %v8130_v56 = vld [vmem:[%s15324_s7 + $0x1f0] sm:$0xff]  ;;  %v8129_v37 = vld [vmem:[%s15324_s7 + $0x1e8] sm:$0xff] }
 0x3d8   : > { %8813 = vmatprep.mubr.f32.mxu1 %v13510_v45  ;;  %11271 = vmatprep.subr.mxu0 %v10802_v6  ;;  %v10850_v6 = vld [vmem:[%s15324_s7 + $0x888] sm:$0xff] }
 0x3d9   : > { %11313 = vmatprep.subr.mxu1 %v8098_v20  ;;  %11272 = vmatpush3.msra.mxu0 %v10786_v3  ;;  %v8114_v20 = vld [vmem:[%s15324_s7 + $0x170] sm:$0xff]  ;;  %v10866_v3 = vld [vmem:[%s15324_s7 + $0x908] sm:$0x7] }
 0x3da   : > { %11314 = vmatpush3.msra.mxu1 %v8082_v11  ;;  %8599 = vmatmul.mubr.f32.vlgmr.msra.gmra.mxu0 %v8373_v2  ;;  %v8113_v11 = vld [vmem:[%s15324_s7 + $0x168] sm:$0xff]  ;;  %v8377_v2 = vrot.slane %v13909_v10, 1 }
 0x3db   : > { %8674 = vmatprep.subr.mxu0 %v13764_v58  ;;  %11315 = vmatprep.subr.mxu1 %v8097_v29  ;;  %v8128_v29 = vld [vmem:[%s15324_s7 + $0x1e0] sm:$0xff] }
 0x3dc   : > { %8675 = vmatpush1.msra.mxu0 %v10865_v21  ;;  %10868 = vmatprep.mubr.msk.f32.mxu0 %vm4388_vm10, %v8378_v24  ;;  %v8163_v21 = vld [vmem:[%s15324_s7 + $0x2f8] sm:$0xff]  ;;  %v8112_v24 = vld [vmem:[%s15324_s7 + $0x160] sm:$0xff] }
 0x3dd   : > { %11316 = vmatpush3.msra.mxu1 %v8081_v36  ;;  %8676 = vmatprep.subr.mxu0 %v13764_v58  ;;  %v8147_v36 = vld [vmem:[%s15324_s7 + $0x278] sm:$0xff] }
 0x3de   : > { %11317 = vmatprep.subr.mxu1 %v8096_v52  ;;  %8677 = vmatpush1.msra.mxu0 %v10864_v48  ;;  %v8127_v52 = vld [vmem:[%s15324_s7 + $0x1d8] sm:$0xff]  ;;  %v8162_v48 = vld [vmem:[%s15324_s7 + $0x2f0] sm:$0xff] }
 0x3df   : > { %11318 = vmatpush3.msra.mxu1 %v8080_v47  ;;  %8678 = vmatprep.subr.mxu0 %v13764_v58  ;;  %v8111_v47 = vld [vmem:[%s15324_s7 + $0x158] sm:$0xff] }
 0x3e0   : > { %11319 = vmatprep.subr.mxu1 %v8095_v31  ;;  %8679 = vmatpush1.msra.mxu0 %v10863_v44  ;;  %v8146_v31 = vld [vmem:[%s15324_s7 + $0x270] sm:$0xff] }
 0x3e1   : > { %11320 = vmatpush3.msra.mxu1 %v8079_v12  ;;  %8680 = vmatprep.subr.mxu0 %v13764_v58  ;;  %v8126_v44 = vld [vmem:[%s15324_s7 + $0x1d0] sm:$0xff]  ;;  %v8161_v12 = vld [vmem:[%s15324_s7 + $0x2e8] sm:$0xff] }
 0x3e2   : > { %11321 = vmatprep.subr.mxu1 %v8094_v18  ;;  %8681 = vmatpush1.msra.mxu0 %v10862_v61  ;;  %v8110_v18 = vld [vmem:[%s15324_s7 + $0x150] sm:$0xff]  ;;  %v8145_v61 = vld [vmem:[%s15324_s7 + $0x268] sm:$0xff] }
 0x3e3   : > { %11322 = vmatpush3.msra.mxu1 %v8078_v28  ;;  %8682 = vmatprep.subr.mxu0 %v13764_v58  ;;  %v8125_v28 = vld [vmem:[%s15324_s7 + $0x1c8] sm:$0xff] }
 0x3e4   : > { %11323 = vmatprep.subr.mxu1 %v8093_v30  ;;  %8683 = vmatpush1.msra.mxu0 %v10861_v4  ;;  %v8160_v30 = vld [vmem:[%s15324_s7 + $0x2e0] sm:$0xff]  ;;  %v8109_v4 = vld [vmem:[%s15324_s7 + $0x148] sm:$0xff] }
 0x3e5   : > { %11324 = vmatpush3.msra.mxu1 %v8077_v39  ;;  %8684 = vmatprep.subr.mxu0 %v13764_v58  ;;  %v8144_v39 = vld [vmem:[%s15324_s7 + $0x260] sm:$0xff] }
 0x3e6   : > { %11325 = vmatprep.subr.mxu1 %v8092_v27  ;;  %8685 = vmatpush1.msra.mxu0 %v10860_v35  ;;  %v8124_v27 = vld [vmem:[%s15324_s7 + $0x1c0] sm:$0xff]  ;;  %v8159_v35 = vld [vmem:[%s15324_s7 + $0x2d8] sm:$0xff] }
 0x3e7   : > { %11326 = vmatpush3.msra.mxu1 %v8076_v63  ;;  %8686 = vmatprep.subr.mxu0 %v13764_v58  ;;  %v8108_v63 = vld [vmem:[%s15324_s7 + $0x140] sm:$0xff] }
 0x3e8   : > { %11327 = vmatprep.subr.mxu1 %v8091_v5  ;;  %8687 = vmatpush1.msra.mxu0 %v10859_v17  ;;  %v8143_v5 = vld [vmem:[%s15324_s7 + $0x258] sm:$0xff] }
 0x3e9   : > { %11328 = vmatpush3.msra.mxu1 %v8075_v46  ;;  %8688 = vmatprep.subr.mxu0 %v13764_v58  ;;  %v8123_v17 = vld [vmem:[%s15324_s7 + $0x1b8] sm:$0xff]  ;;  %v8158_v46 = vld [vmem:[%s15324_s7 + $0x2d0] sm:$0xff] }
 0x3ea   : > { %11329 = vmatprep.subr.mxu1 %v8090_v23  ;;  %8689 = vmatpush1.msra.mxu0 %v10858_v32  ;;  %v8107_v23 = vld [vmem:[%s15324_s7 + $0x138] sm:$0xff]  ;;  %v8142_v32 = vld [vmem:[%s15324_s7 + $0x250] sm:$0xff] }
 0x3eb   : > { %11330 = vmatpush3.msra.mxu1 %v8074_v49  ;;  %8690 = vmatprep.subr.mxu0 %v13764_v58  ;;  %v8122_v49 = vld [vmem:[%s15324_s7 + $0x1b0] sm:$0xff] }
 0x3ec   : > { %11331 = vmatprep.subr.mxu1 %v8089_v41  ;;  %8691 = vmatpush1.msra.mxu0 %v10857_v8  ;;  %v8157_v41 = vld [vmem:[%s15324_s7 + $0x2c8] sm:$0xff]  ;;  %v8106_v8 = vld [vmem:[%s15324_s7 + $0x130] sm:$0xff] }
 0x3ed   : > { %11332 = vmatpush3.msra.mxu1 %v8073_v25  ;;  %8692 = vmatprep.subr.mxu0 %v13764_v58  ;;  %v8141_v25 = vld [vmem:[%s15324_s7 + $0x248] sm:$0xff] }
 0x3ee   : > { %11333 = vmatprep.subr.mxu1 %v8088_v60  ;;  %8693 = vmatpush1.msra.mxu0 %v10856_v40  ;;  %v8121_v60 = vld [vmem:[%s15324_s7 + $0x1a8] sm:$0xff]  ;;  %v8156_v40 = vld [vmem:[%s15324_s7 + $0x2c0] sm:$0xff] }
 0x3ef   : > { %11334 = vmatpush3.msra.mxu1 %v8072_v62  ;;  %8694 = vmatprep.subr.mxu0 %v13764_v58  ;;  %v8105_v62 = vld [vmem:[%s15324_s7 + $0x128] sm:$0xff] }
 0x3f0   : > { %11335 = vmatprep.subr.mxu1 %v8087_v34  ;;  %8695 = vmatpush1.msra.mxu0 %v10855_v9  ;;  %v8140_v34 = vld [vmem:[%s15324_s7 + $0x240] sm:$0xff] }
 0x3f1   : > { %11336 = vmatpush3.msra.mxu1 %v8071_v42  ;;  %8696 = vmatprep.subr.mxu0 %v13764_v58  ;;  %v8120_v9 = vld [vmem:[%s15324_s7 + $0x1a0] sm:$0xff]  ;;  %v8155_v42 = vld [vmem:[%s15324_s7 + $0x2b8] sm:$0xff] }
 0x3f2   : > { %11337 = vmatprep.subr.mxu1 %v8086_v50  ;;  %8697 = vmatpush1.msra.mxu0 %v10854_v38  ;;  %v8104_v50 = vld [vmem:[%s15324_s7 + $0x120] sm:$0xff]  ;;  %v8139_v38 = vld [vmem:[%s15324_s7 + $0x238] sm:$0xff] }
 0x3f3   : > { %11338 = vmatpush3.msra.mxu1 %v8070_v26  ;;  %8698 = vmatprep.subr.mxu0 %v13764_v58  ;;  %v8119_v26 = vld [vmem:[%s15324_s7 + $0x198] sm:$0xff] }
 0x3f4   : > { %11339 = vmatprep.subr.mxu1 %v8085_v16  ;;  %8699 = vmatpush1.msra.mxu0 %v10853_v54  ;;  %v8154_v16 = vld [vmem:[%s15324_s7 + $0x2b0] sm:$0xff]  ;;  %v8103_v54 = vld [vmem:[%s15324_s7 + $0x118] sm:$0xff] }
 0x3f5   : > { %11340 = vmatpush3.msra.mxu1 %v8069_v19  ;;  %8700 = vmatprep.subr.mxu0 %v13764_v58  ;;  %v8138_v19 = vld [vmem:[%s15324_s7 + $0x230] sm:$0xff] }
 0x3f6   : > { %11341 = vmatprep.subr.mxu1 %v8084_v13  ;;  %8701 = vmatpush1.msra.mxu0 %v10852_v55  ;;  %v8118_v13 = vld [vmem:[%s15324_s7 + $0x190] sm:$0xff]  ;;  %v8153_v55 = vld [vmem:[%s15324_s7 + $0x2a8] sm:$0xff] }
 0x3f7   : > { %11342 = vmatpush3.msra.mxu1 %v8068_v1  ;;  %8702 = vmatprep.subr.mxu0 %v13764_v58  ;;  %v8102_v1 = vld [vmem:[%s15324_s7 + $0x110] sm:$0xff] }
 0x3f8   : > { %8814 = vmatmul.mubr.f32.vlgmr.msra.gmra.mxu1 %v13506_v53  ;;  %11346 = vmatprep.subr.mxu1 %v8131_v14  ;;  %v8137_v14 = vld [vmem:[%s15324_s7 + $0x228] sm:$0xff] }
 0x3f9   : > { %8703 = vmatpush1.msra.mxu0 %v10851_v15  ;;  %11347 = vmatpush3.msra.mxu1 %v8115_v22  ;;  %v8117_v15 = vld [vmem:[%s15324_s7 + $0x188] sm:$0xff]  ;;  %v8152_v22 = vld [vmem:[%s15324_s7 + $0x2a0] sm:$0xff] }
 0x3fa   : > { %8883 = vmatprep.mubr.f32.mxu1 %v13502_v43  ;;  %8704 = vmatprep.subr.mxu0 %v13764_v58 }
 0x3fb   : > { %11348 = vmatprep.subr.mxu1 %v8130_v56  ;;  %8705 = vmatpush1.msra.mxu0 %v10850_v6  ;;  %v8101_v56 = vld [vmem:[%s15324_s7 + $0x108] sm:$0xff]  ;;  %v8136_v6 = vld [vmem:[%s15324_s7 + $0x220] sm:$0xff] }
 0x3fc   : > { %11349 = vmatpush3.msra.mxu1 %v8114_v20  ;;  %8736 = vmatprep.subr.mxu0 %v13764_v58  ;;  %v8116_v20 = vld [vmem:[%s15324_s7 + $0x180] sm:$0xff] }
 0x3fd   : > { %11350 = vmatprep.subr.mxu1 %v8129_v37  ;;  %10867 = vmatpush2.msk.msra.mxu0 %vm8390_vm0, %v10866_v3  ;;  %v8151_v37 = vld [vmem:[%s15324_s7 + $0x298] sm:$0xff]  ;;  %v8100_v3 = vld [vmem:[%s15324_s7 + $0x100] sm:$0xff] }
 0x3fe   : > { %11351 = vmatpush3.msra.mxu1 %v8113_v11  ;;  %8739 = vmatmul.mubr.f32.vlgmr.msra.gmra.mxu0 %v8377_v2  ;;  %v8135_v11 = vld [vmem:[%s15324_s7 + $0x218] sm:$0xff]  ;;  %v8150_v2 = vld [vmem:[%s15324_s7 + $0x290] sm:$0xff] }
 0x3ff   : > { %11352 = vmatprep.subr.mxu1 %v8128_v29  ;;  %11381 = vmatprep.subr.mxu0 %v8163_v21  ;;  %v8195_v29 = vld [vmem:[%s15324_s7 + $0x3f8] sm:$0xff]  ;;  %v8134_v21 = vld [vmem:[%s15324_s7 + $0x210] sm:$0xff] }
 0x400   : > { %11353 = vmatpush3.msra.mxu1 %v8112_v24  ;;  %11382 = vmatpush3.msra.mxu0 %v8147_v36  ;;  %v8179_v24 = vld [vmem:[%s15324_s7 + $0x378] sm:$0xff]  ;;  %v8149_v36 = vld [vmem:[%s15324_s7 + $0x288] sm:$0xff] }
 0x401   : > { %8953 = vmatprep.mubr.f32.mxu0 %v13562_v0  ;;  %11354 = vmatprep.subr.mxu1 %v8127_v52  ;;  %v8194_v52 = vld [vmem:[%s15324_s7 + $0x3f0] sm:$0xff] }
 0x402   : > { %11383 = vmatprep.subr.mxu0 %v8162_v48  ;;  %11355 = vmatpush3.msra.mxu1 %v8111_v47  ;;  %v8133_v48 = vld [vmem:[%s15324_s7 + $0x208] sm:$0xff]  ;;  %v8178_v47 = vld [vmem:[%s15324_s7 + $0x370] sm:$0xff] }
 0x403   : > { %11384 = vmatpush3.msra.mxu0 %v8146_v31  ;;  %11356 = vmatprep.subr.mxu1 %v8126_v44  ;;  %v8148_v31 = vld [vmem:[%s15324_s7 + $0x280] sm:$0xff]  ;;  %v8193_v44 = vld [vmem:[%s15324_s7 + $0x3e8] sm:$0xff] }
 0x404   : > { %11385 = vmatprep.subr.mxu0 %v8161_v12  ;;  %11357 = vmatpush3.msra.mxu1 %v8110_v18  ;;  %v8132_v12 = vld [vmem:[%s15324_s7 + $0x200] sm:$0xff]  ;;  %v8177_v18 = vld [vmem:[%s15324_s7 + $0x368] sm:$0xff] }
 0x405   : > { %11386 = vmatpush3.msra.mxu0 %v8145_v61  ;;  %11358 = vmatprep.subr.mxu1 %v8125_v28  ;;  %v8192_v61 = vld [vmem:[%s15324_s7 + $0x3e0] sm:$0xff] }
 0x406   : > { %11387 = vmatprep.subr.mxu0 %v8160_v30  ;;  %11359 = vmatpush3.msra.mxu1 %v8109_v4  ;;  %v8176_v28 = vld [vmem:[%s15324_s7 + $0x360] sm:$0xff]  ;;  %v8211_v30 = vld [vmem:[%s15324_s7 + $0x478] sm:$0xff] }
 0x407   : > { %11388 = vmatpush3.msra.mxu0 %v8144_v39  ;;  %11360 = vmatprep.subr.mxu1 %v8124_v27  ;;  %v8191_v4 = vld [vmem:[%s15324_s7 + $0x3d8] sm:$0xff]  ;;  %v8210_v27 = vld [vmem:[%s15324_s7 + $0x470] sm:$0xff] }
 0x408   : > { %11389 = vmatprep.subr.mxu0 %v8159_v35  ;;  %11361 = vmatpush3.msra.mxu1 %v8108_v63  ;;  %v8175_v39 = vld [vmem:[%s15324_s7 + $0x358] sm:$0xff]  ;;  %v8190_v35 = vld [vmem:[%s15324_s7 + $0x3d0] sm:$0xff] }
 0x409   : > { %11390 = vmatpush3.msra.mxu0 %v8143_v5  ;;  %11362 = vmatprep.subr.mxu1 %v8123_v17  ;;  %v8174_v63 = vld [vmem:[%s15324_s7 + $0x350] sm:$0xff]  ;;  %v8209_v5 = vld [vmem:[%s15324_s7 + $0x468] sm:$0xff] }
 0x40a   : > { %11391 = vmatprep.subr.mxu0 %v8158_v46  ;;  %11363 = vmatpush3.msra.mxu1 %v8107_v23  ;;  %v8189_v17 = vld [vmem:[%s15324_s7 + $0x3c8] sm:$0xff]  ;;  %v8208_v23 = vld [vmem:[%s15324_s7 + $0x460] sm:$0xff] }
 0x40b   : > { %11392 = vmatpush3.msra.mxu0 %v8142_v32  ;;  %11364 = vmatprep.subr.mxu1 %v8122_v49  ;;  %v8173_v46 = vld [vmem:[%s15324_s7 + $0x348] sm:$0xff]  ;;  %v8188_v32 = vld [vmem:[%s15324_s7 + $0x3c0] sm:$0xff] }
 0x40c   : > { %11393 = vmatprep.subr.mxu0 %v8157_v41  ;;  %11365 = vmatpush3.msra.mxu1 %v8106_v8  ;;  %v8172_v49 = vld [vmem:[%s15324_s7 + $0x340] sm:$0xff]  ;;  %v8207_v41 = vld [vmem:[%s15324_s7 + $0x458] sm:$0xff] }
 0x40d   : > { %11394 = vmatpush3.msra.mxu0 %v8141_v25  ;;  %11366 = vmatprep.subr.mxu1 %v8121_v60  ;;  %v8187_v8 = vld [vmem:[%s15324_s7 + $0x3b8] sm:$0xff]  ;;  %v8206_v60 = vld [vmem:[%s15324_s7 + $0x450] sm:$0xff] }
 0x40e   : > { %11395 = vmatprep.subr.mxu0 %v8156_v40  ;;  %11367 = vmatpush3.msra.mxu1 %v8105_v62  ;;  %v8171_v25 = vld [vmem:[%s15324_s7 + $0x338] sm:$0xff]  ;;  %v8186_v40 = vld [vmem:[%s15324_s7 + $0x3b0] sm:$0xff] }
 0x40f   : > { %11396 = vmatpush3.msra.mxu0 %v8140_v34  ;;  %11368 = vmatprep.subr.mxu1 %v8120_v9  ;;  %v8170_v62 = vld [vmem:[%s15324_s7 + $0x330] sm:$0xff]  ;;  %v8205_v34 = vld [vmem:[%s15324_s7 + $0x448] sm:$0xff] }
 0x410   : > { %11397 = vmatprep.subr.mxu0 %v8155_v42  ;;  %11369 = vmatpush3.msra.mxu1 %v8104_v50  ;;  %v8185_v9 = vld [vmem:[%s15324_s7 + $0x3a8] sm:$0xff]  ;;  %v8204_v50 = vld [vmem:[%s15324_s7 + $0x440] sm:$0xff] }
 0x411   : > { %11398 = vmatpush3.msra.mxu0 %v8139_v38  ;;  %11370 = vmatprep.subr.mxu1 %v8119_v26  ;;  %v8169_v42 = vld [vmem:[%s15324_s7 + $0x328] sm:$0xff]  ;;  %v8184_v38 = vld [vmem:[%s15324_s7 + $0x3a0] sm:$0xff] }
 0x412   : > { %11399 = vmatprep.subr.mxu0 %v8154_v16  ;;  %11371 = vmatpush3.msra.mxu1 %v8103_v54  ;;  %v8168_v26 = vld [vmem:[%s15324_s7 + $0x320] sm:$0xff]  ;;  %v8203_v16 = vld [vmem:[%s15324_s7 + $0x438] sm:$0xff] }
 0x413   : > { %11400 = vmatpush3.msra.mxu0 %v8138_v19  ;;  %11372 = vmatprep.subr.mxu1 %v8118_v13  ;;  %v8183_v54 = vld [vmem:[%s15324_s7 + $0x398] sm:$0xff]  ;;  %v8202_v13 = vld [vmem:[%s15324_s7 + $0x430] sm:$0xff] }
 0x414   : > { %11401 = vmatprep.subr.mxu0 %v8153_v55  ;;  %11373 = vmatpush3.msra.mxu1 %v8102_v1  ;;  %v8167_v19 = vld [vmem:[%s15324_s7 + $0x318] sm:$0xff]  ;;  %v8182_v55 = vld [vmem:[%s15324_s7 + $0x390] sm:$0xff] }
 0x415   : > { %11402 = vmatpush3.msra.mxu0 %v8137_v14  ;;  %11374 = vmatprep.subr.mxu1 %v8117_v15  ;;  %v8166_v1 = vld [vmem:[%s15324_s7 + $0x310] sm:$0xff]  ;;  %v8201_v14 = vld [vmem:[%s15324_s7 + $0x428] sm:$0xff] }
 0x416   : > { %11403 = vmatprep.subr.mxu0 %v8152_v22  ;;  %11375 = vmatpush3.msra.mxu1 %v8101_v56  ;;  %v8181_v15 = vld [vmem:[%s15324_s7 + $0x388] sm:$0xff]  ;;  %v8200_v56 = vld [vmem:[%s15324_s7 + $0x420] sm:$0xff] }
 0x417   : > { %11404 = vmatpush3.msra.mxu0 %v8136_v6  ;;  %11376 = vmatprep.subr.mxu1 %v8116_v20  ;;  %v8165_v22 = vld [vmem:[%s15324_s7 + $0x308] sm:$0xff]  ;;  %v8180_v6 = vld [vmem:[%s15324_s7 + $0x380] sm:$0xff] }
 0x418   : > { %11405 = vmatprep.subr.mxu0 %v8151_v37  ;;  %11377 = vmatpush3.msra.mxu1 %v8100_v3  ;;  %v8164_v20 = vld [vmem:[%s15324_s7 + $0x300] sm:$0xff]  ;;  %v8199_v37 = vld [vmem:[%s15324_s7 + $0x418] sm:$0xff]  ;;  %v10902_v3 = vld [vmem:[%s15324_s7 + $0xa08] sm:$0xff] }
 0x419   : > { %11406 = vmatpush3.msra.mxu0 %v8135_v11  ;;  %8884 = vmatmul.mubr.f32.vlgmr.msra.gmra.mxu1 %v13498_v57  ;;  %v8198_v11 = vld [vmem:[%s15324_s7 + $0x410] sm:$0xff] }
 0x41a   : > { %11407 = vmatprep.subr.mxu0 %v8150_v2  ;;  %11416 = vmatprep.subr.mxu1 %v8195_v29  ;;  %v10886_v2 = vld [vmem:[%s15324_s7 + $0x988] sm:$0xff]  ;;  %v9246_v29 = vrot.slane %v13510_v45, 2 }
 0x41b   : > { %11408 = vmatpush3.msra.mxu0 %v8134_v21  ;;  %11417 = vmatpush3.msra.mxu1 %v8179_v24  ;;  %v10901_v21 = vld [vmem:[%s15324_s7 + $0xa00] sm:$0xff]  ;;  %v8197_v24 = vld [vmem:[%s15324_s7 + $0x408] sm:$0xff] }
 0x41c   : > { %9023 = vmatprep.mubr.f32.mxu1 %v13533_v59  ;;  %11409 = vmatprep.subr.mxu0 %v8149_v36  ;;  %v10885_v36 = vld [vmem:[%s15324_s7 + $0x980] sm:$0xff] }
 0x41d   : > { %11418 = vmatprep.subr.mxu1 %v8194_v52  ;;  %11410 = vmatpush3.msra.mxu0 %v8133_v48  ;;  %v10900_v52 = vld [vmem:[%s15324_s7 + $0x9f8] sm:$0xff]  ;;  %v8196_v48 = vld [vmem:[%s15324_s7 + $0x400] sm:$0xff] }
 0x41e   : > { %11419 = vmatpush3.msra.mxu1 %v8178_v47  ;;  %11411 = vmatprep.subr.mxu0 %v8148_v31  ;;  %v10884_v47 = vld [vmem:[%s15324_s7 + $0x978] sm:$0xff]  ;;  %v10899_v31 = vld [vmem:[%s15324_s7 + $0x9f0] sm:$0xff] }
 0x41f   : > { %11420 = vmatprep.subr.mxu1 %v8193_v44  ;;  %11412 = vmatpush3.msra.mxu0 %v8132_v12  ;;  %v8212_v44 = vld [vmem:[%s15324_s7 + $0x480] sm:$0x7]  ;;  %v10883_v12 = vld [vmem:[%s15324_s7 + $0x970] sm:$0xff] }
 0x420   : > { %11421 = vmatpush3.msra.mxu1 %v8177_v18  ;;  %8954 = vmatmul.mubr.f32.vlgmr.msra.gmra.mxu0 %v13729_v51  ;;  %v10898_v18 = vld [vmem:[%s15324_s7 + $0x9e8] sm:$0xff] }
 0x421   : > { %11422 = vmatprep.subr.mxu1 %v8192_v61  ;;  %9029 = vmatprep.subr.mxu0 %v13764_v58  ;;  %v10934_v61 = vld [vmem:[%s15324_s7 + $0xb08] sm:$0xff] }
 0x422   : > { %11423 = vmatpush3.msra.mxu1 %v8176_v28  ;;  %9030 = vmatpush1.msra.mxu0 %v8211_v30  ;;  %v10882_v28 = vld [vmem:[%s15324_s7 + $0x968] sm:$0xff] }
 0x423   : > { %10870 = vmatprep.mubr.msk.f32.mxu0 %vm4388_vm10, %v13741_v33  ;;  %11424 = vmatprep.subr.mxu1 %v8191_v4  ;;  %v10918_v30 = vld [vmem:[%s15324_s7 + $0xa88] sm:$0xff]  ;;  %v9248_v4 = vrot.slane %v13502_v43, 2 }
 0x424   : > { %9031 = vmatprep.subr.mxu0 %v13764_v58  ;;  %11425 = vmatpush3.msra.mxu1 %v8175_v39  ;;  %v10933_v39 = vld [vmem:[%s15324_s7 + $0xb00] sm:$0xff] }
 0x425   : > { %9032 = vmatpush1.msra.mxu0 %v8210_v27  ;;  %11426 = vmatprep.subr.mxu1 %v8190_v35  ;;  %v10881_v27 = vld [vmem:[%s15324_s7 + $0x960] sm:$0xff] }
 0x426   : > { %9033 = vmatprep.subr.mxu0 %v13764_v58  ;;  %11427 = vmatpush3.msra.mxu1 %v8174_v63  ;;  %v10917_v35 = vld [vmem:[%s15324_s7 + $0xa80] sm:$0xff]  ;;  %v10896_v63 = vld [vmem:[%s15324_s7 + $0x9d8] sm:$0xff] }
 0x427   : > { %9034 = vmatpush1.msra.mxu0 %v8209_v5  ;;  %11428 = vmatprep.subr.mxu1 %v8189_v17  ;;  %v10932_v5 = vld [vmem:[%s15324_s7 + $0xaf8] sm:$0xff] }
 0x428   : > { %9035 = vmatprep.subr.mxu0 %v13764_v58  ;;  %11429 = vmatpush3.msra.mxu1 %v8173_v46  ;;  %v10880_v17 = vld [vmem:[%s15324_s7 + $0x958] sm:$0xff] }
 0x429   : > { %9036 = vmatpush1.msra.mxu0 %v8208_v23  ;;  %11430 = vmatprep.subr.mxu1 %v8188_v32  ;;  %v10916_v46 = vld [vmem:[%s15324_s7 + $0xa78] sm:$0xff]  ;;  %v10895_v23 = vld [vmem:[%s15324_s7 + $0x9d0] sm:$0xff] }
 0x42a   : > { %9037 = vmatprep.subr.mxu0 %v13764_v58  ;;  %11431 = vmatpush3.msra.mxu1 %v8172_v49  ;;  %v10931_v32 = vld [vmem:[%s15324_s7 + $0xaf0] sm:$0xff] }
 0x42b   : > { %9038 = vmatpush1.msra.mxu0 %v8207_v41  ;;  %11432 = vmatprep.subr.mxu1 %v8187_v8  ;;  %v10879_v49 = vld [vmem:[%s15324_s7 + $0x950] sm:$0xff]  ;;  %v10894_v8 = vld [vmem:[%s15324_s7 + $0x9c8] sm:$0xff] }
 0x42c   : > { %9039 = vmatprep.subr.mxu0 %v13764_v58  ;;  %11433 = vmatpush3.msra.mxu1 %v8171_v25  ;;  %v10915_v41 = vld [vmem:[%s15324_s7 + $0xa70] sm:$0xff]  ;;  %v10930_v25 = vld [vmem:[%s15324_s7 + $0xae8] sm:$0xff] }
 0x42d   : > { %9040 = vmatpush1.msra.mxu0 %v8206_v60  ;;  %11434 = vmatprep.subr.mxu1 %v8186_v40  ;;  %v10878_v60 = vld [vmem:[%s15324_s7 + $0x948] sm:$0xff] }
 0x42e   : > { %9041 = vmatprep.subr.mxu0 %v13764_v58  ;;  %11435 = vmatpush3.msra.mxu1 %v8170_v62  ;;  %v10914_v40 = vld [vmem:[%s15324_s7 + $0xa68] sm:$0xff]  ;;  %v10893_v62 = vld [vmem:[%s15324_s7 + $0x9c0] sm:$0xff] }
 0x42f   : > { %9042 = vmatpush1.msra.mxu0 %v8205_v34  ;;  %11436 = vmatprep.subr.mxu1 %v8185_v9  ;;  %v10929_v34 = vld [vmem:[%s15324_s7 + $0xae0] sm:$0xff] }
 0x430   : > { %9043 = vmatprep.subr.mxu0 %v13764_v58  ;;  %11437 = vmatpush3.msra.mxu1 %v8169_v42  ;;  %v10877_v9 = vld [vmem:[%s15324_s7 + $0x940] sm:$0xff] }
 0x431   : > { %9044 = vmatpush1.msra.mxu0 %v8204_v50  ;;  %11438 = vmatprep.subr.mxu1 %v8184_v38  ;;  %v10913_v42 = vld [vmem:[%s15324_s7 + $0xa60] sm:$0xff]  ;;  %v10892_v50 = vld [vmem:[%s15324_s7 + $0x9b8] sm:$0xff] }
 0x432   : > { %9045 = vmatprep.subr.mxu0 %v13764_v58  ;;  %11439 = vmatpush3.msra.mxu1 %v8168_v26  ;;  %v10928_v38 = vld [vmem:[%s15324_s7 + $0xad8] sm:$0xff] }
 0x433   : > { %9046 = vmatpush1.msra.mxu0 %v8203_v16  ;;  %11440 = vmatprep.subr.mxu1 %v8183_v54  ;;  %v10876_v26 = vld [vmem:[%s15324_s7 + $0x938] sm:$0xff]  ;;  %v10891_v54 = vld [vmem:[%s15324_s7 + $0x9b0] sm:$0xff] }
 0x434   : > { %9047 = vmatprep.subr.mxu0 %v13764_v58  ;;  %11441 = vmatpush3.msra.mxu1 %v8167_v19  ;;  %v10912_v16 = vld [vmem:[%s15324_s7 + $0xa58] sm:$0xff]  ;;  %v10927_v19 = vld [vmem:[%s15324_s7 + $0xad0] sm:$0xff] }
 0x435   : > { %9048 = vmatpush1.msra.mxu0 %v8202_v13  ;;  %11442 = vmatprep.subr.mxu1 %v8182_v55  ;;  %v10875_v13 = vld [vmem:[%s15324_s7 + $0x930] sm:$0xff] }
 0x436   : > { %9049 = vmatprep.subr.mxu0 %v13764_v58  ;;  %11443 = vmatpush3.msra.mxu1 %v8166_v1  ;;  %v10911_v55 = vld [vmem:[%s15324_s7 + $0xa50] sm:$0xff]  ;;  %v10890_v1 = vld [vmem:[%s15324_s7 + $0x9a8] sm:$0xff] }
 0x437   : > { %9050 = vmatpush1.msra.mxu0 %v8201_v14  ;;  %11444 = vmatprep.subr.mxu1 %v8181_v15  ;;  %v10926_v14 = vld [vmem:[%s15324_s7 + $0xac8] sm:$0xff] }
 0x438   : > { %9051 = vmatprep.subr.mxu0 %v13764_v58  ;;  %11445 = vmatpush3.msra.mxu1 %v8165_v22  ;;  %v10874_v15 = vld [vmem:[%s15324_s7 + $0x928] sm:$0xff] }
 0x439   : > { %9052 = vmatpush1.msra.mxu0 %v8200_v56  ;;  %11446 = vmatprep.subr.mxu1 %v8180_v6  ;;  %v10910_v22 = vld [vmem:[%s15324_s7 + $0xa48] sm:$0xff]  ;;  %v10889_v56 = vld [vmem:[%s15324_s7 + $0x9a0] sm:$0xff] }
 0x43a   : > { %9053 = vmatprep.subr.mxu0 %v13764_v58  ;;  %11447 = vmatpush3.msra.mxu1 %v8164_v20  ;;  %v10925_v6 = vld [vmem:[%s15324_s7 + $0xac0] sm:$0xff] }
 0x43b   : > { %9054 = vmatpush1.msra.mxu0 %v8199_v37  ;;  %9024 = vmatmul.mubr.f32.vlgmr.msra.gmra.mxu1 %v13704_v7  ;;  %v10873_v20 = vld [vmem:[%s15324_s7 + $0x920] sm:$0xff] }
 0x43c   : > { %9055 = vmatprep.subr.mxu0 %v13764_v58  ;;  %11451 = vmatprep.subr.mxu1 %v10902_v3  ;;  %v10909_v37 = vld [vmem:[%s15324_s7 + $0xa40] sm:$0xff]  ;;  %v10888_v3 = vld [vmem:[%s15324_s7 + $0x998] sm:$0xff] }
 0x43d   : > { %9056 = vmatpush1.msra.mxu0 %v8198_v11  ;;  %11452 = vmatpush3.msra.mxu1 %v10886_v2  ;;  %v10924_v11 = vld [vmem:[%s15324_s7 + $0xab8] sm:$0xff] }
 0x43e   : > { %9333 = vmatprep.mubr.f32.mxu1 %v9246_v29  ;;  %9057 = vmatprep.subr.mxu0 %v13764_v58  ;;  %v10872_v2 = vld [vmem:[%s15324_s7 + $0x918] sm:$0xff] }
 0x43f   : > { %11453 = vmatprep.subr.mxu1 %v10901_v21  ;;  %9058 = vmatpush1.msra.mxu0 %v8197_v24  ;;  %v10908_v29 = vld [vmem:[%s15324_s7 + $0xa38] sm:$0xff]  ;;  %v10887_v21 = vld [vmem:[%s15324_s7 + $0x990] sm:$0xff] }
 0x440   : > { %11454 = vmatpush3.msra.mxu1 %v10885_v36  ;;  %9059 = vmatprep.subr.mxu0 %v13764_v58  ;;  %v10923_v24 = vld [vmem:[%s15324_s7 + $0xab0] sm:$0xff] }
 0x441   : > { %11455 = vmatprep.subr.mxu1 %v10900_v52  ;;  %9060 = vmatpush1.msra.mxu0 %v8196_v48  ;;  %v10871_v36 = vld [vmem:[%s15324_s7 + $0x910] sm:$0xff]  ;;  %v9245_v48 = vrot.slane %v13506_v53, 2 }
 0x442   : > { %11456 = vmatpush3.msra.mxu1 %v10884_v47  ;;  %9091 = vmatprep.subr.mxu0 %v13764_v58  ;;  %v10897_v58 = vld [vmem:[%s15324_s7 + $0x9e0] sm:$0xff]  ;;  %v10907_v52 = vld [vmem:[%s15324_s7 + $0xa30] sm:$0xff]  ;;  %v10922_v47 = vld [vmem:[%s15324_s7 + $0xaa8] sm:$0xff] }
 0x443   : > { %11457 = vmatprep.subr.mxu1 %v10899_v31  ;;  %10869 = vmatpush2.msk.msra.mxu0 %vm8390_vm0, %v8212_v44  ;;  %v10966_v31 = vld [vmem:[%s15324_s7 + $0xc08] sm:$0xff] }
 0x444   : > { %11458 = vmatpush3.msra.mxu1 %v10883_v12  ;;  %9094 = vmatmul.mubr.f32.vlgmr.msra.gmra.mxu0 %v13909_v10  ;;  %v10906_v44 = vld [vmem:[%s15324_s7 + $0xa28] sm:$0xff] }
 0x445   : > { %11459 = vmatprep.subr.mxu1 %v10898_v18  ;;  %11486 = vmatprep.subr.mxu0 %v10934_v61  ;;  %v10950_v12 = vld [vmem:[%s15324_s7 + $0xb88] sm:$0xff]  ;;  %v10921_v18 = vld [vmem:[%s15324_s7 + $0xaa0] sm:$0xff]  ;;  %v9250_v61 = vrot.slane %v13562_v0, 2 }
 0x446   : > { %11460 = vmatpush3.msra.mxu1 %v10882_v28  ;;  %11487 = vmatpush3.msra.mxu0 %v10918_v30  ;;  %v10965_v28 = vld [vmem:[%s15324_s7 + $0xc00] sm:$0xff] }
 0x447   : > { %9403 = vmatprep.mubr.f32.mxu0 %v9248_v4  ;;  %11461 = vmatprep.subr.mxu1 %v10897_v58  ;;  %v10905_v30 = vld [vmem:[%s15324_s7 + $0xa20] sm:$0xff]  ;;  %v10920_v4 = vld [vmem:[%s15324_s7 + $0xa98] sm:$0xff] }
 0x448   : > { %11488 = vmatprep.subr.mxu0 %v10933_v39  ;;  %11462 = vmatpush3.msra.mxu1 %v10881_v27  ;;  %v10949_v58 = vld [vmem:[%s15324_s7 + $0xb80] sm:$0xff]  ;;  %v10964_v39 = vld [vmem:[%s15324_s7 + $0xbf8] sm:$0xff] }
 0x449   : > { %11489 = vmatpush3.msra.mxu0 %v10917_v35  ;;  %11463 = vmatprep.subr.mxu1 %v10896_v63  ;;  %v10904_v27 = vld [vmem:[%s15324_s7 + $0xa18] sm:$0xff]  ;;  %v10919_v63 = vld [vmem:[%s15324_s7 + $0xa90] sm:$0xff] }
 0x44a   : > { %11490 = vmatprep.subr.mxu0 %v10932_v5  ;;  %11464 = vmatpush3.msra.mxu1 %v10880_v17  ;;  %v10948_v35 = vld [vmem:[%s15324_s7 + $0xb78] sm:$0xff]  ;;  %v10963_v5 = vld [vmem:[%s15324_s7 + $0xbf0] sm:$0xff] }
 0x44b   : > { %11491 = vmatpush3.msra.mxu0 %v10916_v46  ;;  %11465 = vmatprep.subr.mxu1 %v10895_v23  ;;  %v10903_v17 = vld [vmem:[%s15324_s7 + $0xa10] sm:$0xff]  ;;  %v9247_v23 = vrot.slane %v13498_v57, 2 }
 0x44c   : > { %11492 = vmatprep.subr.mxu0 %v10931_v32  ;;  %11466 = vmatpush3.msra.mxu1 %v10879_v49  ;;  %v10947_v46 = vld [vmem:[%s15324_s7 + $0xb70] sm:$0xff]  ;;  %v10962_v32 = vld [vmem:[%s15324_s7 + $0xbe8] sm:$0xff] }
 0x44d   : > { %11493 = vmatpush3.msra.mxu0 %v10915_v41  ;;  %11467 = vmatprep.subr.mxu1 %v10894_v8  ;;  %v10998_v49 = vld [vmem:[%s15324_s7 + $0xd08] sm:$0xff] }
 0x44e   : > { %11494 = vmatprep.subr.mxu0 %v10930_v25  ;;  %11468 = vmatpush3.msra.mxu1 %v10878_v60  ;;  %v10946_v41 = vld [vmem:[%s15324_s7 + $0xb68] sm:$0xff]  ;;  %v10961_v25 = vld [vmem:[%s15324_s7 + $0xbe0] sm:$0xff]  ;;  %v9252_v60 = vrot.slane %v13533_v59, 2 }
 0x44f   : > { %11495 = vmatpush3.msra.mxu0 %v10914_v40  ;;  %11469 = vmatprep.subr.mxu1 %v10893_v62  ;;  %v10982_v8 = vld [vmem:[%s15324_s7 + $0xc88] sm:$0xff]  ;;  %v10997_v40 = vld [vmem:[%s15324_s7 + $0xd00] sm:$0xff] }
 0x450   : > { %11496 = vmatprep.subr.mxu0 %v10929_v34  ;;  %11470 = vmatpush3.msra.mxu1 %v10877_v9  ;;  %v10945_v62 = vld [vmem:[%s15324_s7 + $0xb60] sm:$0xff]  ;;  %v10960_v9 = vld [vmem:[%s15324_s7 + $0xbd8] sm:$0xff] }
 0x451   : > { %11497 = vmatpush3.msra.mxu0 %v10913_v42  ;;  %11471 = vmatprep.subr.mxu1 %v10892_v50  ;;  %v10981_v34 = vld [vmem:[%s15324_s7 + $0xc80] sm:$0xff]  ;;  %v10996_v42 = vld [vmem:[%s15324_s7 + $0xcf8] sm:$0xff] }
 0x452   : > { %11498 = vmatprep.subr.mxu0 %v10928_v38  ;;  %11472 = vmatpush3.msra.mxu1 %v10876_v26  ;;  %v10944_v50 = vld [vmem:[%s15324_s7 + $0xb58] sm:$0xff]  ;;  %v10959_v26 = vld [vmem:[%s15324_s7 + $0xbd0] sm:$0xff] }
 0x453   : > { %11499 = vmatpush3.msra.mxu0 %v10912_v16  ;;  %11473 = vmatprep.subr.mxu1 %v10891_v54  ;;  %v10980_v38 = vld [vmem:[%s15324_s7 + $0xc78] sm:$0xff]  ;;  %v10995_v16 = vld [vmem:[%s15324_s7 + $0xcf0] sm:$0xff] }
 0x454   : > { %11500 = vmatprep.subr.mxu0 %v10927_v19  ;;  %11474 = vmatpush3.msra.mxu1 %v10875_v13  ;;  %v10943_v54 = vld [vmem:[%s15324_s7 + $0xb50] sm:$0xff]  ;;  %v10958_v13 = vld [vmem:[%s15324_s7 + $0xbc8] sm:$0xff] }
 0x455   : > { %11501 = vmatpush3.msra.mxu0 %v10911_v55  ;;  %11475 = vmatprep.subr.mxu1 %v10890_v1  ;;  %v10979_v19 = vld [vmem:[%s15324_s7 + $0xc70] sm:$0xff]  ;;  %v10994_v55 = vld [vmem:[%s15324_s7 + $0xce8] sm:$0xff] }
 0x456   : > { %11502 = vmatprep.subr.mxu0 %v10926_v14  ;;  %11476 = vmatpush3.msra.mxu1 %v10874_v15  ;;  %v10942_v1 = vld [vmem:[%s15324_s7 + $0xb48] sm:$0xff]  ;;  %v10957_v15 = vld [vmem:[%s15324_s7 + $0xbc0] sm:$0xff] }
 0x457   : > { %11503 = vmatpush3.msra.mxu0 %v10910_v22  ;;  %11477 = vmatprep.subr.mxu1 %v10889_v56  ;;  %v10978_v14 = vld [vmem:[%s15324_s7 + $0xc68] sm:$0xff]  ;;  %v10993_v22 = vld [vmem:[%s15324_s7 + $0xce0] sm:$0xff] }
 0x458   : > { %11504 = vmatprep.subr.mxu0 %v10925_v6  ;;  %11478 = vmatpush3.msra.mxu1 %v10873_v20  ;;  %v10941_v56 = vld [vmem:[%s15324_s7 + $0xb40] sm:$0xff]  ;;  %v10956_v20 = vld [vmem:[%s15324_s7 + $0xbb8] sm:$0xff] }
 0x459   : > { %11505 = vmatpush3.msra.mxu0 %v10909_v37  ;;  %11479 = vmatprep.subr.mxu1 %v10888_v3  ;;  %v10977_v6 = vld [vmem:[%s15324_s7 + $0xc60] sm:$0xff]  ;;  %v10992_v37 = vld [vmem:[%s15324_s7 + $0xcd8] sm:$0xff] }
 0x45a   : > { %11506 = vmatprep.subr.mxu0 %v10924_v11  ;;  %11480 = vmatpush3.msra.mxu1 %v10872_v2  ;;  %v10940_v3 = vld [vmem:[%s15324_s7 + $0xb38] sm:$0xff]  ;;  %v10955_v2 = vld [vmem:[%s15324_s7 + $0xbb0] sm:$0xff] }
 0x45b   : > { %11507 = vmatpush3.msra.mxu0 %v10908_v29  ;;  %11481 = vmatprep.subr.mxu1 %v10887_v21  ;;  %v10976_v11 = vld [vmem:[%s15324_s7 + $0xc58] sm:$0xff]  ;;  %v10991_v29 = vld [vmem:[%s15324_s7 + $0xcd0] sm:$0xff] }
 0x45c   : > { %11508 = vmatprep.subr.mxu0 %v10923_v24  ;;  %11482 = vmatpush3.msra.mxu1 %v10871_v36  ;;  %v10939_v21 = vld [vmem:[%s15324_s7 + $0xb30] sm:$0xff]  ;;  %v10954_v36 = vld [vmem:[%s15324_s7 + $0xba8] sm:$0xff] }
 0x45d   : > { %11509 = vmatpush3.msra.mxu0 %v10907_v52  ;;  %9334 = vmatmul.mubr.f32.vlgmr.msra.gmra.mxu1 %v9245_v48  ;;  %v10975_v24 = vld [vmem:[%s15324_s7 + $0xc50] sm:$0xff]  ;;  %v10990_v52 = vld [vmem:[%s15324_s7 + $0xcc8] sm:$0xff] }
 0x45e   : > { %11510 = vmatprep.subr.mxu0 %v10922_v47  ;;  %11521 = vmatprep.subr.mxu1 %v10966_v31  ;;  %v10938_v48 = vld [vmem:[%s15324_s7 + $0xb28] sm:$0xff] }
 0x45f   : > { %11511 = vmatpush3.msra.mxu0 %v10906_v44  ;;  %11522 = vmatpush3.msra.mxu1 %v10950_v12  ;;  %v10974_v31 = vld [vmem:[%s15324_s7 + $0xc48] sm:$0xff]  ;;  %v10953_v44 = vld [vmem:[%s15324_s7 + $0xba0] sm:$0xff] }
 0x460   : > { %9473 = vmatprep.mubr.f32.mxu1 %v9250_v61  ;;  %11512 = vmatprep.subr.mxu0 %v10921_v18  ;;  %v10989_v12 = vld [vmem:[%s15324_s7 + $0xcc0] sm:$0xff] }
 0x461   : > { %11523 = vmatprep.subr.mxu1 %v10965_v28  ;;  %11513 = vmatpush3.msra.mxu0 %v10905_v30  ;;  %v10937_v18 = vld [vmem:[%s15324_s7 + $0xb20] sm:$0xff]  ;;  %v10952_v30 = vld [vmem:[%s15324_s7 + $0xb98] sm:$0xff] }
 0x462   : > { %11524 = vmatpush3.msra.mxu1 %v10949_v58  ;;  %11514 = vmatprep.subr.mxu0 %v10920_v4  ;;  %v10973_v28 = vld [vmem:[%s15324_s7 + $0xc40] sm:$0xff] }
 0x463   : > { %11525 = vmatprep.subr.mxu1 %v10964_v39  ;;  %11515 = vmatpush3.msra.mxu0 %v10904_v27  ;;  %v10988_v39 = vld [vmem:[%s15324_s7 + $0xcb8] sm:$0xff] }
 0x464   : > { %11526 = vmatpush3.msra.mxu1 %v10948_v35  ;;  %11516 = vmatprep.subr.mxu0 %v10919_v63  ;;  %v10936_v27 = vld [vmem:[%s15324_s7 + $0xb18] sm:$0xff]  ;;  %v10951_v63 = vld [vmem:[%s15324_s7 + $0xb90] sm:$0xff] }
 0x465   : > { %11527 = vmatprep.subr.mxu1 %v10963_v5  ;;  %11517 = vmatpush3.msra.mxu0 %v10903_v17  ;;  %v10972_v35 = vld [vmem:[%s15324_s7 + $0xc38] sm:$0xff]  ;;  %v10987_v17 = vld [vmem:[%s15324_s7 + $0xcb0] sm:$0xff] }
 0x466   : > { %11528 = vmatpush3.msra.mxu1 %v10947_v46  ;;  %9404 = vmatmul.mubr.f32.vlgmr.msra.gmra.mxu0 %v9247_v23  ;;  %v10935_v46 = vld [vmem:[%s15324_s7 + $0xb10] sm:$0xff] }
 0x467   : > { %11529 = vmatprep.subr.mxu1 %v10962_v32  ;;  %11556 = vmatprep.subr.mxu0 %v10998_v49  ;;  %v10971_v32 = vld [vmem:[%s15324_s7 + $0xc30] sm:$0xff]  ;;  %v9249_v49 = vrot.slane %v13729_v51, 2 }
 0x468   : > { %11530 = vmatpush3.msra.mxu1 %v10946_v41  ;;  %11557 = vmatpush3.msra.mxu0 %v10982_v8  ;;  %v10986_v41 = vld [vmem:[%s15324_s7 + $0xca8] sm:$0xff] }
 0x469   : > { %9543 = vmatprep.mubr.f32.mxu0 %v9252_v60  ;;  %11531 = vmatprep.subr.mxu1 %v10961_v25  ;;  %v10970_v25 = vld [vmem:[%s15324_s7 + $0xc28] sm:$0xff] }
 0x46a   : > { %11558 = vmatprep.subr.mxu0 %v10997_v40  ;;  %11532 = vmatpush3.msra.mxu1 %v10945_v62  ;;  %v11014_v60 = vld [vmem:[%s15324_s7 + $0xd88] sm:$0xff]  ;;  %v10985_v40 = vld [vmem:[%s15324_s7 + $0xca0] sm:$0xff] }
 0x46b   : > { %11559 = vmatpush3.msra.mxu0 %v10981_v34  ;;  %11533 = vmatprep.subr.mxu1 %v10960_v9  ;;  %v14663_v62 = vld [vmem:[#allocation2] sm:$0xff]  ;;  %v9254_v34 = vrot.slane %v13741_v33, 2 }
 0x46c   : > { %11560 = vmatprep.subr.mxu0 %v10996_v42  ;;  %11534 = vmatpush3.msra.mxu1 %v10944_v50  ;;  %v10969_v9 = vld [vmem:[%s15324_s7 + $0xc20] sm:$0xff]  ;;  %v10984_v50 = vld [vmem:[%s15324_s7 + $0xc98] sm:$0xff] }
 0x46d   : > { %11561 = vmatpush3.msra.mxu0 %v10980_v38  ;;  %11535 = vmatprep.subr.mxu1 %v10959_v26  ;;  %v11013_v42 = vld [vmem:[%s15324_s7 + $0xd80] sm:$0xff]  ;;  %v10968_v38 = vld [vmem:[%s15324_s7 + $0xc18] sm:$0xff] }
 0x46e   : > { %11562 = vmatprep.subr.mxu0 %v10995_v16  ;;  %11536 = vmatpush3.msra.mxu1 %v10943_v54  ;;  %v11012_v26 = vld [vmem:[%s15324_s7 + $0xd78] sm:$0xff]  ;;  %v10983_v16 = vld [vmem:[%s15324_s7 + $0xc90] sm:$0xff] }
 0x46f   : > { %11563 = vmatpush3.msra.mxu0 %v10979_v19  ;;  %11537 = vmatprep.subr.mxu1 %v10958_v13  ;;  %v10967_v54 = vld [vmem:[%s15324_s7 + $0xc10] sm:$0xff]  ;;  %v9251_v13 = vrot.slane %v13704_v7, 2 }
 0x470   : > { %11564 = vmatprep.subr.mxu0 %v10994_v55  ;;  %11538 = vmatpush3.msra.mxu1 %v10942_v1  ;;  %v11011_v19 = vld [vmem:[%s15324_s7 + $0xd70] sm:$0xff]  ;;  %v11010_v1 = vld [vmem:[%s15324_s7 + $0xd68] sm:$0xff] }
 0x471   : > { %11565 = vmatpush3.msra.mxu0 %v10978_v14  ;;  %11539 = vmatprep.subr.mxu1 %v10957_v15  ;;  %v11049_v55 = vld [vmem:[%s15324_s7 + $0xe90] sm:$0xff]  ;;  %v9767_v15 = vrot.slane %v13510_v45, 3  ;;  %v11047_v45 = vld [vmem:[%s15324_s7 + $0xe80] sm:$0xff] }
 0x472   : > { %11566 = vmatprep.subr.mxu0 %v10993_v22  ;;  %11540 = vmatpush3.msra.mxu1 %v10941_v56  ;;  %v11033_v14 = vld [vmem:[%s15324_s7 + $0xe10] sm:$0xff]  ;;  %v11048_v22 = vld [vmem:[%s15324_s7 + $0xe88] sm:$0xff]  ;;  %v11009_v56 = vld [vmem:[%s15324_s7 + $0xd60] sm:$0xff] }
 0x473   : > { %11567 = vmatpush3.msra.mxu0 %v10977_v6  ;;  %11541 = vmatprep.subr.mxu1 %v10956_v20  ;;  %v11032_v6 = vld [vmem:[%s15324_s7 + $0xe08] sm:$0xff]  ;;  %v11008_v20 = vld [vmem:[%s15324_s7 + $0xd58] sm:$0xff] }
 0x474   : > { %11568 = vmatprep.subr.mxu0 %v10992_v37  ;;  %11542 = vmatpush3.msra.mxu1 %v10940_v3  ;;  %v11031_v37 = vld [vmem:[%s15324_s7 + $0xe00] sm:$0xff]  ;;  %v11046_v3 = vld [vmem:[%s15324_s7 + $0xe78] sm:$0xff] }
 0x475   : > { %11569 = vmatpush3.msra.mxu0 %v10976_v11  ;;  %11543 = vmatprep.subr.mxu1 %v10955_v2  ;;  %v11238_v47 = vpop.f32.mrf.mxu1  ;;  %v11007_v11 = vld [vmem:[%s15324_s7 + $0xd50] sm:$0xff]  ;;  %v11030_v2 = vld [vmem:[%s15324_s7 + $0xdf8] sm:$0xff] }
 0x476   : > { %11570 = vmatprep.subr.mxu0 %v10991_v29  ;;  %11544 = vmatpush3.msra.mxu1 %v10939_v21  ;;  %v11045_v29 = vld [vmem:[%s15324_s7 + $0xe70] sm:$0xff]  ;;  %v11006_v21 = vld [vmem:[%s15324_s7 + $0xd48] sm:$0xff] }
 0x477   : > { %11571 = vmatpush3.msra.mxu0 %v10975_v24  ;;  %11545 = vmatprep.subr.mxu1 %v10954_v36  ;;  %v11239_v61 = vpop.f32.mrf.mxu1  ;;  %v11029_v24 = vld [vmem:[%s15324_s7 + $0xdf0] sm:$0xff]  ;;  %v11044_v36 = vld [vmem:[%s15324_s7 + $0xe68] sm:$0xff] }
 0x478   : > { %11572 = vmatprep.subr.mxu0 %v10990_v52  ;;  %11546 = vmatpush3.msra.mxu1 %v10938_v48  ;;  %v11240_v58 = vadd.f32 %v11239_v61, %v11238_v47  ;;  %v11203_v4 = vpop.f32.mrf.mxu0  ;;  %v11005_v52 = vld [vmem:[%s15324_s7 + $0xd40] sm:$0xff]  ;;  %v11028_v48 = vld [vmem:[%s15324_s7 + $0xde8] sm:$0xff]  ;;  %v11026_v61 = vld [vmem:[%s15324_s7 + $0xdd8] sm:$0xff] }
 0x479   : > { %11573 = vmatpush3.msra.mxu0 %v10974_v31  ;;  %11547 = vmatprep.subr.mxu1 %v10953_v44  ;;  %v11043_v47 = vld [vmem:[%s15324_s7 + $0xe60] sm:$0xff]  ;;  %v11004_v31 = vld [vmem:[%s15324_s7 + $0xd38] sm:$0xff] }
 0x47a   : > { %11574 = vmatprep.subr.mxu0 %v10989_v12  ;;  %11548 = vmatpush3.msra.mxu1 %v10937_v18  ;;  %v11204_v5 = vpop.f32.mrf.mxu0  ;;  %v11027_v44 = vld [vmem:[%s15324_s7 + $0xde0] sm:$0xff]  ;;  %v11042_v12 = vld [vmem:[%s15324_s7 + $0xe58] sm:$0xff]  ;;  %v11003_v18 = vld [vmem:[%s15324_s7 + $0xd30] sm:$0xff] }
 0x47b   : > { %11575 = vmatpush3.msra.mxu0 %v10973_v28  ;;  %11549 = vmatprep.subr.mxu1 %v10952_v30  ;;  %v11205_v23 = vadd.f32 %v11204_v5, %v11203_v4  ;;  %v11041_v30 = vld [vmem:[%s15324_s7 + $0xe50] sm:$0xff]  ;;  %v11024_v5 = vld [vmem:[%s15324_s7 + $0xdc8] sm:$0xff] }
 0x47c   : > { %11576 = vmatprep.subr.mxu0 %v10988_v39  ;;  %11550 = vmatpush3.msra.mxu1 %v10936_v27  ;;  %v11025_v4 = vld [vmem:[%s15324_s7 + $0xdd0] sm:$0xff]  ;;  %v11040_v27 = vld [vmem:[%s15324_s7 + $0xe48] sm:$0xff] }
 0x47d   : > { %11577 = vmatpush3.msra.mxu0 %v10972_v35  ;;  %11551 = vmatprep.subr.mxu1 %v10951_v63  ;;  %v14652_v8 = vadd.f32 %v11240_v58, %v11205_v23  ;;  %v11002_v58 = vld [vmem:[%s15324_s7 + $0xd28] sm:$0xff]  ;;  %v11001_v35 = vld [vmem:[%s15324_s7 + $0xd20] sm:$0xff]  ;;  %v11000_v23 = vld [vmem:[%s15324_s7 + $0xd18] sm:$0xff] }
 0x47e   : > { %11578 = vmatprep.subr.mxu0 %v10987_v17  ;;  %11552 = vmatpush3.msra.mxu1 %v10935_v46  ;;  %v11039_v46 = vld [vmem:[%s15324_s7 + $0xe40] sm:$0xff] }
 0x47f   : > { %11579 = vmatpush3.msra.mxu0 %v10971_v32  ;;  %9474 = vmatmul.mubr.f32.vlgmr.msra.gmra.mxu1 %v9249_v49  ;;  %v11023_v32 = vld [vmem:[%s15324_s7 + $0xdc0] sm:$0xff] }
 0x480   : > { %11580 = vmatprep.subr.mxu0 %v10986_v41  ;;  %9549 = vmatprep.subr.mxu1 %v14663_v62  ;;  %v11038_v41 = vld [vmem:[%s15324_s7 + $0xe38] sm:$0xff] }
 0x481   : > { %11581 = vmatpush3.msra.mxu0 %v10970_v25  ;;  %9550 = vmatpush1.msra.mxu1 %v11014_v60  ;;  %v10999_v25 = vld [vmem:[%s15324_s7 + $0xd10] sm:$0xff] }
 0x482   : > { %11017 = vmatprep.mubr.msk.f32.mxu1 %vm4388_vm10, %v9254_v34  ;;  %11582 = vmatprep.subr.mxu0 %v10985_v40  ;;  %v11022_v40 = vld [vmem:[%s15324_s7 + $0xdb8] sm:$0xff]  ;;  %v11037_v34 = vld [vmem:[%s15324_s7 + $0xe30] sm:$0xff] }
 0x483   : > { %9551 = vmatprep.subr.mxu1 %v14663_v62  ;;  %11583 = vmatpush3.msra.mxu0 %v10969_v9  ;;  %v11015_v9 = vld [vmem:[%s15324_s7 + $0xd90] sm:$0x7] }
 0x484   : > { %9552 = vmatpush1.msra.mxu1 %v11013_v42  ;;  %11584 = vmatprep.subr.mxu0 %v10984_v50  ;;  %v11021_v50 = vld [vmem:[%s15324_s7 + $0xdb0] sm:$0xff] }
 0x485   : > { %9553 = vmatprep.subr.mxu1 %v14663_v62  ;;  %11585 = vmatpush3.msra.mxu0 %v10968_v38  ;;  %v9253_v38 = vrot.slane %v13909_v10, 2 }
 0x486   : > { %9554 = vmatpush1.msra.mxu1 %v11012_v26  ;;  %11586 = vmatprep.subr.mxu0 %v10983_v16  ;;  %v11036_v26 = vld [vmem:[%s15324_s7 + $0xe28] sm:$0xff]  ;;  %v11081_v16 = vld [vmem:[%s15324_s7 + $0xf90] sm:$0xff] }
 0x487   : > { %9555 = vmatprep.subr.mxu1 %v14663_v62  ;;  %11587 = vmatpush3.msra.mxu0 %v10967_v54  ;;  %v11020_v54 = vld [vmem:[%s15324_s7 + $0xda8] sm:$0xff] }
 0x488   : > { %9556 = vmatpush1.msra.mxu1 %v11011_v19  ;;  %9544 = vmatmul.mubr.f32.vlgmr.msra.gmra.mxu0 %v9251_v13  ;;  %v11065_v19 = vld [vmem:[%s15324_s7 + $0xf10] sm:$0xff]  ;;  %v11035_v13 = vld [vmem:[%s15324_s7 + $0xe20] sm:$0xff] }
 0x489   : > { %9557 = vmatprep.subr.mxu1 %v14663_v62  ;;  %11591 = vmatprep.subr.mxu0 %v11049_v55  ;;  %v9769_v55 = vrot.slane %v13502_v43, 3  ;;  %v11079_v43 = vld [vmem:[%s15324_s7 + $0xf80] sm:$0xff] }
 0x48a   : > { %9558 = vmatpush1.msra.mxu1 %v11010_v1  ;;  %11592 = vmatpush3.msra.mxu0 %v11033_v14  ;;  %v11080_v1 = vld [vmem:[%s15324_s7 + $0xf88] sm:$0xff]  ;;  %v11019_v14 = vld [vmem:[%s15324_s7 + $0xda0] sm:$0xff] }
 0x48b   : > { %9854 = vmatprep.mubr.f32.mxu0 %v9767_v15  ;;  %9559 = vmatprep.subr.mxu1 %v14663_v62  ;;  %v11064_v15 = vld [vmem:[%s15324_s7 + $0xf08] sm:$0xff] }
 0x48c   : > { %11593 = vmatprep.subr.mxu0 %v11048_v22  ;;  %9560 = vmatpush1.msra.mxu1 %v11009_v56  ;;  %v11034_v22 = vld [vmem:[%s15324_s7 + $0xe18] sm:$0xff] }
 0x48d   : > { %11594 = vmatpush3.msra.mxu0 %v11032_v6  ;;  %9561 = vmatprep.subr.mxu1 %v14663_v62  ;;  %v11018_v56 = vld [vmem:[%s15324_s7 + $0xd98] sm:$0xff]  ;;  %v11063_v6 = vld [vmem:[%s15324_s7 + $0xf00] sm:$0xff] }
 0x48e   : > { %11595 = vmatprep.subr.mxu0 %v11047_v45  ;;  %9562 = vmatpush1.msra.mxu1 %v11008_v20  ;;  %v9766_v45 = vrot.slane %v13506_v53, 3  ;;  %v11078_v20 = vld [vmem:[%s15324_s7 + $0xf78] sm:$0xff]  ;;  %v11077_v53 = vld [vmem:[%s15324_s7 + $0xf70] sm:$0xff] }
 0x48f   : > { %11596 = vmatpush3.msra.mxu0 %v11031_v37  ;;  %9563 = vmatprep.subr.mxu1 %v14663_v62  ;;  %v11113_v37 = vld [vmem:[%s15324_s7 + $0x1090] sm:$0xff] }
 0x490   : > { %11597 = vmatprep.subr.mxu0 %v11046_v3  ;;  %9564 = vmatpush1.msra.mxu1 %v11007_v11  ;;  %v11062_v3 = vld [vmem:[%s15324_s7 + $0xef8] sm:$0xff]  ;;  %v11097_v11 = vld [vmem:[%s15324_s7 + $0x1010] sm:$0xff] }
 0x491   : > { %11598 = vmatpush3.msra.mxu0 %v11030_v2  ;;  %9565 = vmatprep.subr.mxu1 %v14663_v62  ;;  %v9771_v2 = vrot.slane %v13562_v0, 3  ;;  %v11111_v0 = vld [vmem:[%s15324_s7 + $0x1080] sm:$0xff] }
 0x492   : > { %11599 = vmatprep.subr.mxu0 %v11045_v29  ;;  %9566 = vmatpush1.msra.mxu1 %v11006_v21  ;;  %v11112_v29 = vld [vmem:[%s15324_s7 + $0x1088] sm:$0xff]  ;;  %v11061_v21 = vld [vmem:[%s15324_s7 + $0xef0] sm:$0xff] }
 0x493   : > { %11600 = vmatpush3.msra.mxu0 %v11029_v24  ;;  %9567 = vmatprep.subr.mxu1 %v14663_v62  ;;  %v11096_v24 = vld [vmem:[%s15324_s7 + $0x1008] sm:$0xff] }
 0x494   : > { %11601 = vmatprep.subr.mxu0 %v11044_v36  ;;  %9568 = vmatpush1.msra.mxu1 %v11005_v52  ;;  %v11076_v36 = vld [vmem:[%s15324_s7 + $0xf68] sm:$0xff] }
 0x495   : > { %11602 = vmatpush3.msra.mxu0 %v11028_v48  ;;  %9569 = vmatprep.subr.mxu1 %v14663_v62  ;;  %v11060_v52 = vld [vmem:[%s15324_s7 + $0xee8] sm:$0xff]  ;;  %v11095_v48 = vld [vmem:[%s15324_s7 + $0x1000] sm:$0xff] }
 0x496   : > { %11603 = vmatprep.subr.mxu0 %v11043_v47  ;;  %9570 = vmatpush1.msra.mxu1 %v11004_v31  ;;  %v11308_v28 = vpop.f32.mrf.mxu1  ;;  %v11075_v47 = vld [vmem:[%s15324_s7 + $0xf60] sm:$0xff]  ;;  %v11110_v31 = vld [vmem:[%s15324_s7 + $0x1078] sm:$0xff] }
 0x497   : > { %11604 = vmatpush3.msra.mxu0 %v11027_v44  ;;  %9571 = vmatprep.subr.mxu1 %v14663_v62  ;;  %v11059_v44 = vld [vmem:[%s15324_s7 + $0xee0] sm:$0xff] }
 0x498   : > { %11605 = vmatprep.subr.mxu0 %v11042_v12  ;;  %9572 = vmatpush1.msra.mxu1 %v11003_v18  ;;  %v11309_v39 = vpop.f32.mrf.mxu1  ;;  %v11094_v12 = vld [vmem:[%s15324_s7 + $0xff8] sm:$0xff] }
 0x499   : > { %11606 = vmatpush3.msra.mxu0 %v11026_v61  ;;  %9573 = vmatprep.subr.mxu1 %v14663_v62  ;;  %v11310_v63 = vadd.f32 %v11309_v39, %v11308_v28  ;;  %v11074_v18 = vld [vmem:[%s15324_s7 + $0xf58] sm:$0xff]  ;;  %v11109_v61 = vld [vmem:[%s15324_s7 + $0x1070] sm:$0xff] }
 0x49a   : > { %11607 = vmatprep.subr.mxu0 %v11041_v30  ;;  %9574 = vmatpush1.msra.mxu1 %v11002_v58  ;;  %v11273_v17 = vpop.f32.mrf.mxu0  ;;  %v11058_v28 = vld [vmem:[%s15324_s7 + $0xed8] sm:$0xff]  ;;  %v11093_v30 = vld [vmem:[%s15324_s7 + $0xff0] sm:$0xff] }
 0x49b   : > { %11608 = vmatpush3.msra.mxu0 %v11025_v4  ;;  %9575 = vmatprep.subr.mxu1 %v14663_v62  ;;  %v11073_v58 = vld [vmem:[%s15324_s7 + $0xf50] sm:$0xff]  ;;  %v11108_v4 = vld [vmem:[%s15324_s7 + $0x1068] sm:$0xff] }
 0x49c   : > { %11609 = vmatprep.subr.mxu0 %v11040_v27  ;;  %9576 = vmatpush1.msra.mxu1 %v11001_v35  ;;  %v11274_v49 = vpop.f32.mrf.mxu0  ;;  %v11057_v39 = vld [vmem:[%s15324_s7 + $0xed0] sm:$0xff]  ;;  %v11092_v27 = vld [vmem:[%s15324_s7 + $0xfe8] sm:$0xff] }
 0x49d   : > { %11610 = vmatpush3.msra.mxu0 %v11024_v5  ;;  %9577 = vmatprep.subr.mxu1 %v14663_v62  ;;  %v11275_v60 = vadd.f32 %v11274_v49, %v11273_v17  ;;  %v11072_v35 = vld [vmem:[%s15324_s7 + $0xf48] sm:$0xff]  ;;  %v11091_v17 = vld [vmem:[%s15324_s7 + $0xfe0] sm:$0xff]  ;;  %v11090_v49 = vld [vmem:[%s15324_s7 + $0xfd8] sm:$0xff] }
 0x49e   : > { %11611 = vmatprep.subr.mxu0 %v11039_v46  ;;  %9578 = vmatpush1.msra.mxu1 %v11000_v23  ;;  %v11056_v5 = vld [vmem:[%s15324_s7 + $0xec8] sm:$0xff]  ;;  %v11071_v46 = vld [vmem:[%s15324_s7 + $0xf40] sm:$0xff]  ;;  %v11106_v23 = vld [vmem:[%s15324_s7 + $0x1058] sm:$0xff] }
 0x49f   : > { %11612 = vmatpush3.msra.mxu0 %v11023_v32  ;;  %9579 = vmatprep.subr.mxu1 %v14663_v62  ;;  %v8601_v42 = vadd.f32 %v11275_v60, %v14652_v8  ;;  %v11055_v32 = vld [vmem:[%s15324_s7 + $0xec0] sm:$0xff]  ;;  %v11105_v60 = vld [vmem:[%s15324_s7 + $0x1050] sm:$0xff] }
 0x4a0   : > { %11613 = vmatprep.subr.mxu0 %v11038_v41  ;;  %9580 = vmatpush1.msra.mxu1 %v10999_v25  ;;  %v11070_v41 = vld [vmem:[%s15324_s7 + $0xf38] sm:$0xff] }
 0x4a1   : > { %11614 = vmatpush3.msra.mxu0 %v11022_v40  ;;  %9611 = vmatprep.subr.mxu1 %v14663_v62  ;;  %v14835_v8 = vadd.f32 %v11310_v63, %v8601_v42  ;;  %v11107_v63 = vld [vmem:[%s15324_s7 + $0x1060] sm:$0xff]  ;;  %v11054_v40 = vld [vmem:[%s15324_s7 + $0xeb8] sm:$0xff] }
 0x4a2   : > { %11615 = vmatprep.subr.mxu0 %v11037_v34  ;;  %11016 = vmatpush2.msk.msra.mxu1 %vm8390_vm0, %v11015_v9  ;;  %v11089_v34 = vld [vmem:[%s15324_s7 + $0xfd0] sm:$0xff] }
 0x4a3   : > { %11616 = vmatpush3.msra.mxu0 %v11021_v50  ;;  %9614 = vmatmul.mubr.f32.vlgmr.msra.gmra.mxu1 %v9253_v38  ;;  %v11069_v9 = vld [vmem:[%s15324_s7 + $0xf30] sm:$0xff]  ;;  %v11104_v50 = vld [vmem:[%s15324_s7 + $0x1048] sm:$0xff] }
 0x4a4   : > { %11617 = vmatprep.subr.mxu0 %v11036_v26  ;;  %11626 = vmatprep.subr.mxu1 %v11081_v16  ;;  %v11053_v38 = vld [vmem:[%s15324_s7 + $0xeb0] sm:$0xff]  ;;  %v11088_v16 = vld [vmem:[%s15324_s7 + $0xfc8] sm:$0xff] }
 0x4a5   : > { %11618 = vmatpush3.msra.mxu0 %v11020_v54  ;;  %11627 = vmatpush3.msra.mxu1 %v11065_v19  ;;  %v11068_v54 = vld [vmem:[%s15324_s7 + $0xf28] sm:$0xff]  ;;  %v11103_v19 = vld [vmem:[%s15324_s7 + $0x1040] sm:$0xff] }
 0x4a6   : > { %9924 = vmatprep.mubr.f32.mxu1 %v9769_v55  ;;  %11619 = vmatprep.subr.mxu0 %v11035_v13  ;;  %v11052_v13 = vld [vmem:[%s15324_s7 + $0xea8] sm:$0xff]  ;;  %v11087_v55 = vld [vmem:[%s15324_s7 + $0xfc0] sm:$0xff] }
 0x4a7   : > { %11628 = vmatprep.subr.mxu1 %v11080_v1  ;;  %11620 = vmatpush3.msra.mxu0 %v11019_v14  ;;  %v11067_v1 = vld [vmem:[%s15324_s7 + $0xf20] sm:$0xff] }
 0x4a8   : > { %11629 = vmatpush3.msra.mxu1 %v11064_v15  ;;  %11621 = vmatprep.subr.mxu0 %v11034_v22  ;;  %v11102_v15 = vld [vmem:[%s15324_s7 + $0x1038] sm:$0xff]  ;;  %v11051_v22 = vld [vmem:[%s15324_s7 + $0xea0] sm:$0xff] }
 0x4a9   : > { %11630 = vmatprep.subr.mxu1 %v11079_v43  ;;  %11622 = vmatpush3.msra.mxu0 %v11018_v56  ;;  %v11086_v56 = vld [vmem:[%s15324_s7 + $0xfb8] sm:$0xff] }
 0x4aa   : > { %11631 = vmatpush3.msra.mxu1 %v11063_v6  ;;  %9855 = vmatmul.mubr.f32.vlgmr.msra.gmra.mxu0 %v9766_v45  ;;  %v11066_v6 = vld [vmem:[%s15324_s7 + $0xf18] sm:$0xff] }
 0x4ab   : > { %11632 = vmatprep.subr.mxu1 %v11078_v20  ;;  %11661 = vmatprep.subr.mxu0 %v11113_v37  ;;  %v11101_v20 = vld [vmem:[%s15324_s7 + $0x1030] sm:$0xff] }
 0x4ac   : > { %11633 = vmatpush3.msra.mxu1 %v11062_v3  ;;  %11662 = vmatpush3.msra.mxu0 %v11097_v11  ;;  %v11085_v3 = vld [vmem:[%s15324_s7 + $0xfb0] sm:$0xff]  ;;  %v9768_v11 = vrot.slane %v13498_v57, 3  ;;  %v11099_v57 = vld [vmem:[%s15324_s7 + $0x1020] sm:$0xff] }
 0x4ad   : > { %9994 = vmatprep.mubr.f32.mxu0 %v9771_v2  ;;  %11634 = vmatprep.subr.mxu1 %v11077_v53  ;;  %v11100_v53 = vld [vmem:[%s15324_s7 + $0x1028] sm:$0xff]  ;;  %v11145_v2 = vld [vmem:[%s15324_s7 + $0x1190] sm:$0xff] }
 0x4ae   : > { %11663 = vmatprep.subr.mxu0 %v11112_v29  ;;  %11635 = vmatpush3.msra.mxu1 %v11061_v21  ;;  %v11084_v29 = vld [vmem:[%s15324_s7 + $0xfa8] sm:$0xff]  ;;  %v11129_v21 = vld [vmem:[%s15324_s7 + $0x1110] sm:$0xff] }
 0x4af   : > { %11664 = vmatpush3.msra.mxu0 %v11096_v24  ;;  %11636 = vmatprep.subr.mxu1 %v11076_v36  ;;  %v9773_v24 = vrot.slane %v13533_v59, 3  ;;  %v11144_v36 = vld [vmem:[%s15324_s7 + $0x1188] sm:$0xff]  ;;  %v11143_v59 = vld [vmem:[%s15324_s7 + $0x1180] sm:$0xff] }
 0x4b0   : > { %11665 = vmatprep.subr.mxu0 %v11111_v0  ;;  %11637 = vmatpush3.msra.mxu1 %v11060_v52  ;;  %v11083_v0 = vld [vmem:[%s15324_s7 + $0xfa0] sm:$0xff]  ;;  %v11128_v52 = vld [vmem:[%s15324_s7 + $0x1108] sm:$0xff] }
 0x4b1   : > { %11666 = vmatpush3.msra.mxu0 %v11095_v48  ;;  %11638 = vmatprep.subr.mxu1 %v11075_v47  ;;  %v11098_v48 = vld [vmem:[%s15324_s7 + $0x1018] sm:$0xff] }
 0x4b2   : > { %11667 = vmatprep.subr.mxu0 %v11110_v31  ;;  %11639 = vmatpush3.msra.mxu1 %v11059_v44  ;;  %v11082_v47 = vld [vmem:[%s15324_s7 + $0xf98] sm:$0xff]  ;;  %v11127_v31 = vld [vmem:[%s15324_s7 + $0x1100] sm:$0xff]  ;;  %v9770_v44 = vrot.slane %v13729_v51, 3  ;;  %v11141_v51 = vld [vmem:[%s15324_s7 + $0x1170] sm:$0xff] }
 0x4b3   : > { %11668 = vmatpush3.msra.mxu0 %v11094_v12  ;;  %11640 = vmatprep.subr.mxu1 %v11074_v18  ;;  %v11142_v12 = vld [vmem:[%s15324_s7 + $0x1178] sm:$0xff] }
 0x4b4   : > { %11669 = vmatprep.subr.mxu0 %v11109_v61  ;;  %11641 = vmatpush3.msra.mxu1 %v11058_v28  ;;  %v11126_v18 = vld [vmem:[%s15324_s7 + $0x10f8] sm:$0xff]  ;;  %v11161_v61 = vld [vmem:[%s15324_s7 + $0x1210] sm:$0xff]  ;;  %v9775_v28 = vrot.slane %v13741_v33, 3  ;;  %v11124_v33 = vld [vmem:[%s15324_s7 + $0x10e8] sm:$0xff] }
 0x4b5   : > { %11670 = vmatpush3.msra.mxu0 %v11093_v30  ;;  %11642 = vmatprep.subr.mxu1 %v11073_v58  ;;  %v11125_v30 = vld [vmem:[%s15324_s7 + $0x10f0] sm:$0xff]  ;;  %v11160_v58 = vld [vmem:[%s15324_s7 + $0x1208] sm:$0xff] }
 0x4b6   : > { %11671 = vmatprep.subr.mxu0 %v11108_v4  ;;  %11643 = vmatpush3.msra.mxu1 %v11057_v39  ;;  %v11140_v4 = vld [vmem:[%s15324_s7 + $0x1168] sm:$0xff]  ;;  %v11159_v39 = vld [vmem:[%s15324_s7 + $0x1200] sm:$0xff] }
 0x4b7   : > { %11672 = vmatpush3.msra.mxu0 %v11092_v27  ;;  %11644 = vmatprep.subr.mxu1 %v11072_v35  ;;  %v11139_v27 = vld [vmem:[%s15324_s7 + $0x1160] sm:$0xff] }
 0x4b8   : > { %11673 = vmatprep.subr.mxu0 %v11107_v63  ;;  %11645 = vmatpush3.msra.mxu1 %v11056_v5  ;;  %v11343_v25 = vpop.f32.mrf.mxu1  ;;  %v11123_v35 = vld [vmem:[%s15324_s7 + $0x10e0] sm:$0xff]  ;;  %v11158_v63 = vld [vmem:[%s15324_s7 + $0x11f8] sm:$0xff] }
 0x4b9   : > { %11674 = vmatpush3.msra.mxu0 %v11091_v17  ;;  %11646 = vmatprep.subr.mxu1 %v11071_v46  ;;  %v11138_v5 = vld [vmem:[%s15324_s7 + $0x1158] sm:$0xff]  ;;  %v11157_v46 = vld [vmem:[%s15324_s7 + $0x11f0] sm:$0xff] }
 0x4ba   : > { %11675 = vmatprep.subr.mxu0 %v11106_v23  ;;  %11647 = vmatpush3.msra.mxu1 %v11055_v32  ;;  %v11344_v42 = vpop.f32.mrf.mxu1  ;;  %v11122_v17 = vld [vmem:[%s15324_s7 + $0x10d8] sm:$0xff]  ;;  %v11137_v23 = vld [vmem:[%s15324_s7 + $0x1150] sm:$0xff] }
 0x4bb   : > { %11676 = vmatpush3.msra.mxu0 %v11090_v49  ;;  %11648 = vmatprep.subr.mxu1 %v11070_v41  ;;  %v11345_v26 = vadd.f32 %v11344_v42, %v11343_v25  ;;  %v11121_v32 = vld [vmem:[%s15324_s7 + $0x10d0] sm:$0xff]  ;;  %v11156_v49 = vld [vmem:[%s15324_s7 + $0x11e8] sm:$0xff]  ;;  %v11154_v42 = vld [vmem:[%s15324_s7 + $0x11d8] sm:$0xff] }
 0x4bc   : > { %11677 = vmatprep.subr.mxu0 %v11105_v60  ;;  %11649 = vmatpush3.msra.mxu1 %v11054_v40  ;;  %v11136_v41 = vld [vmem:[%s15324_s7 + $0x1148] sm:$0xff]  ;;  %v11155_v60 = vld [vmem:[%s15324_s7 + $0x11e0] sm:$0xff] }
 0x4bd   : > { %11678 = vmatpush3.msra.mxu0 %v11089_v34  ;;  %11650 = vmatprep.subr.mxu1 %v11069_v9  ;;  %v11120_v25 = vld [vmem:[%s15324_s7 + $0x10c8] sm:$0xff]  ;;  %v11135_v40 = vld [vmem:[%s15324_s7 + $0x1140] sm:$0xff] }
 0x4be   : > { %11679 = vmatprep.subr.mxu0 %v11104_v50  ;;  %11651 = vmatpush3.msra.mxu1 %v11053_v38  ;;  %v8740_v14 = vpop.f32.mrf.mxu0  ;;  %v11119_v34 = vld [vmem:[%s15324_s7 + $0x10c0] sm:$0xff]  ;;  %v11134_v50 = vld [vmem:[%s15324_s7 + $0x1138] sm:$0xff] }
 0x4bf   : > { %11680 = vmatpush3.msra.mxu0 %v11088_v16  ;;  %11652 = vmatprep.subr.mxu1 %v11068_v54  ;;  %v8741_v43 = vadd.f32 %v8740_v14, %v14835_v8  ;;  %v11050_v8 = vld [vmem:[%s15324_s7 + $0xe98] sm:$0xff]  ;;  %v11153_v16 = vld [vmem:[%s15324_s7 + $0x11d0] sm:$0xff] }
 0x4c0   : > { %11681 = vmatprep.subr.mxu0 %v11103_v19  ;;  %11653 = vmatpush3.msra.mxu1 %v11052_v13  ;;  %v8742_v45 = vpop.f32.mrf.mxu0  ;;  %v11118_v38 = vld [vmem:[%s15324_s7 + $0x10b8] sm:$0xff]  ;;  %v11133_v54 = vld [vmem:[%s15324_s7 + $0x1130] sm:$0xff] }
 0x4c1   : > { %11682 = vmatpush3.msra.mxu0 %v11087_v55  ;;  %11654 = vmatprep.subr.mxu1 %v11067_v1  ;;  %v15025_v37 = vadd.f32 %v11345_v26, %v8741_v43  ;;  %v11117_v13 = vld [vmem:[%s15324_s7 + $0x10b0] sm:$0xff]  ;;  %v11152_v55 = vld [vmem:[%s15324_s7 + $0x11c8] sm:$0xff]  ;;  %v11131_v43 = vld [vmem:[%s15324_s7 + $0x1120] sm:$0xff] }
 0x4c2   : > { %11683 = vmatprep.subr.mxu0 %v11102_v15  ;;  %11655 = vmatpush3.msra.mxu1 %v11051_v22  ;;  %v11132_v1 = vld [vmem:[%s15324_s7 + $0x1128] sm:$0xff]  ;;  %v11151_v22 = vld [vmem:[%s15324_s7 + $0x11c0] sm:$0xff]  ;;  %v11150_v45 = vld [vmem:[%s15324_s7 + $0x11b8] sm:$0xff] }
 0x4c3   : > { %11684 = vmatpush3.msra.mxu0 %v11086_v56  ;;  %11656 = vmatprep.subr.mxu1 %v11066_v6  ;;  %v11116_v15 = vld [vmem:[%s15324_s7 + $0x10a8] sm:$0xff]  ;;  %v11115_v6 = vld [vmem:[%s15324_s7 + $0x10a0] sm:$0xff] }
 0x4c4   : > { %11685 = vmatprep.subr.mxu0 %v11101_v20  ;;  %11657 = vmatpush3.msra.mxu1 %v11050_v8  ;;  %v11130_v20 = vld [vmem:[%s15324_s7 + $0x1118] sm:$0xff] }
 0x4c5   : > { %11686 = vmatpush3.msra.mxu0 %v11085_v3  ;;  %9925 = vmatmul.mubr.f32.vlgmr.msra.gmra.mxu1 %v9768_v11  ;;  %v11149_v11 = vld [vmem:[%s15324_s7 + $0x11b0] sm:$0xff] }
 0x4c6   : > { %11687 = vmatprep.subr.mxu0 %v11100_v53  ;;  %11696 = vmatprep.subr.mxu1 %v11145_v2  ;;  %v9772_v53 = vrot.slane %v13704_v7, 3  ;;  %v11147_v7 = vld [vmem:[%s15324_s7 + $0x11a0] sm:$0xff] }
 0x4c7   : > { %11688 = vmatpush3.msra.mxu0 %v11084_v29  ;;  %11697 = vmatpush3.msra.mxu1 %v11129_v21  ;;  %v11148_v29 = vld [vmem:[%s15324_s7 + $0x11a8] sm:$0xff]  ;;  %v10145_v21 = vld [vmem:[%s15326_s9] sm:$0xff] }
 0x4c8   : > { %10064 = vmatprep.mubr.f32.mxu1 %v9773_v24  ;;  %11689 = vmatprep.subr.mxu0 %v11099_v57  ;;  %v10144_v57 = vld [vmem:[%s523_s23] sm:$0x1]  ;;  %v11146_v24 = vld [vmem:[%s15324_s7 + $0x1198] sm:$0xff] }
 0x4c9   : > { %11698 = vmatprep.subr.mxu1 %v11144_v36  ;;  %11690 = vmatpush3.msra.mxu0 %v11083_v0  ;;  %v11162_v36 = vld [vmem:[%s15324_s7 + $0x1218] sm:$0x7]  ;;  %v9774_v0 = vrot.slane %v13909_v10, 3 }
 0x4ca   : > { %11699 = vmatpush3.msra.mxu1 %v11128_v52  ;;  %11691 = vmatprep.subr.mxu0 %v11098_v48  ;;  %v10228_v10 = vld [vmem:[%s15329_s12 + $0x18] sm:$0xff] }
 0x4cb   : > { %11700 = vmatprep.subr.mxu1 %v11143_v59  ;;  %11692 = vmatpush3.msra.mxu0 %v11082_v47 }
 0x4cc   : > { %11701 = vmatpush3.msra.mxu1 %v11127_v31  ;;  %9995 = vmatmul.mubr.f32.vlgmr.msra.gmra.mxu0 %v9770_v44 }
 0x4cd   : > { %11702 = vmatprep.subr.mxu1 %v11142_v12  ;;  %10070 = vmatprep.subr.mxu0 %v14663_v62 }
 0x4ce   : > { %11703 = vmatpush3.msra.mxu1 %v11126_v18  ;;  %10071 = vmatpush1.msra.mxu0 %v11161_v61 }
 0x4cf   : > { %11164 = vmatprep.mubr.msk.f32.mxu0 %vm4388_vm10, %v9775_v28  ;;  %11704 = vmatprep.subr.mxu1 %v11141_v51  ;;  %v10227_v28 = vld [vmem:[%s15329_s12 + $0x10] sm:$0xff] }
 0x4d0   : > { %10072 = vmatprep.subr.mxu0 %v14663_v62  ;;  %11705 = vmatpush3.msra.mxu1 %v11125_v30  ;;  %v10226_v30 = vld [vmem:[%s15329_s12 + $0x8] sm:$0xff] }
 0x4d1   : > { %10073 = vmatpush1.msra.mxu0 %v11160_v58  ;;  %11706 = vmatprep.subr.mxu1 %v11140_v4  ;;  %v10225_v58 = vld [vmem:[%s15329_s12] sm:$0xff] }
 0x4d2   : > { %10074 = vmatprep.subr.mxu0 %v14663_v62  ;;  %11707 = vmatpush3.msra.mxu1 %v11124_v33 }
 0x4d3   : > { %10075 = vmatpush1.msra.mxu0 %v11159_v39  ;;  %11708 = vmatprep.subr.mxu1 %v11139_v27 }
 0x4d4   : > { %10076 = vmatprep.subr.mxu0 %v14663_v62  ;;  %11709 = vmatpush3.msra.mxu1 %v11123_v35 }
 0x4d5   : > { %10077 = vmatpush1.msra.mxu0 %v11158_v63  ;;  %11710 = vmatprep.subr.mxu1 %v11138_v5  ;;  %v10386_v63 = vld [vmem:[%s15331_s14 + $0x38] sm:$0xff] }
 0x4d6   : > { %10078 = vmatprep.subr.mxu0 %v14663_v62  ;;  %11711 = vmatpush3.msra.mxu1 %v11122_v17 }
 0x4d7   : > { %10079 = vmatpush1.msra.mxu0 %v11157_v46  ;;  %11712 = vmatprep.subr.mxu1 %v11137_v23 }
 0x4d8   : > { %10080 = vmatprep.subr.mxu0 %v14663_v62  ;;  %11713 = vmatpush3.msra.mxu1 %v11121_v32 }
 0x4d9   : > { %10081 = vmatpush1.msra.mxu0 %v11156_v49  ;;  %11714 = vmatprep.subr.mxu1 %v11136_v41  ;;  %v11378_v9 = vpop.f32.mrf.mxu1 }
 0x4da   : > { %10082 = vmatprep.subr.mxu0 %v14663_v62  ;;  %11715 = vmatpush3.msra.mxu1 %v11120_v25 }
 0x4db   : > { %10083 = vmatpush1.msra.mxu0 %v11155_v60  ;;  %11716 = vmatprep.subr.mxu1 %v11135_v40  ;;  %v11379_v26 = vpop.f32.mrf.mxu1 }
 0x4dc   : > { %10084 = vmatprep.subr.mxu0 %v14663_v62  ;;  %11717 = vmatpush3.msra.mxu1 %v11119_v34  ;;  %v11380_v19 = vadd.f32 %v11379_v26, %v11378_v9 }
 0x4dd   : > { %10085 = vmatpush1.msra.mxu0 %v11154_v42  ;;  %11718 = vmatprep.subr.mxu1 %v11134_v50 }
 0x4de   : > { %10086 = vmatprep.subr.mxu0 %v14663_v62  ;;  %11719 = vmatpush3.msra.mxu1 %v11118_v38  ;;  %v8886_v14 = vadd.f32 %v11380_v19, %v15025_v37  ;;  %v11114_v37 = vld [vmem:[%s15324_s7 + $0x1098] sm:$0xff] }
 0x4df   : > { %10087 = vmatpush1.msra.mxu0 %v11153_v16  ;;  %11720 = vmatprep.subr.mxu1 %v11133_v54 }
 0x4e0   : > { %10088 = vmatprep.subr.mxu0 %v14663_v62  ;;  %11721 = vmatpush3.msra.mxu1 %v11117_v13  ;;  %v11413_v56 = vpop.f32.mrf.mxu0 }
 0x4e1   : > { %10089 = vmatpush1.msra.mxu0 %v11152_v55  ;;  %11722 = vmatprep.subr.mxu1 %v11132_v1 }
 0x4e2   : > { %10090 = vmatprep.subr.mxu0 %v14663_v62  ;;  %11723 = vmatpush3.msra.mxu1 %v11116_v15  ;;  %v11414_v8 = vpop.f32.mrf.mxu0 }
 0x4e3   : > { %10091 = vmatpush1.msra.mxu0 %v11151_v22  ;;  %11724 = vmatprep.subr.mxu1 %v11131_v43  ;;  %v11415_v3 = vadd.f32 %v11414_v8, %v11413_v56  ;;  %v10141_v8 = vld [vmem:[%s15325_s8] sm:$0x1] }
 0x4e4   : > { %10092 = vmatprep.subr.mxu0 %v14663_v62  ;;  %11725 = vmatpush3.msra.mxu1 %v11115_v6 }
 0x4e5   : > { %10093 = vmatpush1.msra.mxu0 %v11150_v45  ;;  %11726 = vmatprep.subr.mxu1 %v11130_v20  ;;  %v8956_v2 = vadd.f32 %v11415_v3, %v8886_v14 }
 0x4e6   : > { %10094 = vmatprep.subr.mxu0 %v14663_v62  ;;  %11727 = vmatpush3.msra.mxu1 %v11114_v37 }
 0x4e7   : > { %10095 = vmatpush1.msra.mxu0 %v11149_v11  ;;  %10065 = vmatmul.mubr.f32.vlgmr.msra.gmra.mxu1 %v9772_v53  ;;  %v10146_v53 = vld [vmem:[%s15327_s10] sm:$0x1] }
 0x4e8   : > { %10096 = vmatprep.subr.mxu0 %v14663_v62  ;;  %11752 = vmatprep.subr.mxu1 %v14663_v62 }
 0x4e9   : > { %10097 = vmatpush1.msra.mxu0 %v11148_v29  ;;  %11753 = vmatpush3.msra.mxu1 %v10145_v21  ;;  %v10224_v29 = vld [vmem:[%s15328_s11 + $0x18] sm:$0xff] }
 0x4ea   : > { %10098 = vmatprep.subr.mxu0 %v14663_v62  ;;  %11754 = vmatprep.mubr.msk.f32.mxu1 %vm11857_vm2, %v14663_v62 }
 0x4eb   : > { %10099 = vmatpush1.msra.mxu0 %v11147_v7  ;;  %11755 = vmatmul.mubr.msk.f32.vlgmr.msra.gmra.mxu1 %vm4454_vm14, %v10144_v57  ;;  %v10223_v7 = vld [vmem:[%s15328_s11 + $0x10] sm:$0xff]  ;;  %v10222_v57 = vld [vmem:[%s15328_s11 + $0x8] sm:$0xff] }
 0x4ec   : > { %10100 = vmatprep.subr.mxu0 %v14663_v62  ;;  %11757 = vmatprep.subr.mxu1 %v14663_v62 }
 0x4ed   : > { %10101 = vmatpush1.msra.mxu0 %v11146_v24  ;;  %11765 = vmatprep.mubr.msk.f32.mxu1 %vm11857_vm2, %v14663_v62 }
 0x4ee   : > { %10132 = vmatprep.subr.mxu0 %v14663_v62  ;;  %11758 = vmatpush3.msra.mxu1 %v10228_v10 }
 0x4ef   : > { %11163 = vmatpush2.msk.msra.mxu0 %vm8390_vm0, %v11162_v36  ;;  %11759 = vmatprep.subr.mxu1 %v14663_v62  ;;  %v10221_v36 = vld [vmem:[%s15328_s11] sm:$0xff] }
 0x4f0   : > { %10135 = vmatmul.mubr.f32.vlgmr.msra.gmra.mxu0 %v9774_v0  ;;  %11779 = vmatprep.subr.mxu0 %v14663_v62  ;;  %v10385_v0 = vld [vmem:[%s15331_s14 + $0x30] sm:$0xff] }
 0x4f1   : > { %11795 = vmatprep.mubr.msk.f32.mxu0 %vm11857_vm2, %v14663_v62  ;;  %11760 = vmatpush3.msra.mxu1 %v10227_v28 }
 0x4f2   : > { %11761 = vmatprep.subr.mxu1 %v14663_v62  ;;  %11780 = vmatpush3.msra.mxu0 %v10386_v63 }
 0x4f3   : > { %11762 = vmatpush3.msra.mxu1 %v10226_v30  ;;  %11781 = vmatprep.subr.mxu0 %v14663_v62 }
 0x4f4   : > { %11763 = vmatprep.subr.mxu1 %v14663_v62  ;;  %11782 = vmatpush3.msra.mxu0 %v10385_v0 }
 0x4f5   : > { %11764 = vmatpush3.msra.mxu1 %v10225_v58 }
 0x4f6   : > { %11768 = vmatprep.subr.mxu1 %v14663_v62 }
 0x4fb   : > { %v11448_v52 = vpop.f32.mrf.mxu1 }
 0x4fd   : > { %v11449_v48 = vpop.f32.mrf.mxu1 }
 0x4fe   : > { %v11450_v59 = vadd.f32 %v11449_v48, %v11448_v52  ;;  %v11833_v52 = vld [vmem:[#allocation2] sm:$0xff]  ;;  %v10384_v48 = vld [vmem:[%s15331_s14 + $0x28] sm:$0xff] }
 0x4ff   : > { %11783 = vmatprep.subr.mxu0 %v11833_v52 }
 0x500   : > { %v9026_v47 = vadd.f32 %v11450_v59, %v8956_v2  ;;  %v10383_v59 = vld [vmem:[%s15331_s14 + $0x20] sm:$0xff]  ;;  %11784 = vmatpush3.msra.mxu0 %v10384_v48 }
 0x501   : > { %11785 = vmatprep.subr.mxu0 %v11833_v52 }
 0x502   : > { %11786 = vmatpush3.msra.mxu0 %v10383_v59 }
 0x503   : > { %11787 = vmatprep.subr.mxu0 %v11833_v52 }
 0x504   : > { %v9095_v31 = vpop.f32.mrf.mxu0 }
 0x505   : > { %v9096_v44 = vadd.f32 %v9095_v31, %v9026_v47  ;;  %v10381_v47 = vld [vmem:[%s15331_s14 + $0x10] sm:$0xff]  ;;  %v10380_v31 = vld [vmem:[%s15331_s14 + $0x8] sm:$0xff] }
 0x506   : > { %v9097_v12 = vpop.f32.mrf.mxu0 }
 0x51d   : > { %v11483_v18 = vpop.f32.mrf.mxu1 }
 0x51f   : > { %v11484_v61 = vpop.f32.mrf.mxu1 }
 0x520   : > { %v11485_v51 = vadd.f32 %v11484_v61, %v11483_v18 }
 0x526   : > { %v11518_v4 = vpop.f32.mrf.mxu0 }
 0x528   : > { %v11519_v33 = vpop.f32.mrf.mxu0 }
 0x529   : > { %v11520_v39 = vadd.f32 %v11519_v33, %v11518_v4  ;;  %v10387_v4 = vld [vmem:[%s15332_s15] sm:$0x1] }
 0x52b   : > { %v9406_v5 = vadd.f32 %v11520_v39, %v11485_v51  ;;  %v10376_v51 = vld [vmem:[%s15330_s13] sm:$0x1] }
 0x53f   : > { %v11553_v27 = vpop.f32.mrf.mxu1 }
 0x541   : > { %v11554_v35 = vpop.f32.mrf.mxu1 }
 0x542   : > { %v11555_v17 = vadd.f32 %v11554_v35, %v11553_v27 }
 0x544   : > { %v9476_v46 = vadd.f32 %v11555_v17, %v9406_v5 }
 0x548   : > { %v11588_v23 = vpop.f32.mrf.mxu0 }
 0x54a   : > { %v11589_v32 = vpop.f32.mrf.mxu0 }
 0x54b   : > { %v11590_v49 = vadd.f32 %v11589_v32, %v11588_v23 }
 0x54d   : > { %v9546_v41 = vadd.f32 %v11590_v49, %v9476_v46 }
 0x563   : > { %v9615_v25 = vpop.f32.mrf.mxu1 }
 0x564   : > { %v9616_v60 = vadd.f32 %v9615_v25, %v9546_v41 }
 0x565   : > { %v9617_v40 = vpop.f32.mrf.mxu1 }
 0x566   : > { %v9619_v34 = vadd.f32 %v9616_v60, %v9096_v44  ;;  %v10379_v44 = vld [vmem:[%s15331_s14] sm:$0xff] }
 0x56a   : > { %v11623_v9 = vpop.f32.mrf.mxu0 }
 0x56c   : > { %v11624_v42 = vpop.f32.mrf.mxu0 }
 0x56d   : > { %v11625_v13 = vadd.f32 %v11624_v42, %v11623_v9 }
 0x585   : > { %v11658_v50 = vpop.f32.mrf.mxu1 }
 0x587   : > { %v11659_v26 = vpop.f32.mrf.mxu1 }
 0x588   : > { %v11660_v54 = vadd.f32 %v11659_v26, %v11658_v50 }
 0x58a   : > { %v9927_v14 = vadd.f32 %v11660_v54, %v11625_v13 }
 0x58c   : > { %v11693_v38 = vpop.f32.mrf.mxu0 }
 0x58e   : > { %v11694_v16 = vpop.f32.mrf.mxu0 }
 0x58f   : > { %v11695_v55 = vadd.f32 %v11694_v16, %v11693_v38 }
 0x591   : > { %v9997_v43 = vadd.f32 %v11695_v55, %v9927_v14 }
 0x5a7   : > { %v11728_v19 = vpop.f32.mrf.mxu1 }
 0x5a9   : > { %v11729_v1 = vpop.f32.mrf.mxu1 }
 0x5aa   : > { %v11730_v15 = vadd.f32 %v11729_v1, %v11728_v19 }
 0x5ab   : > { %v10216_v22 = vpop.f32.mrf.mxu1 }
 0x5ac   : > { %v10067_v6 = vadd.f32 %v11730_v15, %v9997_v43  ;;  %v10217_v21 = vadd.f32 %v10216_v22, %v10146_v53 }
 0x5ad   : > { %v11756_v56 = vpop.f32.mrf.mxu1 }
 0x5ae   : > { %v10220_v24 = vmax.f32 %v10217_v21, 0.0 }
 0x5b0   : > { %v10136_v45 = vpop.f32.mrf.mxu0 }
 0x5b1   : > { %v10137_v20 = vadd.f32 %v10136_v45, %v10067_v6 }
 0x5b2   : > { %v10138_v37 = vpop.f32.mrf.mxu0 }
 0x5b3   : > { %v10140_v3 = vadd.f32 %v10137_v20, %v9619_v34 }
 0x5b5   : > { %v10142_v11 = vadd.f32 %v10141_v8, %v10140_v3 }
 0x5b7   : > { %v10143_v2 = vmax.f32 %v10142_v11, 0.0 }
 0x5b9   : > { %11766 = vmatmul.mubr.msk.f32.vlgmr.msra.gmra.mxu1 %vm10229_vm3, %v10143_v2 }
 0x5ba   : > { %11769 = vmatpush3.msra.mxu1 %v10224_v29  ;;  %11776 = vmatprep.mubr.msk.f32.mxu1 %vm11857_vm2, %v14663_v62 }
 0x5bb   : > { %11770 = vmatprep.subr.mxu1 %v14663_v62 }
 0x5bc   : > { %11771 = vmatpush3.msra.mxu1 %v10223_v7 }
 0x5bd   : > { %11772 = vmatprep.subr.mxu1 %v14663_v62 }
 0x5be   : > { %11773 = vmatpush3.msra.mxu1 %v10222_v57 }
 0x5bf   : > { %11774 = vmatprep.subr.mxu1 %v14663_v62  ;;  %v10382_v62 = vld [vmem:[%s15331_s14 + $0x18] sm:$0xff] }
 0x5c0   : > { %11775 = vmatpush3.msra.mxu1 %v10221_v36  ;;  %11788 = vmatpush3.msra.mxu0 %v10382_v62 }
 0x5c1   : > { %11777 = vmatmul.mubr.msk.f32.vlgmr.msra.gmra.mxu1 %vm10229_vm3, %v10220_v24  ;;  %11789 = vmatprep.subr.mxu0 %v11833_v52 }
 0x5c2   : > { %11790 = vmatpush3.msra.mxu0 %v10381_v47 }
 0x5c3   : > { %11791 = vmatprep.subr.mxu0 %v11833_v52 }
 0x5c4   : > { %11792 = vmatpush3.msra.mxu0 %v10380_v31 }
 0x5c5   : > { %11793 = vmatprep.subr.mxu0 %v11833_v52 }
 0x5c6   : > { %11794 = vmatpush3.msra.mxu0 %v10379_v44 }
 0x679   : > { %v10299_v12 = vpop.f32.mrf.mxu1 }
 0x67b   : > { %v11767_v18 = vpop.f32.mrf.mxu1 }
 0x681   : > { %v10372_v61 = vpop.f32.mrf.mxu1 }
 0x682   : > { %v10373_v10 = vadd.f32 %v10372_v61, %v10299_v12 }
 0x683   : > { %v11778_v28 = vpop.f32.mrf.mxu1 }
 0x684   : > { %v10377_v30 = vadd.f32 %v10376_v51, %v10373_v10 }
 0x686   : > { %v10378_v58 = vmax.f32 %v10377_v30, 0.0 }
 0x688   : > { %11796 = vmatmul.mubr.msk.f32.vlgmr.msra.gmra.mxu0 %vm10388_vm4, %v10378_v58 }
 0x748   : > { %v10458_v33 = vpop.f32.mrf.mxu0 }
 0x749   : > { %v10459_v39 = vadd.f32 %v10458_v33, %v10387_v4 }
 0x74a   : > { %v11797_v27 = vpop.f32.mrf.mxu0 }
 0x74b   : > { %10463 = vst.msk [vmem:[%s531_s24] sm:$0x1] %vm10462_vm5, %v10459_v39 }
 0x74c PF: > { %s26_s21 = sadd.s32 1, %s11840_s21  }
 0x74d   : > { %p23_p4 = scmp.ge.s32.totalorder %s26_s21, 4  }
 0x74f   :  { %25 = sbr.rel (!%p23_p4) target bundleno = 2 (0x2), region = 136 }

</bundles_post_ra>
